<compile_context>
chip_gen: v7x
topology: tpu7x:2x2x1
jax: 0.10.0
libtpu: 0.0.40
codegen_flags: <defaults>
</compile_context>

<pallas_src>
import numpy as np
import jax
import jax.numpy as jnp
from jax import lax
from jax.experimental import pallas as pl
from jax.experimental.pallas import tpu as pltpu

LANE = 128
SUB = 8


def _round_up(x, m):
    return (x + m - 1) // m * m


def _pad2(a, r, c):
    return jnp.pad(a, ((0, r - a.shape[0]), (0, c - a.shape[1])))


# ------------------------- CSR edge preprocessing (host, once) -------------------------

def build_csr(src, tgt, n_pad, tm, te):
    """Sort edges by target; pad each node-tile segment to a te multiple.

    Returns (eb_flat, nsteps, tgt_csr, src_csr, max_steps):
      eb_flat[i*max_steps + k] : edge-tile block index visited by node tile i at
                                 reduction step k (clamped; guarded by nsteps)
      nsteps[i]                : number of real edge tiles for node tile i
      tgt_csr : (1, E_csr) int32 targets (padded entries = -1, never match)
      src_csr : (E_csr,)   int32 sources (padded entries = 0, harmless: skipped)
    Requires concrete (host-visible) edge_index; done once, reused by all layers.
    """
    src = np.asarray(src, np.int32)
    tgt = np.asarray(tgt, np.int32)
    n_tiles = n_pad // tm
    order = np.argsort(tgt, kind="stable")
    tgt_s, src_s = tgt[order], src[order]
    counts = np.bincount(tgt_s // tm, minlength=n_tiles).astype(np.int64)
    nsteps = -(-counts // te)                                # ceil-div, may be 0
    max_steps = max(int(nsteps.max()), 1)
    total_tiles = max(int(nsteps.sum()), 1)
    e_csr = total_tiles * te
    tgt_csr = np.full((e_csr,), -1, np.int32)
    src_csr = np.zeros((e_csr,), np.int32)
    offs = np.zeros((n_tiles,), np.int64)
    pe = 0   # cursor into sorted edges
    pt = 0   # cursor into padded edge tiles
    for i in range(n_tiles):
        offs[i] = pt
        c = int(counts[i])
        tgt_csr[pt * te: pt * te + c] = tgt_s[pe:pe + c]
        src_csr[pt * te: pt * te + c] = src_s[pe:pe + c]
        pe += c
        pt += int(nsteps[i])
    eb = offs[:, None] + np.minimum(np.arange(max_steps)[None, :],
                                    np.maximum(nsteps[:, None] - 1, 0))
    eb = np.clip(eb, 0, total_tiles - 1).astype(np.int32)
    return (jnp.asarray(eb.reshape(-1)),
            jnp.asarray(nsteps.astype(np.int32)),
            jnp.asarray(tgt_csr).reshape(1, e_csr),
            jnp.asarray(src_csr),
            max_steps)


# ----------------------------- Pallas kernels -----------------------------

def _gin_layer_kernel(eb_ref, ns_ref, tgt_ref, x_ref, xsrc_ref,
                      w1_ref, b1_ref, w2_ref, b2_ref, o_ref, acc_ref):
    # Fused GINConv: scatter-add over this node tile's CSR edge tiles into a
    # resident f32 accumulator, then Lin1/ReLU/Lin2/ReLU epilogue on the last
    # reduction step. bf16 MXU operands, f32 accumulation, f32 bias/ReLU math.
    i = pl.program_id(0)
    k = pl.program_id(1)
    tm = acc_ref.shape[0]

    @pl.when(k == 0)
    def _():
        # eps = 0 -> the self term seeds the neighbourhood sum.
        acc_ref[...] = x_ref[...].astype(jnp.float32)

    @pl.when(k < ns_ref[i])
    def _():
        te = xsrc_ref.shape[0]
        # Loop-invariant local iota; subtract the tile offset from the (1, te)
        # target row (2 vregs of scalar work) instead of offsetting the iota.
        row = lax.broadcasted_iota(jnp.int32, (tm, te), 0)
        onehot = (row == (tgt_ref[...] - i * tm)).astype(jnp.bfloat16)
        acc_ref[...] += jnp.dot(onehot, xsrc_ref[...],
                                preferred_element_type=jnp.float32)

    @pl.when(k == pl.num_programs(1) - 1)
    def _():
        h = acc_ref[...].astype(jnp.bfloat16)
        h = jnp.dot(h, w1_ref[...], preferred_element_type=jnp.float32) + b1_ref[...]
        h = jnp.maximum(h, 0.0).astype(jnp.bfloat16)
        h = jnp.dot(h, w2_ref[...], preferred_element_type=jnp.float32) + b2_ref[...]
        o_ref[...] = jnp.maximum(h, 0.0).astype(o_ref.dtype)


def gin_layer_fused(eb, ns, tgt_csr, x, x_src, lp, tm, te, max_steps):
    n_pad, fin = x.shape
    fout = lp["w2"].shape[1]
    n_tiles = n_pad // tm

    def edge_map(i, k, eb, ns):
        return (eb[i * max_steps + k], 0)

    def tgt_map(i, k, eb, ns):
        return (0, eb[i * max_steps + k])

    def const_map(i, k, eb, ns):
        return (0, 0)

    return pl.pallas_call(
        _gin_layer_kernel,
        out_shape=jax.ShapeDtypeStruct((n_pad, fout), jnp.bfloat16),
        grid_spec=pltpu.PrefetchScalarGridSpec(
            num_scalar_prefetch=2,
            grid=(n_tiles, max_steps),           # reduction (edge) axis last
            in_specs=[
                pl.BlockSpec((1, te), tgt_map),
                pl.BlockSpec((tm, fin), lambda i, k, eb, ns: (i, 0)),
                pl.BlockSpec((te, fin), edge_map),
                pl.BlockSpec(lp["w1"].shape, const_map),
                pl.BlockSpec(lp["b1"].shape, const_map),
                pl.BlockSpec(lp["w2"].shape, const_map),
                pl.BlockSpec(lp["b2"].shape, const_map),
            ],
            out_specs=pl.BlockSpec((tm, fout), lambda i, k, eb, ns: (i, 0)),
            scratch_shapes=[pltpu.VMEM((tm, fin), jnp.float32)]),
        compiler_params=pltpu.CompilerParams(
            dimension_semantics=("parallel", "arbitrary")),
    )(eb, ns, tgt_csr, x, x_src, lp["w1"], lp["b1"], lp["w2"], lp["b2"])


def _pool_lin_kernel(batch_ref, x_ref, wl_ref, bl_ref, o_ref, sum_ref, cnt_ref):
    # global_mean_pool accumulated over node tiles; Linear fused in the epilogue.
    s = pl.program_id(0)

    @pl.when(s == 0)
    def _():
        sum_ref[...] = jnp.zeros_like(sum_ref)
        cnt_ref[...] = jnp.zeros_like(cnt_ref)

    gp = sum_ref.shape[0]
    tn = x_ref.shape[0]
    gid = lax.broadcasted_iota(jnp.int32, (gp, tn), 0)
    m = gid == batch_ref[...]                                  # (gp, tn) bool
    sum_ref[...] += jnp.dot(m.astype(jnp.bfloat16), x_ref[...],
                            preferred_element_type=jnp.float32)
    cnt_ref[...] += jnp.sum(m.astype(jnp.float32), axis=1, keepdims=True)

    @pl.when(s == pl.num_programs(0) - 1)
    def _():
        cnt = jnp.max(cnt_ref[...], axis=1, keepdims=True)     # all lanes equal
        mean = sum_ref[...] * pl.reciprocal(jnp.maximum(cnt, 1.0), approx=True)
        # TODO(synk): F.dropout(p=0.5) is identity here (eval mode); training-mode RNG dropout omitted.
        o_ref[...] = jnp.dot(mean.astype(jnp.bfloat16), wl_ref[...],
                             preferred_element_type=jnp.float32) + bl_ref[...]


def pool_lin(batch_ids, x, wl, bl, num_graphs, tn):
    n_pad, feat = x.shape
    p = wl.shape[1]
    gp = _round_up(max(num_graphs, SUB), SUB)
    return pl.pallas_call(
        _pool_lin_kernel,
        out_shape=jax.ShapeDtypeStruct((gp, p), jnp.float32),
        grid=(n_pad // tn,),
        in_specs=[pl.BlockSpec((1, tn), lambda s: (0, s)),
                  pl.BlockSpec((tn, feat), lambda s: (s, 0)),
                  pl.BlockSpec(wl.shape, lambda s: (0, 0)),
                  pl.BlockSpec(bl.shape, lambda s: (0, 0))],
        out_specs=pl.BlockSpec((gp, p), lambda s: (0, 0)),
        scratch_shapes=[pltpu.VMEM((gp, feat), jnp.float32),
                        pltpu.VMEM((gp, LANE), jnp.float32)],
        compiler_params=pltpu.CompilerParams(dimension_semantics=("arbitrary",)),
    )(batch_ids, x, wl, bl)


# ----------------------------- parameters -----------------------------

def _linear_params(key, din, dout):
    # torch.nn.Linear default init, weight stored (in, out) so y = x @ W + b.
    kw, kb = jax.random.split(key)
    bound = float(1.0 / (din ** 0.5))
    w = jax.random.uniform(kw, (din, dout), jnp.float32, -bound, bound)
    b = jax.random.uniform(kb, (1, dout), jnp.float32, -bound, bound)
    return w, b


def init_params(key, n_f, hidden, n_hlin, n_pred, n_layers):
    # GINlayers.forward only uses convs[0 .. n_layers-1]; the extra convs the
    # ctor builds (hidden->hidden, hidden->n_hlin) are dead weights -> omitted.
    keys = jax.random.split(key, 2 * n_layers + 1)
    convs = []
    din = n_f
    for i in range(n_layers):
        w1, b1 = _linear_params(keys[2 * i], din, hidden)
        w2, b2 = _linear_params(keys[2 * i + 1], hidden, hidden)
        convs.append(((w1, b1), (w2, b2)))
        din = hidden
    lin = _linear_params(keys[-1], n_hlin, n_pred)   # requires n_hlin == hidden
    return {"convs": convs, "lin": lin}


def pad_params(params):
    # Pad every weight/bias to 128-lane multiples ONCE and cast weights to
    # bf16 (MXU-native); biases stay f32 (bias-add / ReLU done in f32).
    convs = []
    for (w1, b1), (w2, b2) in params["convs"]:
        i_pad = _round_up(w1.shape[0], LANE)
        h_pad = _round_up(w1.shape[1], LANE)
        o_pad = _round_up(w2.shape[1], LANE)
        convs.append(dict(
            w1=_pad2(w1, i_pad, h_pad).astype(jnp.bfloat16),
            b1=_pad2(b1, 1, h_pad),
            w2=_pad2(w2, h_pad, o_pad).astype(jnp.bfloat16),
            b2=_pad2(b2, 1, o_pad)))
    wl, bl = params["lin"]
    li = _round_up(wl.shape[0], LANE)
    lo = _round_up(wl.shape[1], LANE)
    return {"convs": convs,
            "lin_w": _pad2(wl, li, lo).astype(jnp.bfloat16),
            "lin_b": _pad2(bl, 1, lo),
            "n_pred": int(wl.shape[1])}


# ----------------------------- forward pass -----------------------------

def gin_layers_forward(pparams, x, edge_index, batch, num_graphs, *, tm=512, te=512):
    n, n_f = x.shape
    f0 = pparams["convs"][0]["w1"].shape[0]
    n_pad = _round_up(n, tm)

    # CSR edge preprocessing on the host (edge structure reused by every layer).
    eb, ns, tgt_csr, src_csr, max_steps = build_csr(
        edge_index[0], edge_index[1], n_pad, tm, te)

    # Pad once: nodes to a row-tile multiple, features to 128 lanes. Activations
    # are carried in bf16 (f32 accumulation happens inside the kernels). Padded
    # nodes get batch = -1 and padded edges tgt = -1 -> never match the iota.
    h = jnp.pad(jnp.asarray(x, jnp.float32),
                ((0, n_pad - n), (0, f0 - n_f))).astype(jnp.bfloat16)
    batch_ids = jnp.pad(jnp.asarray(batch, jnp.int32), (0, n_pad - n),
                        constant_values=-1).reshape(1, n_pad)

    for lp in pparams["convs"]:
        # GINConv message x_j = x[src]: the 128-lane row gather stays in XLA,
        # scatter-add + MLP run as one fused Pallas kernel.
        x_src = h[src_csr]                                       # (E_csr, F) bf16
        h = gin_layer_fused(eb, ns, tgt_csr, h, x_src, lp, tm, te, max_steps)

    # global_mean_pool + dropout(identity) + Linear fused in one kernel.
    out = pool_lin(batch_ids, h, pparams["lin_w"], pparams["lin_b"],
                   num_graphs, tm)
    return out[:num_graphs, :pparams["n_pred"]]


# ----------------------------- pure-JAX reference -----------------------------

def reference(params, x, edge_index, batch, num_graphs):
    src, tgt = edge_index[0], edge_index[1]
    h = x
    for (w1, b1), (w2, b2) in params["convs"]:
        aggr = jax.ops.segment_sum(h[src], tgt, num_segments=h.shape[0])
        z = h + aggr                                   # eps = 0
        z = jnp.maximum(z @ w1 + b1, 0.0)
        z = z @ w2 + b2
        h = jnp.maximum(z, 0.0)
    sums = jax.ops.segment_sum(h, batch, num_segments=num_graphs)
    cnts = jax.ops.segment_sum(jnp.ones((h.shape[0],), jnp.float32), batch,
                               num_segments=num_graphs)
    pooled = sums / cnts[:, None]
    wl, bl = params["lin"]
    return pooled @ wl + bl


if __name__ == "__main__":
    # Small shapes consistent with the module's forward.
    # Note: GINlayers.forward only works if n_hlin == hidden_channels
    # (pooled features are hidden_channels-wide when fed to self.lin).
    n_f, hidden, n_hlin, n_pred, n_layers = 4, 32, 32, 2, 3
    N, E, G = 12, 24, 2

    key = jax.random.PRNGKey(0)
    kp, kx, ks, kt = jax.random.split(key, 4)

    params = init_params(kp, n_f, hidden, n_hlin, n_pred, n_layers)
    pparams = pad_params(params)

    x = jax.random.normal(kx, (N, n_f), jnp.float32)
    src = jax.random.randint(ks, (E,), 0, N, dtype=jnp.int32)
    tgt = (src + 1 + jax.random.randint(kt, (E,), 0, N - 1, dtype=jnp.int32)) % N
    edge_index = jnp.stack([src, tgt], axis=0)
    batch = jnp.concatenate([jnp.zeros(N // 2, jnp.int32),
                             jnp.ones(N - N // 2, jnp.int32)])

    out = gin_layers_forward(pparams, x, edge_index, batch, G)
    out = jax.block_until_ready(out)

    ref = reference(params, x, edge_index, batch, G)
    assert out.shape == (G, n_pred)
    # bf16 operands / bf16-carried activations with f32 accumulation ->
    # loosened tolerance vs the f32 reference (structural errors would be O(1)).
    assert jnp.allclose(out, ref, rtol=5e-2, atol=5e-2), (out, ref)

    print("KERNEL_OK")
</pallas_src>

<mosaic_0001>
module attributes {stable_mosaic.version = 11 : i64} {
  func.func @_gin_layer_kernel(%arg0: i32, %arg1: i32, %arg2: memref<1xi32, #tpu.memory_space<smem>>, %arg3: memref<1xi32, #tpu.memory_space<smem>>, %arg4: memref<1x512xi32, #tpu.memory_space<vmem>>, %arg5: memref<512x128xbf16, #tpu.memory_space<vmem>>, %arg6: memref<512x128xbf16, #tpu.memory_space<vmem>>, %arg7: memref<128x128xbf16, #tpu.memory_space<vmem>>, %arg8: memref<1x128xf32, #tpu.memory_space<vmem>>, %arg9: memref<128x128xbf16, #tpu.memory_space<vmem>>, %arg10: memref<1x128xf32, #tpu.memory_space<vmem>>, %arg11: memref<512x128xbf16, #tpu.memory_space<vmem>>, %arg12: memref<512x128xf32, #tpu.memory_space<vmem>>) attributes {dimension_semantics = [#tpu.dimension_semantics<parallel>, #tpu.dimension_semantics<arbitrary>], iteration_bounds = array<i64: 1, 1>, scalar_prefetch = 2 : i64, scratch_operands = 1 : i64, tpu.core_type = #tpu.core_type<tc>, window_params = [{transform_indices = @transform_0, window_bounds = array<i64: 1, 512>}, {transform_indices = @transform_1, window_bounds = array<i64: 512, 128>}, {transform_indices = @transform_2, window_bounds = array<i64: 512, 128>}, {pipeline_mode = #tpu.pipeline_mode<synchronous>, transform_indices = @transform_3, window_bounds = array<i64: 128, 128>}, {pipeline_mode = #tpu.pipeline_mode<synchronous>, transform_indices = @transform_4, window_bounds = array<i64: 1, 128>}, {pipeline_mode = #tpu.pipeline_mode<synchronous>, transform_indices = @transform_5, window_bounds = array<i64: 128, 128>}, {pipeline_mode = #tpu.pipeline_mode<synchronous>, transform_indices = @transform_6, window_bounds = array<i64: 1, 128>}, {transform_indices = @transform_7, window_bounds = array<i64: 512, 128>}]} {
    %c0_i32 = arith.constant 0 : i32
    %0 = arith.cmpi eq, %arg1, %c0_i32 : i32
    %1 = arith.extui %0 : i1 to i32
    %c0_i32_0 = arith.constant 0 : i32
    %2 = arith.cmpi ne, %1, %c0_i32_0 : i32
    scf.if %2 {
      %c0 = arith.constant 0 : index
      %c0_4 = arith.constant 0 : index
      %11 = vector.load %arg5[%c0, %c0_4] : memref<512x128xbf16, #tpu.memory_space<vmem>>, vector<512x128xbf16>
      %12 = arith.extf %11 : vector<512x128xbf16> to vector<512x128xf32>
      %c0_5 = arith.constant 0 : index
      %c0_6 = arith.constant 0 : index
      %13 = vector.load %arg12[%c0_5, %c0_6] : memref<512x128xf32, #tpu.memory_space<vmem>>, vector<512x128xf32>
      tpu.vector_store %arg12[%c0_5, %c0_6], %12 {strides = array<i32>} : memref<512x128xf32, #tpu.memory_space<vmem>>, vector<512x128xf32>,
    } else {
    }
    %3 = arith.index_cast %arg0 : i32 to index
    %4 = memref.load %arg3[%3] : memref<1xi32, #tpu.memory_space<smem>>
    %5 = arith.cmpi slt, %arg1, %4 : i32
    %6 = arith.extui %5 : i1 to i32
    %c0_i32_1 = arith.constant 0 : i32
    %7 = arith.cmpi ne, %6, %c0_i32_1 : i32
    scf.if %7 {
      %11 = tpu.iota {dimensions = array<i32: 0>} : vector<512x512xi32>
      %c0 = arith.constant 0 : index
      %c0_4 = arith.constant 0 : index
      %12 = vector.load %arg4[%c0, %c0_4] : memref<1x512xi32, #tpu.memory_space<vmem>>, vector<1x512xi32>
      %c512_i32 = arith.constant 512 : i32
      %13 = arith.muli %arg0, %c512_i32 : i32
      %14 = vector.broadcast %13 : i32 to vector<1x512xi32>
      %15 = arith.subi %12, %14 : vector<1x512xi32>
      %16 = vector.broadcast %15 : vector<1x512xi32> to vector<512x512xi32>
      %17 = arith.cmpi eq, %11, %16 : vector<512x512xi32>
      %18 = arith.extui %17 : vector<512x512xi1> to vector<512x512xi32>
      %19 = arith.sitofp %18 : vector<512x512xi32> to vector<512x512xf32>
      %20 = arith.truncf %19 : vector<512x512xf32> to vector<512x512xbf16>
      %c0_5 = arith.constant 0 : index
      %c0_6 = arith.constant 0 : index
      %21 = vector.load %arg12[%c0_5, %c0_6] : memref<512x128xf32, #tpu.memory_space<vmem>>, vector<512x128xf32>
      %c0_7 = arith.constant 0 : index
      %c0_8 = arith.constant 0 : index
      %22 = vector.load %arg6[%c0_7, %c0_8] : memref<512x128xbf16, #tpu.memory_space<vmem>>, vector<512x128xbf16>
      %cst = arith.constant dense<0.000000e+00> : vector<512x128xf32>
      %23 = tpu.matmul %20, %22, %cst {dimension_numbers = #tpu.dot_dimension_numbers<[1], [0], [0], [1], [0, 0, 1, 1], [], []>} : vector<512x512xbf16>, vector<512x128xbf16>, vector<512x128xf32> -> vector<512x128xf32>
      %24 = arith.addf %21, %23 : vector<512x128xf32>
      %c0_9 = arith.constant 0 : index
      %c0_10 = arith.constant 0 : index
      %25 = vector.load %arg12[%c0_9, %c0_10] : memref<512x128xf32, #tpu.memory_space<vmem>>, vector<512x128xf32>
      tpu.vector_store %arg12[%c0_9, %c0_10], %24 {strides = array<i32>} : memref<512x128xf32, #tpu.memory_space<vmem>>, vector<512x128xf32>,
    } else {
    }
    %c0_i32_2 = arith.constant 0 : i32
    %8 = arith.cmpi eq, %arg1, %c0_i32_2 : i32
    %9 = arith.extui %8 : i1 to i32
    %c0_i32_3 = arith.constant 0 : i32
    %10 = arith.cmpi ne, %9, %c0_i32_3 : i32
    scf.if %10 {
      %c0 = arith.constant 0 : index
      %c0_4 = arith.constant 0 : index
      %11 = vector.load %arg12[%c0, %c0_4] : memref<512x128xf32, #tpu.memory_space<vmem>>, vector<512x128xf32>
      %12 = arith.truncf %11 : vector<512x128xf32> to vector<512x128xbf16>
      %c0_5 = arith.constant 0 : index
      %c0_6 = arith.constant 0 : index
      %13 = vector.load %arg7[%c0_5, %c0_6] : memref<128x128xbf16, #tpu.memory_space<vmem>>, vector<128x128xbf16>
      %cst = arith.constant dense<0.000000e+00> : vector<512x128xf32>
      %14 = tpu.matmul %12, %13, %cst {dimension_numbers = #tpu.dot_dimension_numbers<[1], [0], [0], [1], [0, 0, 1, 1], [], []>} : vector<512x128xbf16>, vector<128x128xbf16>, vector<512x128xf32> -> vector<512x128xf32>
      %c0_7 = arith.constant 0 : index
      %c0_8 = arith.constant 0 : index
      %15 = vector.load %arg8[%c0_7, %c0_8] : memref<1x128xf32, #tpu.memory_space<vmem>>, vector<1x128xf32>
      %16 = vector.broadcast %15 : vector<1x128xf32> to vector<512x128xf32>
      %17 = arith.addf %14, %16 : vector<512x128xf32>
      %cst_9 = arith.constant 0.000000e+00 : f32
      %18 = vector.broadcast %cst_9 : f32 to vector<512x128xf32>
      %19 = arith.maximumf %17, %18 : vector<512x128xf32>
      %20 = arith.truncf %19 : vector<512x128xf32> to vector<512x128xbf16>
      %c0_10 = arith.constant 0 : index
      %c0_11 = arith.constant 0 : index
      %21 = vector.load %arg9[%c0_10, %c0_11] : memref<128x128xbf16, #tpu.memory_space<vmem>>, vector<128x128xbf16>
      %cst_12 = arith.constant dense<0.000000e+00> : vector<512x128xf32>
      %22 = tpu.matmul %20, %21, %cst_12 {dimension_numbers = #tpu.dot_dimension_numbers<[1], [0], [0], [1], [0, 0, 1, 1], [], []>} : vector<512x128xbf16>, vector<128x128xbf16>, vector<512x128xf32> -> vector<512x128xf32>
      %c0_13 = arith.constant 0 : index
      %c0_14 = arith.constant 0 : index
      %23 = vector.load %arg10[%c0_13, %c0_14] : memref<1x128xf32, #tpu.memory_space<vmem>>, vector<1x128xf32>
      %24 = vector.broadcast %23 : vector<1x128xf32> to vector<512x128xf32>
      %25 = arith.addf %22, %24 : vector<512x128xf32>
      %cst_15 = arith.constant 0.000000e+00 : f32
      %26 = vector.broadcast %cst_15 : f32 to vector<512x128xf32>
      %27 = arith.maximumf %25, %26 : vector<512x128xf32>
      %28 = arith.truncf %27 : vector<512x128xf32> to vector<512x128xbf16>
      %c0_16 = arith.constant 0 : index
      %c0_17 = arith.constant 0 : index
      %29 = vector.load %arg11[%c0_16, %c0_17] : memref<512x128xbf16, #tpu.memory_space<vmem>>, vector<512x128xbf16>
      tpu.vector_store %arg11[%c0_16, %c0_17], %28 {strides = array<i32>} : memref<512x128xbf16, #tpu.memory_space<vmem>>, vector<512x128xbf16>,
    } else {
    }
    return
  }
  func.func @transform_0(%arg0: i32, %arg1: i32, %arg2: memref<1xi32, #tpu.memory_space<smem>>, %arg3: memref<1xi32, #tpu.memory_space<smem>>) -> (i32, i32) {
    %c1_i32 = arith.constant 1 : i32
    %0 = arith.muli %arg0, %c1_i32 : i32
    %1 = arith.addi %0, %arg1 : i32
    %2 = arith.index_cast %1 : i32 to index
    %3 = memref.load %arg2[%2] : memref<1xi32, #tpu.memory_space<smem>>
    %c0_i32 = arith.constant 0 : i32
    %c0_i32_0 = arith.constant 0 : i32
    return %c0_i32, %3 : i32, i32
  }
  func.func @transform_1(%arg0: i32, %arg1: i32, %arg2: memref<1xi32, #tpu.memory_space<smem>>, %arg3: memref<1xi32, #tpu.memory_space<smem>>) -> (i32, i32) {
    %c0_i32 = arith.constant 0 : i32
    %c0_i32_0 = arith.constant 0 : i32
    return %arg0, %c0_i32 : i32, i32
  }
  func.func @transform_2(%arg0: i32, %arg1: i32, %arg2: memref<1xi32, #tpu.memory_space<smem>>, %arg3: memref<1xi32, #tpu.memory_space<smem>>) -> (i32, i32) {
    %c1_i32 = arith.constant 1 : i32
    %0 = arith.muli %arg0, %c1_i32 : i32
    %1 = arith.addi %0, %arg1 : i32
    %2 = arith.index_cast %1 : i32 to index
    %3 = memref.load %arg2[%2] : memref<1xi32, #tpu.memory_space<smem>>
    %c0_i32 = arith.constant 0 : i32
    %c0_i32_0 = arith.constant 0 : i32
    return %3, %c0_i32 : i32, i32
  }
  func.func @transform_3(%arg0: i32, %arg1: i32, %arg2: memref<1xi32, #tpu.memory_space<smem>>, %arg3: memref<1xi32, #tpu.memory_space<smem>>) -> (i32, i32) {
    %c0_i32 = arith.constant 0 : i32
    %c0_i32_0 = arith.constant 0 : i32
    %c0_i32_1 = arith.constant 0 : i32
    return %c0_i32, %c0_i32_0 : i32, i32
  }
  func.func @transform_4(%arg0: i32, %arg1: i32, %arg2: memref<1xi32, #tpu.memory_space<smem>>, %arg3: memref<1xi32, #tpu.memory_space<smem>>) -> (i32, i32) {
    %c0_i32 = arith.constant 0 : i32
    %c0_i32_0 = arith.constant 0 : i32
    %c0_i32_1 = arith.constant 0 : i32
    return %c0_i32, %c0_i32_0 : i32, i32
  }
  func.func @transform_5(%arg0: i32, %arg1: i32, %arg2: memref<1xi32, #tpu.memory_space<smem>>, %arg3: memref<1xi32, #tpu.memory_space<smem>>) -> (i32, i32) {
    %c0_i32 = arith.constant 0 : i32
    %c0_i32_0 = arith.constant 0 : i32
    %c0_i32_1 = arith.constant 0 : i32
    return %c0_i32, %c0_i32_0 : i32, i32
  }
  func.func @transform_6(%arg0: i32, %arg1: i32, %arg2: memref<1xi32, #tpu.memory_space<smem>>, %arg3: memref<1xi32, #tpu.memory_space<smem>>) -> (i32, i32) {
    %c0_i32 = arith.constant 0 : i32
    %c0_i32_0 = arith.constant 0 : i32
    %c0_i32_1 = arith.constant 0 : i32
    return %c0_i32, %c0_i32_0 : i32, i32
  }
  func.func @transform_7(%arg0: i32, %arg1: i32, %arg2: memref<1xi32, #tpu.memory_space<smem>>, %arg3: memref<1xi32, #tpu.memory_space<smem>>) -> (i32, i32) {
    %c0_i32 = arith.constant 0 : i32
    %c0_i32_0 = arith.constant 0 : i32
    return %arg0, %c0_i32 : i32, i32
  }
}

</mosaic_0001>

<bundles_post_ra>
// kernel: tpu_custom_call.1
= control target key start
LH: loop header
LB: loop body
LE: loop exit
PB: predicated region body
PF: predicated region fallthrough
CT: control target
= control target key end

     0   :  { %16 = vsyncpa [#allocation7], 0  ;;  %s5943_s0 = inlined_call_operand.<no memory space> [shape: s32[1], index: 0, kind: input, shape index: {}]   ;;  %s5944_s1 = inlined_call_operand.<no memory space> [shape: s32[1], index: 1, kind: input, shape index: {}]   ;;  %s5945_s2 = inlined_call_operand.vmem [shape: s32[1,512], index: 2, kind: input, shape index: {}]   ;;  %s5946_s3 = inlined_call_operand.hbm [shape: bf16[512,128], index: 3, kind: input, shape index: {}]   ;;  %s5947_s4 = inlined_call_operand.hbm [shape: bf16[512,128], index: 4, kind: input, shape index: {}]   ;;  %s5948_s5 = inlined_call_operand.hbm [shape: bf16[128,128], index: 5, kind: input, shape index: {}]   ;;  %s5949_s6 = inlined_call_operand.vmem [shape: f32[1,128], index: 6, kind: input, shape index: {}]   ;;  %s5950_s7 = inlined_call_operand.hbm [shape: bf16[128,128], index: 7, kind: input, shape index: {}]   ;;  %s5951_s8 = inlined_call_operand.vmem [shape: f32[1,128], index: 8, kind: input, shape index: {}]   ;;  %s5952_s9 = inlined_call_operand.hbm [shape: bf16[512,128], index: 9, kind: output, shape index: {}]  }
   0x1   :  { %17 = vsyncpa [#allocation10], 0 }
   0x2   :  { %18 = vsyncpa [#allocation13], 0 }
   0x3   :  { %19 = vsyncpa [#allocation8], 0  ;;  %s4281_s11 = sshll.u32 %s5943_s0, 12  ;;  %s5113_s15 = smov [#allocation9]  }
   0x4   :  { %s52_s14 = scalar_lea.hbm %s5947_s4, %s4281_s11  ;;  %s53_s16 = sshll.u32 %s5113_s15, 4  ;;  %s54_s16 = int_to_ptr.vmem [resolvable:$true] %s53_s16 }
   0x5   :  { %s4993_s17 = scalar_lea.hbm %s52_s14, 4096  ;;  %s4995_s20 = scalar_lea.hbm %s5947_s4, 4096 }
   0x6   :  { %p4994_p0 = scmp.ne.s32.totalorder %s52_s14, %s4993_s17  ;;  %p4996_p1 = scmp.lt.u32.totalorder %s52_s14, %s5947_s4 }
   0x7   :  { %p4997_p2 = scmp.lt.u32.totalorder %s4995_s20, %s4993_s17  ;;  %p4999_p4 = scmp.lt.u32.totalorder %s4993_s17, %s52_s14 }
   0x9   :  { %p4998_p3 = por %p4997_p2, %p4996_p1 }
   0xb   :  { %p5000_p5 = por %p4999_p4, %p4998_p3 }
   0xd   :  { %p5001_p6 = pnand %p5000_p5, %p4994_p0 }
   0xf   :  { %5004 = shalt.err (!%p5001_p6)
}
  0x10   :  { %s5005_s23 = scalar_lea.vmem %s54_s16, 4096  ;;  %p5010_p8 = scmp.lt.s32.totalorder %s54_s16, %s54_s16 }
  0x11   :  { %p5006_p7 = scmp.ne.s32.totalorder %s54_s16, %s5005_s23  ;;  %p5011_p9 = scmp.lt.s32.totalorder %s5005_s23, %s5005_s23 }
  0x13   :  { %p5012_p10 = por %p5011_p9, %p5010_p8 }
  0x15   :  { %p5013_p11 = pnand %p5012_p10, %p5006_p7 }
  0x17   :  { %5016 = shalt.err (!%p5013_p11)
}
  0x18   :  { %s5114_s24 = smov 64   ;;  %s5115_s25 = smov 4  }
  0x19   :  { %59 = dma.hbm_to_vmem [thread:$0]  %s52_s14, 4096, %s54_s16, [#allocation10], %s5114_s24, %s5114_s24, %s5115_s25  }
  0x1a   :  { %s5116_s4 = smov [#allocation6]   ;;  %s5117_s27 = smov [#allocation11]  }
  0x1b   :  { %s36_s26 = sshll.u32 %s5116_s4, 4  ;;  %s65_s28 = sshll.u32 %s5117_s27, 4  ;;  %s37_s26 = int_to_ptr.vmem [resolvable:$true] %s36_s26  ;;  %s66_s28 = int_to_ptr.vmem [resolvable:$true] %s65_s28 }
  0x1c   :  { %s5017_s10 = scalar_lea.hbm %s5946_s3, 4096 }
  0x1d   :  { %p5018_p12 = scmp.ne.s32.totalorder %s5946_s3, %s5017_s10  ;;  %p5021_p13 = scmp.lt.u32.totalorder %s5017_s10, %s5946_s3 }
  0x1f   :  { %p5023_p0 = pnand %p5021_p13, %p5018_p12 }
  0x21   :  { %5026 = shalt.err (!%p5023_p0)
}
  0x22   :  { %s5027_s14 = scalar_lea.vmem %s37_s26, 4096  ;;  %p5032_p2 = scmp.lt.s32.totalorder %s37_s26, %s37_s26 }
  0x23   :  { %p5028_p1 = scmp.ne.s32.totalorder %s37_s26, %s5027_s14  ;;  %p5033_p3 = scmp.lt.s32.totalorder %s5027_s14, %s5027_s14 }
  0x25   :  { %p5034_p4 = por %p5033_p3, %p5032_p2 }
  0x27   :  { %p5035_p5 = pnand %p5034_p4, %p5028_p1 }
  0x29   :  { %5038 = shalt.err (!%p5035_p5)
}
  0x2a   :  { %42 = dma.hbm_to_vmem [thread:$0]  %s5946_s3, 4096, %s37_s26, [#allocation7], %s5114_s24, %s5114_s24, %s5115_s25  }
  0x2b   :  { %s5039_s20 = scalar_lea.hbm %s5948_s5, 1024 }
  0x2c   :  { %p5040_p6 = scmp.ne.s32.totalorder %s5948_s5, %s5039_s20  ;;  %p5043_p7 = scmp.lt.u32.totalorder %s5039_s20, %s5948_s5 }
  0x2e   :  { %p5045_p8 = pnand %p5043_p7, %p5040_p6 }
  0x30   :  { %5048 = shalt.err (!%p5045_p8)
}
  0x31   :  { %s5049_s27 = scalar_lea.vmem %s66_s28, 1024  ;;  %p5054_p10 = scmp.lt.s32.totalorder %s66_s28, %s66_s28 }
  0x32   :  { %p5050_p9 = scmp.ne.s32.totalorder %s66_s28, %s5049_s27  ;;  %p5055_p11 = scmp.lt.s32.totalorder %s5049_s27, %s5049_s27 }
  0x34   :  { %p5056_p12 = por %p5055_p11, %p5054_p10 }
  0x36   :  { %p5057_p13 = pnand %p5056_p12, %p5050_p9 }
  0x38   :  { %5060 = shalt.err (!%p5057_p13)
}
  0x39   :  { %71 = dma.hbm_to_vmem [thread:$0]  %s5948_s5, 1024, %s66_s28, [#allocation10], %s5114_s24, %s5114_s24, %s5115_s25  }
  0x3a   :  { %s5118_s29 = smov [#allocation12]   ;;  %s5061_s12 = scalar_lea.hbm %s5950_s7, 1024 }
  0x3b   :  { %s79_s30 = sshll.u32 %s5118_s29, 4  ;;  %p5062_p0 = scmp.ne.s32.totalorder %s5950_s7, %s5061_s12  ;;  %s80_s30 = int_to_ptr.vmem [resolvable:$true] %s79_s30 }
  0x3c   :  { %p5065_p1 = scmp.lt.u32.totalorder %s5061_s12, %s5950_s7 }
  0x3e   :  { %p5067_p2 = pnand %p5065_p1, %p5062_p0 }
  0x40   :  { %5070 = shalt.err (!%p5067_p2)
}
  0x41   :  { %s5071_s17 = scalar_lea.vmem %s80_s30, 1024  ;;  %p5076_p4 = scmp.lt.s32.totalorder %s80_s30, %s80_s30 }
  0x42   :  { %p5072_p3 = scmp.ne.s32.totalorder %s80_s30, %s5071_s17  ;;  %p5077_p5 = scmp.lt.s32.totalorder %s5071_s17, %s5071_s17 }
  0x44   :  { %p5078_p6 = por %p5077_p5, %p5076_p4 }
  0x46   :  { %p5079_p7 = pnand %p5078_p6, %p5072_p3 }
  0x48   :  { %5082 = shalt.err (!%p5079_p7)
}
  0x49   :  { %85 = dma.hbm_to_vmem [thread:$0]  %s5950_s7, 1024, %s80_s30, [#allocation13], %s5114_s24, %s5114_s24, %s5115_s25  }
  0x4a   :  { %5105 = dma.done.wait [#allocation7], 4096  }
  0x4b   :  { %5106 = vsyncadd [#allocation7], 4294963200 }
  0x4c   :  { %5107 = dma.done.wait [#allocation10], 5120  }
  0x4d   :  { %5108 = vsyncadd [#allocation10], 4294962176 }
  0x4e   :  { %5109 = dma.done.wait [#allocation13], 1024  }
  0x4f   :  { %5110 = vsyncadd [#allocation13], 4294966272  ;;  %s3652_s20 = sshll.u32 %s5943_s0, 2  ;;  %v4347_v0 = vld [vmem:[#allocation6] sm:$0xff]   ;;  %v4634_v1 = vld [vmem:[#allocation6 + $0x8] sm:$0xff]   ;;  %p3654_p9 = scmp.le.s32.totalorder %s5944_s1, 0 }
  0x50   :  { %p109_p8 = scmp.lt.s32.totalorder %s3652_s20, 3  ;;  %v4635_v2 = vld [vmem:[#allocation6 + $0x10] sm:$0xff]   ;;  %v4348_v3 = vunpack.c.l.bf16 %v4347_v0  ;;  %v4349_v4 = vunpack.c.h.bf16 %v4347_v0  ;;  %v4352_v5 = vunpack.c.l.bf16 %v4634_v1  ;;  %v4353_v6 = vunpack.c.h.bf16 %v4634_v1  ;;  %v4636_v7 = vld [vmem:[#allocation6 + $0x18] sm:$0xff]   ;;  %v4637_v8 = vld [vmem:[#allocation6 + $0x20] sm:$0xff]  }
  0x51   :  { %v4638_v9 = vld [vmem:[#allocation6 + $0x28] sm:$0xff]   ;;  %v4356_v10 = vunpack.c.l.bf16 %v4635_v2  ;;  %v4357_v11 = vunpack.c.h.bf16 %v4635_v2  ;;  %v4360_v12 = vunpack.c.l.bf16 %v4636_v7  ;;  %v4361_v13 = vunpack.c.h.bf16 %v4636_v7  ;;  %v4639_v14 = vld [vmem:[#allocation6 + $0x30] sm:$0xff]   ;;  %v4640_v15 = vld [vmem:[#allocation6 + $0x38] sm:$0xff]  }
  0x52   :  { %s5962_s20 = smov (!%p109_p8, %s3652_s20), 3  ;;  %v4641_v16 = vld [vmem:[#allocation6 + $0x40] sm:$0xff]   ;;  %251 = vst [vmem:[#allocation2] sm:$0xff] %v4348_v3  ;;  %252 = vst [vmem:[#allocation2 + $0x8] sm:$0xff] %v4349_v4  ;;  %v4364_v17 = vunpack.c.l.bf16 %v4637_v8  ;;  %v4365_v18 = vunpack.c.h.bf16 %v4637_v8  ;;  %v4368_v19 = vunpack.c.l.bf16 %v4638_v9  ;;  %v4369_v20 = vunpack.c.h.bf16 %v4638_v9  ;;  %v4642_v21 = vld [vmem:[#allocation6 + $0x48] sm:$0xff]  }
  0x53   :  { %s111_s23 = scalar_lea.vmem %s5945_s2, %s5962_s20  ;;  %253 = vst [vmem:[#allocation2 + $0x10] sm:$0xff] %v4352_v5  ;;  %254 = vst [vmem:[#allocation2 + $0x18] sm:$0xff] %v4353_v6  ;;  %v4643_v22 = vld [vmem:[#allocation6 + $0x50] sm:$0xff]   ;;  %v4644_v23 = vld [vmem:[#allocation6 + $0x58] sm:$0xff]   ;;  %v4372_v24 = vunpack.c.l.bf16 %v4639_v14  ;;  %v4373_v25 = vunpack.c.h.bf16 %v4639_v14  ;;  %v4376_v26 = vunpack.c.l.bf16 %v4640_v15  ;;  %v4377_v27 = vunpack.c.h.bf16 %v4640_v15 }
  0x54   :  { %255 = vst [vmem:[#allocation2 + $0x20] sm:$0xff] %v4356_v10  ;;  %256 = vst [vmem:[#allocation2 + $0x28] sm:$0xff] %v4357_v11  ;;  %v4645_v28 = vld [vmem:[#allocation6 + $0x60] sm:$0xff]   ;;  %v4646_v29 = vld [vmem:[#allocation6 + $0x68] sm:$0xff]   ;;  %v4380_v30 = vunpack.c.l.bf16 %v4641_v16  ;;  %v4381_v31 = vunpack.c.h.bf16 %v4641_v16  ;;  %v4384_v32 = vunpack.c.l.bf16 %v4642_v21  ;;  %v4385_v33 = vunpack.c.h.bf16 %v4642_v21 }
  0x55   :  { %257 = vst [vmem:[#allocation2 + $0x30] sm:$0xff] %v4360_v12  ;;  %258 = vst [vmem:[#allocation2 + $0x38] sm:$0xff] %v4361_v13  ;;  %v4647_v34 = vld [vmem:[#allocation6 + $0x70] sm:$0xff]   ;;  %v4648_v35 = vld [vmem:[#allocation6 + $0x78] sm:$0xff]   ;;  %v4388_v36 = vunpack.c.l.bf16 %v4643_v22  ;;  %v4389_v37 = vunpack.c.h.bf16 %v4643_v22  ;;  %v4392_v38 = vunpack.c.l.bf16 %v4644_v23  ;;  %v4393_v39 = vunpack.c.h.bf16 %v4644_v23 }
  0x56   :  { %259 = vst [vmem:[#allocation2 + $0x40] sm:$0xff] %v4364_v17  ;;  %260 = vst [vmem:[#allocation2 + $0x48] sm:$0xff] %v4365_v18  ;;  %v4649_v40 = vld [vmem:[#allocation6 + $0x80] sm:$0xff]   ;;  %v4650_v41 = vld [vmem:[#allocation6 + $0x88] sm:$0xff]   ;;  %v4396_v42 = vunpack.c.l.bf16 %v4645_v28  ;;  %v4397_v43 = vunpack.c.h.bf16 %v4645_v28  ;;  %v4400_v44 = vunpack.c.l.bf16 %v4646_v29  ;;  %v4401_v45 = vunpack.c.h.bf16 %v4646_v29 }
  0x57   :  { %261 = vst [vmem:[#allocation2 + $0x50] sm:$0xff] %v4368_v19  ;;  %262 = vst [vmem:[#allocation2 + $0x58] sm:$0xff] %v4369_v20  ;;  %v4651_v46 = vld [vmem:[#allocation6 + $0x90] sm:$0xff]   ;;  %v4652_v47 = vld [vmem:[#allocation6 + $0x98] sm:$0xff]   ;;  %v4404_v48 = vunpack.c.l.bf16 %v4647_v34  ;;  %v4405_v49 = vunpack.c.h.bf16 %v4647_v34  ;;  %v4408_v50 = vunpack.c.l.bf16 %v4648_v35  ;;  %v4409_v51 = vunpack.c.h.bf16 %v4648_v35 }
  0x58   :  { %263 = vst [vmem:[#allocation2 + $0x60] sm:$0xff] %v4372_v24  ;;  %264 = vst [vmem:[#allocation2 + $0x68] sm:$0xff] %v4373_v25  ;;  %v4653_v52 = vld [vmem:[#allocation6 + $0xa0] sm:$0xff]   ;;  %v4654_v53 = vld [vmem:[#allocation6 + $0xa8] sm:$0xff]   ;;  %v4412_v54 = vunpack.c.l.bf16 %v4649_v40  ;;  %v4413_v55 = vunpack.c.h.bf16 %v4649_v40  ;;  %v4416_v56 = vunpack.c.l.bf16 %v4650_v41  ;;  %v4417_v57 = vunpack.c.h.bf16 %v4650_v41 }
  0x59   :  { %265 = vst [vmem:[#allocation2 + $0x70] sm:$0xff] %v4376_v26  ;;  %266 = vst [vmem:[#allocation2 + $0x78] sm:$0xff] %v4377_v27  ;;  %v4655_v58 = vld [vmem:[#allocation6 + $0xb0] sm:$0xff]   ;;  %v4656_v59 = vld [vmem:[#allocation6 + $0xb8] sm:$0xff]   ;;  %v4420_v60 = vunpack.c.l.bf16 %v4651_v46  ;;  %v4421_v61 = vunpack.c.h.bf16 %v4651_v46  ;;  %v4424_v62 = vunpack.c.l.bf16 %v4652_v47  ;;  %v4425_v63 = vunpack.c.h.bf16 %v4652_v47 }
  0x5a   :  { %267 = vst [vmem:[#allocation2 + $0x80] sm:$0xff] %v4380_v30  ;;  %268 = vst [vmem:[#allocation2 + $0x88] sm:$0xff] %v4381_v31  ;;  %v4657_v0 = vld [vmem:[#allocation6 + $0xc0] sm:$0xff]   ;;  %v4658_v1 = vld [vmem:[#allocation6 + $0xc8] sm:$0xff]   ;;  %v4428_v2 = vunpack.c.l.bf16 %v4653_v52  ;;  %v4429_v3 = vunpack.c.h.bf16 %v4653_v52  ;;  %v4432_v4 = vunpack.c.l.bf16 %v4654_v53  ;;  %v4433_v5 = vunpack.c.h.bf16 %v4654_v53 }
  0x5b   :  { %269 = vst [vmem:[#allocation2 + $0x90] sm:$0xff] %v4384_v32  ;;  %270 = vst [vmem:[#allocation2 + $0x98] sm:$0xff] %v4385_v33  ;;  %v4659_v6 = vld [vmem:[#allocation6 + $0xd0] sm:$0xff]   ;;  %v4660_v7 = vld [vmem:[#allocation6 + $0xd8] sm:$0xff]   ;;  %v4436_v8 = vunpack.c.l.bf16 %v4655_v58  ;;  %v4437_v9 = vunpack.c.h.bf16 %v4655_v58  ;;  %v4440_v10 = vunpack.c.l.bf16 %v4656_v59  ;;  %v4441_v11 = vunpack.c.h.bf16 %v4656_v59 }
  0x5c   :  { %271 = vst [vmem:[#allocation2 + $0xa0] sm:$0xff] %v4388_v36  ;;  %272 = vst [vmem:[#allocation2 + $0xa8] sm:$0xff] %v4389_v37  ;;  %v4661_v12 = vld [vmem:[#allocation6 + $0xe0] sm:$0xff]   ;;  %v4662_v13 = vld [vmem:[#allocation6 + $0xe8] sm:$0xff]   ;;  %v4444_v14 = vunpack.c.l.bf16 %v4657_v0  ;;  %v4445_v15 = vunpack.c.h.bf16 %v4657_v0  ;;  %v4448_v16 = vunpack.c.l.bf16 %v4658_v1  ;;  %v4449_v17 = vunpack.c.h.bf16 %v4658_v1 }
  0x5d   :  { %273 = vst [vmem:[#allocation2 + $0xb0] sm:$0xff] %v4392_v38  ;;  %274 = vst [vmem:[#allocation2 + $0xb8] sm:$0xff] %v4393_v39  ;;  %v4663_v18 = vld [vmem:[#allocation6 + $0xf0] sm:$0xff]   ;;  %v4664_v19 = vld [vmem:[#allocation6 + $0xf8] sm:$0xff]   ;;  %v4452_v20 = vunpack.c.l.bf16 %v4659_v6  ;;  %v4453_v21 = vunpack.c.h.bf16 %v4659_v6  ;;  %v4456_v22 = vunpack.c.l.bf16 %v4660_v7  ;;  %v4457_v23 = vunpack.c.h.bf16 %v4660_v7 }
  0x5e   :  { %275 = vst [vmem:[#allocation2 + $0xc0] sm:$0xff] %v4396_v42  ;;  %276 = vst [vmem:[#allocation2 + $0xc8] sm:$0xff] %v4397_v43  ;;  %v4460_v24 = vunpack.c.l.bf16 %v4661_v12  ;;  %v4461_v25 = vunpack.c.h.bf16 %v4661_v12  ;;  %v4464_v26 = vunpack.c.l.bf16 %v4662_v13  ;;  %v4465_v27 = vunpack.c.h.bf16 %v4662_v13  ;;  %v4945_v32 = vld [vmem:[#allocation9] sm:$0xff] (!%p3654_p9)   ;;  %v4947_v35 = vld [vmem:[#allocation9 + $0x8] sm:$0xff] (!%p3654_p9)  }
  0x5f   :  { %277 = vst [vmem:[#allocation2 + $0xd0] sm:$0xff] %v4400_v44  ;;  %278 = vst [vmem:[#allocation2 + $0xd8] sm:$0xff] %v4401_v45  ;;  %v4468_v28 = vunpack.c.l.bf16 %v4663_v18  ;;  %v4469_v29 = vunpack.c.h.bf16 %v4663_v18  ;;  %v4472_v30 = vunpack.c.l.bf16 %v4664_v19  ;;  %v4473_v31 = vunpack.c.h.bf16 %v4664_v19  ;;  %v4946_v34 = vld [vmem:[#allocation9 + $0x80] sm:$0xff] (!%p3654_p9)   ;;  %v4948_v36 = vld [vmem:[#allocation9 + $0x88] sm:$0xff] (!%p3654_p9)  }
  0x60   :  { %279 = vst [vmem:[#allocation2 + $0xe0] sm:$0xff] %v4404_v48  ;;  %280 = vst [vmem:[#allocation2 + $0xe8] sm:$0xff] %v4405_v49  ;;  %v5119_v33 = vmov (!%p3654_p9), 0   ;;  %v4949_v37 = vld [vmem:[#allocation9 + $0x10] sm:$0xff] (!%p3654_p9)   ;;  %v4951_v39 = vld [vmem:[#allocation9 + $0x18] sm:$0xff] (!%p3654_p9)   ;;  %v320_v45 = vlaneseq (!%p3654_p9) }
  0x61   :  { %281 = vst [vmem:[#allocation2 + $0xf0] sm:$0xff] %v4408_v50  ;;  %282 = vst [vmem:[#allocation2 + $0xf8] sm:$0xff] %v4409_v51  ;;  %1621 = vmatprep.subr.bf16.mxu0 (!%p3654_p9), %v5119_v33  ;;  %1910 = vmatprep.subr.bf16.mxu1 (!%p3654_p9), %v5119_v33  ;;  %v4950_v38 = vld [vmem:[#allocation9 + $0x90] sm:$0xff] (!%p3654_p9)   ;;  %v4952_v40 = vld [vmem:[#allocation9 + $0x98] sm:$0xff] (!%p3654_p9)  }
  0x62   :  { %283 = vst [vmem:[#allocation2 + $0x100] sm:$0xff] %v4412_v54  ;;  %284 = vst [vmem:[#allocation2 + $0x108] sm:$0xff] %v4413_v55  ;;  %1622 = vmatpush1.bf16.msra.mxu0 (!%p3654_p9), %v4945_v32  ;;  %1911 = vmatpush1.bf16.msra.mxu1 (!%p3654_p9), %v4946_v34  ;;  %v4953_v41 = vld [vmem:[#allocation9 + $0x20] sm:$0xff] (!%p3654_p9)   ;;  %v4955_v43 = vld [vmem:[#allocation9 + $0x28] sm:$0xff] (!%p3654_p9)   ;;  %v5258_v48 = vshrl.u32 (!%p3654_p9), %v320_v45, 7 }
  0x63   :  { %285 = vst [vmem:[#allocation2 + $0x110] sm:$0xff] %v4416_v56  ;;  %286 = vst [vmem:[#allocation2 + $0x118] sm:$0xff] %v4417_v57  ;;  %1623 = vmatprep.subr.bf16.mxu0 (!%p3654_p9), %v5119_v33  ;;  %1912 = vmatprep.subr.bf16.mxu1 (!%p3654_p9), %v5119_v33  ;;  %v4954_v42 = vld [vmem:[#allocation9 + $0xa0] sm:$0xff] (!%p3654_p9)   ;;  %v4956_v44 = vld [vmem:[#allocation9 + $0xa8] sm:$0xff] (!%p3654_p9)  }
  0x64   :  { %287 = vst [vmem:[#allocation2 + $0x120] sm:$0xff] %v4420_v60  ;;  %288 = vst [vmem:[#allocation2 + $0x128] sm:$0xff] %v4421_v61  ;;  %v4957_v46 = vld [vmem:[#allocation9 + $0x30] sm:$0xff] (!%p3654_p9)   ;;  %v4959_v49 = vld [vmem:[#allocation9 + $0x38] sm:$0xff] (!%p3654_p9)   ;;  %v395_v51 = vsub.s32 (!%p3654_p9), 1, %v5258_v48  ;;  %v403_v52 = vsub.s32 (!%p3654_p9), 3, %v5258_v48 }
  0x65   :  { %289 = vst [vmem:[#allocation2 + $0x130] sm:$0xff] %v4424_v62  ;;  %290 = vst [vmem:[#allocation2 + $0x138] sm:$0xff] %v4425_v63  ;;  %v4958_v47 = vld [vmem:[#allocation9 + $0xb0] sm:$0xff] (!%p3654_p9)   ;;  %v4960_v50 = vld [vmem:[#allocation9 + $0xb8] sm:$0xff] (!%p3654_p9)   ;;  %v5266_v55 = vadd.s32 (!%p3654_p9), 8, %v5258_v48  ;;  %v399_v7 = vsub.s32 (!%p3654_p9), 2, %v5258_v48 }
  0x66   :  { %291 = vst [vmem:[#allocation2 + $0x140] sm:$0xff] %v4428_v2  ;;  %292 = vst [vmem:[#allocation2 + $0x148] sm:$0xff] %v4429_v3  ;;  %1624 = vmatpush1.bf16.msra.mxu0 (!%p3654_p9), %v4947_v35  ;;  %1913 = vmatpush1.bf16.msra.mxu1 (!%p3654_p9), %v4948_v36  ;;  %v4961_v53 = vld [vmem:[#allocation9 + $0x40] sm:$0xff] (!%p3654_p9)   ;;  %v4963_v59 = vld [vmem:[#allocation9 + $0x48] sm:$0xff] (!%p3654_p9)   ;;  %v5120_v61 = vmov (!%p3654_p9), 1.0|1.0  }
  0x67   :  { %293 = vst [vmem:[#allocation2 + $0x150] sm:$0xff] %v4432_v4  ;;  %294 = vst [vmem:[#allocation2 + $0x158] sm:$0xff] %v4433_v5  ;;  %1625 = vmatprep.subr.bf16.mxu0 (!%p3654_p9), %v5119_v33  ;;  %1914 = vmatprep.subr.bf16.mxu1 (!%p3654_p9), %v5119_v33  ;;  %v4962_v54 = vld [vmem:[#allocation9 + $0xc0] sm:$0xff] (!%p3654_p9)   ;;  %v4964_v60 = vld [vmem:[#allocation9 + $0xc8] sm:$0xff] (!%p3654_p9)   ;;  %v391_v5 = vsub.s32 (!%p3654_p9), 0, %v5258_v48  ;;  %v323_v12 = vadd.s32 (!%p3654_p9), 16, %v5258_v48 }
  0x68   :  { %295 = vst [vmem:[#allocation2 + $0x160] sm:$0xff] %v4436_v8  ;;  %296 = vst [vmem:[#allocation2 + $0x168] sm:$0xff] %v4437_v9  ;;  %v385_v56 = vld [vmem:[%s111_s23] sm:$0xf] (!%p3654_p9)  ;;  %v4965_v62 = vld [vmem:[#allocation9 + $0x50] sm:$0xff] (!%p3654_p9)   ;;  %v324_v13 = vadd.s32 (!%p3654_p9), 24, %v5258_v48 }
  0x69   :  { %297 = vst [vmem:[#allocation2 + $0x170] sm:$0xff] %v4440_v10  ;;  %298 = vst [vmem:[#allocation2 + $0x178] sm:$0xff] %v4441_v11  ;;  %v5274_v57 = vrot.slane (!%p3654_p9), %v385_v56, %v395_v51  ;;  %v5276_v58 = vrot.slane (!%p3654_p9), %v385_v56, %v403_v52  ;;  %v4966_v63 = vld [vmem:[#allocation9 + $0xd0] sm:$0xff] (!%p3654_p9)   ;;  %v4967_v0 = vld [vmem:[#allocation9 + $0x58] sm:$0xff] (!%p3654_p9)   ;;  %v5300_v9 = vrot.slane (!%p3654_p9), %v385_v56, %v391_v5  ;;  %v327_v18 = vadd.s32 (!%p3654_p9), 48, %v5258_v48 }
  0x6a   :  { %299 = vst [vmem:[#allocation2 + $0x180] sm:$0xff] %v4444_v14  ;;  %300 = vst [vmem:[#allocation2 + $0x188] sm:$0xff] %v4445_v15  ;;  %1626 = vmatpush1.bf16.msra.mxu0 (!%p3654_p9), %v4949_v37  ;;  %1915 = vmatpush1.bf16.msra.mxu1 (!%p3654_p9), %v4950_v38  ;;  %v4968_v1 = vld [vmem:[#allocation9 + $0xd8] sm:$0xff] (!%p3654_p9)   ;;  %v4969_v2 = vld [vmem:[#allocation9 + $0x60] sm:$0xff] (!%p3654_p9)   ;;  %v5303_v11 = vrot.slane (!%p3654_p9), %v385_v56, %v399_v7  ;;  %v328_v19 = vadd.s32 (!%p3654_p9), 56, %v5258_v48  ;;  %v341_v32 = vadd.s32 (!%p3654_p9), 160, %v5258_v48 }
  0x6b   :  { %301 = vst [vmem:[#allocation2 + $0x190] sm:$0xff] %v4448_v16  ;;  %302 = vst [vmem:[#allocation2 + $0x198] sm:$0xff] %v4449_v17  ;;  %319 = sbr.rel (%p3654_p9) target bundleno = 628 (0x274), region = 53  ;;  %1627 = vmatprep.subr.bf16.mxu0 (!%p3654_p9), %v5119_v33  ;;  %1916 = vmatprep.subr.bf16.mxu1 (!%p3654_p9), %v5119_v33  ;;  %vm406_vm0 = vcmp.eq.s32.totalorder (!%p3654_p9), %v5258_v48, %v5274_v57  ;;  %vm410_vm1 = vcmp.eq.s32.totalorder (!%p3654_p9), %v5266_v55, %v5274_v57  ;;  %v4970_v3 = vld [vmem:[#allocation9 + $0xe0] sm:$0xff] (!%p3654_p9)   ;;  %v4971_v4 = vld [vmem:[#allocation9 + $0x68] sm:$0xff] (!%p3654_p9)   ;;  %v325_v16 = vadd.s32 (!%p3654_p9), 32, %v5258_v48 }
  0x6c   :  { %303 = vst [vmem:[#allocation2 + $0x1a0] sm:$0xff] %v4452_v20  ;;  %304 = vst [vmem:[#allocation2 + $0x1a8] sm:$0xff] %v4453_v21  ;;  %vm408_vm2 = vcmp.eq.s32.totalorder (!%p3654_p9), %v5258_v48, %v5276_v58  ;;  %vm412_vm4 = vcmp.eq.s32.totalorder (!%p3654_p9), %v5266_v55, %v5276_v58  ;;  %v4972_v6 = vld [vmem:[#allocation9 + $0xe8] sm:$0xff] (!%p3654_p9)   ;;  %v4973_v8 = vld [vmem:[#allocation9 + $0x70] sm:$0xff] (!%p3654_p9)   ;;  %vm405_vm6 = vcmp.eq.s32.totalorder (!%p3654_p9), %v5258_v48, %v5300_v9  ;;  %v326_v17 = vadd.s32 (!%p3654_p9), 40, %v5258_v48 }
  0x6d   :  { %305 = vst [vmem:[#allocation2 + $0x1b0] sm:$0xff] %v4456_v22  ;;  %306 = vst [vmem:[#allocation2 + $0x1b8] sm:$0xff] %v4457_v23  ;;  %v4974_v10 = vld [vmem:[#allocation9 + $0xf0] sm:$0xff] (!%p3654_p9)   ;;  %v4975_v14 = vld [vmem:[#allocation9 + $0x78] sm:$0xff] (!%p3654_p9)   ;;  %vm409_vm7 = vcmp.eq.s32.totalorder (!%p3654_p9), %v5266_v55, %v5300_v9  ;;  %vm407_vm8 = vcmp.eq.s32.totalorder (!%p3654_p9), %v5258_v48, %v5303_v11  ;;  %vm411_vm9 = vcmp.eq.s32.totalorder (!%p3654_p9), %v5266_v55, %v5303_v11  ;;  %v329_v20 = vadd.s32 (!%p3654_p9), 64, %v5258_v48 }
  0x6e   :  { %307 = vst [vmem:[#allocation2 + $0x1c0] sm:$0xff] %v4460_v24  ;;  %308 = vst [vmem:[#allocation2 + $0x1c8] sm:$0xff] %v4461_v25  ;;  %1628 = vmatpush1.bf16.msra.mxu0 (!%p3654_p9), %v4951_v39  ;;  %1917 = vmatpush1.bf16.msra.mxu1 (!%p3654_p9), %v4952_v40  ;;  %v4976_v15 = vld [vmem:[#allocation9 + $0xf8] sm:$0xff] (!%p3654_p9)   ;;  %vm414_vm10 = vcmp.eq.s32.totalorder (!%p3654_p9), %v323_v12, %v5274_v57  ;;  %vm418_vm11 = vcmp.eq.s32.totalorder (!%p3654_p9), %v324_v13, %v5274_v57  ;;  %v330_v21 = vadd.s32 (!%p3654_p9), 72, %v5258_v48 }
  0x6f   :  { %309 = vst [vmem:[#allocation2 + $0x1d0] sm:$0xff] %v4464_v26  ;;  %310 = vst [vmem:[#allocation2 + $0x1d8] sm:$0xff] %v4465_v27  ;;  %1629 = vmatprep.subr.bf16.mxu0 (!%p3654_p9), %v5119_v33  ;;  %1918 = vmatprep.subr.bf16.mxu1 (!%p3654_p9), %v5119_v33  ;;  %vm416_vm13 = vcmp.eq.s32.totalorder (!%p3654_p9), %v323_v12, %v5276_v58  ;;  %vm420_vm14 = vcmp.eq.s32.totalorder (!%p3654_p9), %v324_v13, %v5276_v58  ;;  %v331_v22 = vadd.s32 (!%p3654_p9), 80, %v5258_v48 }
  0x70   :  { %311 = vst [vmem:[#allocation2 + $0x1e0] sm:$0xff] %v4468_v28  ;;  %312 = vst [vmem:[#allocation2 + $0x1e8] sm:$0xff] %v4469_v29  ;;  %v332_v23 = vadd.s32 (!%p3654_p9), 88, %v5258_v48  ;;  %v333_v24 = vadd.s32 (!%p3654_p9), 96, %v5258_v48  ;;  %v334_v25 = vadd.s32 (!%p3654_p9), 104, %v5258_v48  ;;  %v335_v26 = vadd.s32 (!%p3654_p9), 112, %v5258_v48 }
  0x71   :  { %313 = vst [vmem:[#allocation2 + $0x1f0] sm:$0xff] %v4472_v30  ;;  %314 = vst [vmem:[#allocation2 + $0x1f8] sm:$0xff] %v4473_v31  ;;  %v336_v27 = vadd.s32 (!%p3654_p9), 120, %v5258_v48  ;;  %v337_v28 = vadd.s32 (!%p3654_p9), 128, %v5258_v48  ;;  %v338_v29 = vadd.s32 (!%p3654_p9), 136, %v5258_v48  ;;  %v339_v30 = vadd.s32 (!%p3654_p9), 144, %v5258_v48 }
  0x72   :  { %1630 = vmatpush1.bf16.msra.mxu0 %v4953_v41  ;;  %1919 = vmatpush1.bf16.msra.mxu1 %v4954_v42  ;;  %vm3943_vm3 = vmpackc.low %vm410_vm1, %vm406_vm0  ;;  %v340_v31 = vadd.s32 152, %v5258_v48  ;;  %v343_v34 = vadd.s32 176, %v5258_v48  ;;  %v344_v35 = vadd.s32 184, %v5258_v48  ;;  %v345_v36 = vadd.s32 192, %v5258_v48 }
  0x73   :  { %1631 = vmatprep.subr.bf16.mxu0 %v5119_v33  ;;  %1920 = vmatprep.subr.bf16.mxu1 %v5119_v33  ;;  %vm4071_vm5 = vmpackc.low %vm412_vm4, %vm408_vm2  ;;  %vm413_vm2 = vcmp.eq.s32.totalorder %v323_v12, %v5300_v9  ;;  %vm415_vm4 = vcmp.eq.s32.totalorder %v323_v12, %v5303_v11  ;;  %v346_v37 = vadd.s32 200, %v5258_v48  ;;  %v347_v38 = vadd.s32 208, %v5258_v48 }
  0x74   :  { %3944 = vmatprep.mubr.msk.bf16.mxu0 %vm3943_vm3, %v5120_v61  ;;  %4072 = vmatprep.mubr.msk.bf16.mxu1 %vm4071_vm5, %v5120_v61  ;;  %vm3945_vm12 = vmpackc.low %vm409_vm7, %vm405_vm6  ;;  %vm417_vm3 = vcmp.eq.s32.totalorder %v324_v13, %v5300_v9  ;;  %vm419_vm5 = vcmp.eq.s32.totalorder %v324_v13, %v5303_v11  ;;  %vm422_vm6 = vcmp.eq.s32.totalorder %v325_v16, %v5274_v57  ;;  %v348_v39 = vadd.s32 216, %v5258_v48  ;;  %v1301_v13 = vld [vmem:[#allocation2] sm:$0xff] }
  0x75   :  { %vm4073_vm15 = vmpackc.low %vm411_vm9, %vm407_vm8  ;;  %vm426_vm7 = vcmp.eq.s32.totalorder %v326_v17, %v5274_v57  ;;  %vm424_vm9 = vcmp.eq.s32.totalorder %v325_v16, %v5276_v58  ;;  %v349_v40 = vadd.s32 224, %v5258_v48  ;;  %v350_v41 = vadd.s32 232, %v5258_v48 }
  0x76   :  { %1632 = vmatpush1.bf16.msra.mxu0 %v4955_v43  ;;  %1921 = vmatpush1.bf16.msra.mxu1 %v4956_v44  ;;  %vm3947_vm0 = vmpackc.low %vm418_vm11, %vm414_vm10  ;;  %vm428_vm10 = vcmp.eq.s32.totalorder %v326_v17, %v5276_v58  ;;  %v351_v42 = vadd.s32 240, %v5258_v48  ;;  %v352_v43 = vadd.s32 248, %v5258_v48  ;;  %v353_v44 = vadd.s32 256, %v5258_v48 }
  0x77   :  { %1633 = vmatprep.subr.bf16.mxu0 %v5119_v33  ;;  %1922 = vmatprep.subr.bf16.mxu1 %v5119_v33  ;;  %vm4075_vm1 = vmpackc.low %vm420_vm14, %vm416_vm13  ;;  %vm421_vm14 = vcmp.eq.s32.totalorder %v325_v16, %v5300_v9  ;;  %v354_v45 = vadd.s32 264, %v5258_v48  ;;  %v359_v51 = vadd.s32 304, %v5258_v48  ;;  %v360_v52 = vadd.s32 312, %v5258_v48 }
  0x78   :  { %vm3949_vm8 = vmpackc.low %vm417_vm3, %vm413_vm2  ;;  %vm430_vm2 = vcmp.eq.s32.totalorder %v327_v18, %v5274_v57  ;;  %vm434_vm3 = vcmp.eq.s32.totalorder %v328_v19, %v5274_v57  ;;  %v363_v55 = vadd.s32 336, %v5258_v48  ;;  %v364_v56 = vadd.s32 344, %v5258_v48 }
  0x79   :  { %vm4077_vm11 = vmpackc.low %vm419_vm5, %vm415_vm4  ;;  %vm432_vm5 = vcmp.eq.s32.totalorder %v327_v18, %v5276_v58  ;;  %v374_v5 = vadd.s32 424, %v5258_v48  ;;  %v376_v7 = vadd.s32 440, %v5258_v48 }
  0x7a   :  { %1634 = vmatpush1.bf16.msra.mxu0 %v4957_v46  ;;  %1923 = vmatpush1.bf16.msra.mxu1 %v4958_v47  ;;  %vm4079_vm13 = vmpackc.low %vm428_vm10, %vm424_vm9  ;;  %vm429_vm10 = vcmp.eq.s32.totalorder %v327_v18, %v5300_v9  ;;  %v355_v46 = vadd.s32 272, %v5258_v48  ;;  %v356_v47 = vadd.s32 280, %v5258_v48 }
  0x7b   :  { %1635 = vmatprep.subr.bf16.mxu0 %v5119_v33  ;;  %1924 = vmatprep.subr.bf16.mxu1 %v5119_v33 }
  0x7e   :  { %1636 = vmatpush1.bf16.msra.mxu0 %v4959_v49  ;;  %1925 = vmatpush1.bf16.msra.mxu1 %v4960_v50  ;;  %v357_v49 = vadd.s32 288, %v5258_v48  ;;  %v358_v50 = vadd.s32 296, %v5258_v48 }
  0x7f   :  { %1637 = vmatprep.subr.bf16.mxu0 %v5119_v33  ;;  %1926 = vmatprep.subr.bf16.mxu1 %v5119_v33 }
  0x82   :  { %1638 = vmatpush1.bf16.msra.mxu0 %v4961_v53  ;;  %1927 = vmatpush1.bf16.msra.mxu1 %v4962_v54  ;;  %v361_v53 = vadd.s32 320, %v5258_v48  ;;  %v362_v54 = vadd.s32 328, %v5258_v48 }
  0x83   :  { %1639 = vmatprep.subr.bf16.mxu0 %v5119_v33  ;;  %1928 = vmatprep.subr.bf16.mxu1 %v5119_v33 }
  0x86   :  { %1640 = vmatpush1.bf16.msra.mxu0 %v4963_v59  ;;  %1929 = vmatpush1.bf16.msra.mxu1 %v4964_v60  ;;  %v365_v59 = vadd.s32 352, %v5258_v48  ;;  %v366_v60 = vadd.s32 360, %v5258_v48 }
  0x87   :  { %1641 = vmatprep.subr.bf16.mxu0 %v5119_v33  ;;  %1930 = vmatprep.subr.bf16.mxu1 %v5119_v33 }
  0x8a   :  { %1642 = vmatpush1.bf16.msra.mxu0 %v4965_v62  ;;  %1931 = vmatpush1.bf16.msra.mxu1 %v4966_v63  ;;  %v367_v62 = vadd.s32 368, %v5258_v48  ;;  %v368_v63 = vadd.s32 376, %v5258_v48 }
  0x8b   :  { %1643 = vmatprep.subr.bf16.mxu0 %v5119_v33  ;;  %1932 = vmatprep.subr.bf16.mxu1 %v5119_v33 }
  0x8e   :  { %1644 = vmatpush1.bf16.msra.mxu0 %v4967_v0  ;;  %1933 = vmatpush1.bf16.msra.mxu1 %v4968_v1  ;;  %v369_v0 = vadd.s32 384, %v5258_v48  ;;  %v370_v1 = vadd.s32 392, %v5258_v48 }
  0x8f   :  { %1645 = vmatprep.subr.bf16.mxu0 %v5119_v33  ;;  %1934 = vmatprep.subr.bf16.mxu1 %v5119_v33 }
  0x92   :  { %1646 = vmatpush1.bf16.msra.mxu0 %v4969_v2  ;;  %1935 = vmatpush1.bf16.msra.mxu1 %v4970_v3  ;;  %v371_v2 = vadd.s32 400, %v5258_v48  ;;  %v372_v3 = vadd.s32 408, %v5258_v48 }
  0x93   :  { %1647 = vmatprep.subr.bf16.mxu0 %v5119_v33  ;;  %1936 = vmatprep.subr.bf16.mxu1 %v5119_v33 }
  0x96   :  { %1648 = vmatpush1.bf16.msra.mxu0 %v4971_v4  ;;  %1937 = vmatpush1.bf16.msra.mxu1 %v4972_v6  ;;  %v373_v4 = vadd.s32 416, %v5258_v48  ;;  %v375_v6 = vadd.s32 432, %v5258_v48 }
  0x97   :  { %1649 = vmatprep.subr.bf16.mxu0 %v5119_v33  ;;  %1938 = vmatprep.subr.bf16.mxu1 %v5119_v33 }
  0x9a   :  { %1650 = vmatpush1.bf16.msra.mxu0 %v4973_v8  ;;  %1939 = vmatpush1.bf16.msra.mxu1 %v4974_v10  ;;  %v377_v8 = vadd.s32 448, %v5258_v48  ;;  %v378_v10 = vadd.s32 456, %v5258_v48 }
  0x9b   :  { %1651 = vmatprep.subr.bf16.mxu0 %v5119_v33  ;;  %1940 = vmatprep.subr.bf16.mxu1 %v5119_v33  ;;  %v342_v33 = vadd.s32 168, %v5258_v48 }
  0x9e   :  { %1652 = vmatpush1.bf16.msra.mxu0 %v4975_v14  ;;  %1941 = vmatpush1.bf16.msra.mxu1 %v4976_v15 }
  0xa1   :  { %3946 = vmatmul.mubr.msk.bf16.vlgmr.msra.gmra.mrb[0].mxu0 %vm3945_vm12, %v5120_v61  ;;  %4074 = vmatmul.mubr.msk.bf16.vlgmr.msra.gmra.mrb[0].mxu1 %vm4073_vm15, %v5120_v61  ;;  %vm3951_vm12 = vmpackc.low %vm426_vm7, %vm422_vm6  ;;  %vm425_vm15 = vcmp.eq.s32.totalorder %v326_v17, %v5300_v9  ;;  %vm436_vm6 = vcmp.eq.s32.totalorder %v328_v19, %v5276_v58 }
  0xa2   :  { %3948 = vmatprep.mubr.msk.bf16.mxu0 %vm3947_vm0, %v5120_v61  ;;  %4076 = vmatprep.mubr.msk.bf16.mxu1 %vm4075_vm1, %v5120_v61  ;;  %vm423_vm0 = vcmp.eq.s32.totalorder %v325_v16, %v5303_v11  ;;  %vm427_vm1 = vcmp.eq.s32.totalorder %v326_v17, %v5303_v11  ;;  %vm3953_vm4 = vmpackc.low %vm425_vm15, %vm421_vm14  ;;  %vm438_vm14 = vcmp.eq.s32.totalorder %v329_v20, %v5274_v57 }
  0xa3   :  { %vm4081_vm7 = vmpackc.low %vm427_vm1, %vm423_vm0  ;;  %vm442_vm15 = vcmp.eq.s32.totalorder %v330_v21, %v5274_v57  ;;  %vm440_vm1 = vcmp.eq.s32.totalorder %v329_v20, %v5276_v58 }
  0xa4   :  { %vm4083_vm9 = vmpackc.low %vm436_vm6, %vm432_vm5  ;;  %vm437_vm6 = vcmp.eq.s32.totalorder %v329_v20, %v5300_v9 }
  0xa9   :  { %3950 = vmatmul.mubr.msk.bf16.gmra.mrb[4].mxu0 %vm3949_vm8, %v5120_v61  ;;  %4078 = vmatmul.mubr.msk.bf16.gmra.mrb[4].mxu1 %vm4077_vm11, %v5120_v61  ;;  %vm3955_vm8 = vmpackc.low %vm434_vm3, %vm430_vm2  ;;  %vm433_vm11 = vcmp.eq.s32.totalorder %v328_v19, %v5300_v9  ;;  %vm444_vm2 = vcmp.eq.s32.totalorder %v330_v21, %v5276_v58 }
  0xaa   :  { %3952 = vmatprep.mubr.msk.bf16.mxu0 %vm3951_vm12, %v5120_v61  ;;  %4080 = vmatprep.mubr.msk.bf16.mxu1 %vm4079_vm13, %v5120_v61  ;;  %vm431_vm12 = vcmp.eq.s32.totalorder %v327_v18, %v5303_v11  ;;  %vm435_vm13 = vcmp.eq.s32.totalorder %v328_v19, %v5303_v11  ;;  %vm3957_vm0 = vmpackc.low %vm433_vm11, %vm429_vm10  ;;  %vm446_vm10 = vcmp.eq.s32.totalorder %v331_v22, %v5274_v57 }
  0xab   :  { %vm4085_vm3 = vmpackc.low %vm435_vm13, %vm431_vm12  ;;  %vm450_vm11 = vcmp.eq.s32.totalorder %v332_v23, %v5274_v57  ;;  %vm448_vm13 = vcmp.eq.s32.totalorder %v331_v22, %v5276_v58 }
  0xac   :  { %vm4087_vm5 = vmpackc.low %vm444_vm2, %vm440_vm1  ;;  %vm445_vm2 = vcmp.eq.s32.totalorder %v331_v22, %v5300_v9 }
  0xb1   :  { %3954 = vmatmul.mubr.msk.bf16.gmra.mrb[8].mxu0 %vm3953_vm4, %v5120_v61  ;;  %4082 = vmatmul.mubr.msk.bf16.gmra.mrb[8].mxu1 %vm4081_vm7, %v5120_v61  ;;  %vm3959_vm4 = vmpackc.low %vm442_vm15, %vm438_vm14  ;;  %vm441_vm7 = vcmp.eq.s32.totalorder %v330_v21, %v5300_v9  ;;  %vm452_vm14 = vcmp.eq.s32.totalorder %v332_v23, %v5276_v58 }
  0xb2   :  { %3956 = vmatprep.mubr.msk.bf16.mxu0 %vm3955_vm8, %v5120_v61  ;;  %4084 = vmatprep.mubr.msk.bf16.mxu1 %vm4083_vm9, %v5120_v61  ;;  %vm439_vm8 = vcmp.eq.s32.totalorder %v329_v20, %v5303_v11  ;;  %vm443_vm9 = vcmp.eq.s32.totalorder %v330_v21, %v5303_v11  ;;  %vm3961_vm12 = vmpackc.low %vm441_vm7, %vm437_vm6  ;;  %vm454_vm6 = vcmp.eq.s32.totalorder %v333_v24, %v5274_v57  ;;  %v1302_v20 = vld [vmem:[#allocation2 + $0x8] sm:$0xff] }
  0xb3   :  { %vm4089_vm15 = vmpackc.low %vm443_vm9, %vm439_vm8  ;;  %vm458_vm7 = vcmp.eq.s32.totalorder %v334_v25, %v5274_v57  ;;  %vm456_vm9 = vcmp.eq.s32.totalorder %v333_v24, %v5276_v58 }
  0xb4   :  { %vm4091_vm1 = vmpackc.low %vm452_vm14, %vm448_vm13  ;;  %vm453_vm14 = vcmp.eq.s32.totalorder %v333_v24, %v5300_v9 }
  0xb9   :  { %3958 = vmatmul.mubr.msk.bf16.gmra.mrb[12].mxu0 %vm3957_vm0, %v5120_v61  ;;  %4086 = vmatmul.mubr.msk.bf16.gmra.mrb[12].mxu1 %vm4085_vm3, %v5120_v61  ;;  %vm3963_vm0 = vmpackc.low %vm450_vm11, %vm446_vm10  ;;  %vm449_vm3 = vcmp.eq.s32.totalorder %v332_v23, %v5300_v9  ;;  %vm460_vm10 = vcmp.eq.s32.totalorder %v334_v25, %v5276_v58 }
  0xba   :  { %3960 = vmatprep.mubr.msk.bf16.mxu0 %vm3959_vm4, %v5120_v61  ;;  %4088 = vmatprep.mubr.msk.bf16.mxu1 %vm4087_vm5, %v5120_v61  ;;  %vm447_vm4 = vcmp.eq.s32.totalorder %v331_v22, %v5303_v11  ;;  %vm451_vm5 = vcmp.eq.s32.totalorder %v332_v23, %v5303_v11  ;;  %vm3965_vm8 = vmpackc.low %vm449_vm3, %vm445_vm2  ;;  %vm462_vm2 = vcmp.eq.s32.totalorder %v335_v26, %v5274_v57 }
  0xbb   :  { %vm4093_vm11 = vmpackc.low %vm451_vm5, %vm447_vm4  ;;  %vm466_vm3 = vcmp.eq.s32.totalorder %v336_v27, %v5274_v57  ;;  %vm464_vm5 = vcmp.eq.s32.totalorder %v335_v26, %v5276_v58 }
  0xbc   :  { %vm4095_vm13 = vmpackc.low %vm460_vm10, %vm456_vm9  ;;  %vm461_vm10 = vcmp.eq.s32.totalorder %v335_v26, %v5300_v9 }
  0xc1   :  { %3962 = vmatmul.mubr.msk.bf16.gmra.mrb[16].mxu0 %vm3961_vm12, %v5120_v61  ;;  %4090 = vmatmul.mubr.msk.bf16.gmra.mrb[16].mxu1 %vm4089_vm15, %v5120_v61  ;;  %vm3967_vm12 = vmpackc.low %vm458_vm7, %vm454_vm6  ;;  %vm457_vm15 = vcmp.eq.s32.totalorder %v334_v25, %v5300_v9  ;;  %vm468_vm6 = vcmp.eq.s32.totalorder %v336_v27, %v5276_v58 }
  0xc2   :  { %3964 = vmatprep.mubr.msk.bf16.mxu0 %vm3963_vm0, %v5120_v61  ;;  %4092 = vmatprep.mubr.msk.bf16.mxu1 %vm4091_vm1, %v5120_v61  ;;  %vm455_vm0 = vcmp.eq.s32.totalorder %v333_v24, %v5303_v11  ;;  %vm459_vm1 = vcmp.eq.s32.totalorder %v334_v25, %v5303_v11  ;;  %vm3969_vm4 = vmpackc.low %vm457_vm15, %vm453_vm14  ;;  %vm470_vm14 = vcmp.eq.s32.totalorder %v337_v28, %v5274_v57 }
  0xc3   :  { %vm4097_vm7 = vmpackc.low %vm459_vm1, %vm455_vm0  ;;  %vm474_vm15 = vcmp.eq.s32.totalorder %v338_v29, %v5274_v57  ;;  %vm472_vm1 = vcmp.eq.s32.totalorder %v337_v28, %v5276_v58 }
  0xc4   :  { %vm4099_vm9 = vmpackc.low %vm468_vm6, %vm464_vm5  ;;  %vm469_vm6 = vcmp.eq.s32.totalorder %v337_v28, %v5300_v9 }
  0xc9   :  { %3966 = vmatmul.mubr.msk.bf16.gmra.mrb[20].mxu0 %vm3965_vm8, %v5120_v61  ;;  %4094 = vmatmul.mubr.msk.bf16.gmra.mrb[20].mxu1 %vm4093_vm11, %v5120_v61  ;;  %vm3971_vm8 = vmpackc.low %vm466_vm3, %vm462_vm2  ;;  %vm465_vm11 = vcmp.eq.s32.totalorder %v336_v27, %v5300_v9  ;;  %vm476_vm2 = vcmp.eq.s32.totalorder %v338_v29, %v5276_v58 }
  0xca   :  { %3968 = vmatprep.mubr.msk.bf16.mxu0 %vm3967_vm12, %v5120_v61  ;;  %4096 = vmatprep.mubr.msk.bf16.mxu1 %vm4095_vm13, %v5120_v61  ;;  %vm463_vm12 = vcmp.eq.s32.totalorder %v335_v26, %v5303_v11  ;;  %vm467_vm13 = vcmp.eq.s32.totalorder %v336_v27, %v5303_v11  ;;  %vm3973_vm0 = vmpackc.low %vm465_vm11, %vm461_vm10  ;;  %vm478_vm10 = vcmp.eq.s32.totalorder %v339_v30, %v5274_v57  ;;  %v379_v26 = vadd.s32 464, %v5258_v48 }
  0xcb   :  { %vm4101_vm3 = vmpackc.low %vm467_vm13, %vm463_vm12  ;;  %vm482_vm11 = vcmp.eq.s32.totalorder %v340_v31, %v5274_v57  ;;  %vm480_vm13 = vcmp.eq.s32.totalorder %v339_v30, %v5276_v58  ;;  %v380_v27 = vadd.s32 472, %v5258_v48 }
  0xcc   :  { %vm4103_vm5 = vmpackc.low %vm476_vm2, %vm472_vm1  ;;  %vm477_vm2 = vcmp.eq.s32.totalorder %v339_v30, %v5300_v9 }
  0xd1   :  { %3970 = vmatmul.mubr.msk.bf16.gmra.mrb[24].mxu0 %vm3969_vm4, %v5120_v61  ;;  %4098 = vmatmul.mubr.msk.bf16.gmra.mrb[24].mxu1 %vm4097_vm7, %v5120_v61  ;;  %vm3975_vm4 = vmpackc.low %vm474_vm15, %vm470_vm14  ;;  %vm473_vm7 = vcmp.eq.s32.totalorder %v338_v29, %v5300_v9  ;;  %vm484_vm14 = vcmp.eq.s32.totalorder %v340_v31, %v5276_v58 }
  0xd2   :  { %3972 = vmatprep.mubr.msk.bf16.mxu0 %vm3971_vm8, %v5120_v61  ;;  %4100 = vmatprep.mubr.msk.bf16.mxu1 %vm4099_vm9, %v5120_v61  ;;  %vm471_vm8 = vcmp.eq.s32.totalorder %v337_v28, %v5303_v11  ;;  %vm475_vm9 = vcmp.eq.s32.totalorder %v338_v29, %v5303_v11  ;;  %vm3977_vm12 = vmpackc.low %vm473_vm7, %vm469_vm6  ;;  %vm486_vm6 = vcmp.eq.s32.totalorder %v341_v32, %v5274_v57 }
  0xd3   :  { %vm4105_vm15 = vmpackc.low %vm475_vm9, %vm471_vm8  ;;  %vm490_vm7 = vcmp.eq.s32.totalorder %v342_v33, %v5274_v57  ;;  %vm488_vm9 = vcmp.eq.s32.totalorder %v341_v32, %v5276_v58 }
  0xd4   :  { %vm4107_vm1 = vmpackc.low %vm484_vm14, %vm480_vm13  ;;  %vm485_vm14 = vcmp.eq.s32.totalorder %v341_v32, %v5300_v9 }
  0xd9   :  { %3974 = vmatmul.mubr.msk.bf16.gmra.mrb[28].mxu0 %vm3973_vm0, %v5120_v61  ;;  %4102 = vmatmul.mubr.msk.bf16.gmra.mrb[28].mxu1 %vm4101_vm3, %v5120_v61  ;;  %vm3979_vm0 = vmpackc.low %vm482_vm11, %vm478_vm10  ;;  %vm481_vm3 = vcmp.eq.s32.totalorder %v340_v31, %v5300_v9  ;;  %vm492_vm10 = vcmp.eq.s32.totalorder %v342_v33, %v5276_v58 }
  0xda   :  { %3976 = vmatprep.mubr.msk.bf16.mxu0 %vm3975_vm4, %v5120_v61  ;;  %4104 = vmatprep.mubr.msk.bf16.mxu1 %vm4103_vm5, %v5120_v61  ;;  %vm479_vm4 = vcmp.eq.s32.totalorder %v339_v30, %v5303_v11  ;;  %vm483_vm5 = vcmp.eq.s32.totalorder %v340_v31, %v5303_v11  ;;  %vm3981_vm8 = vmpackc.low %vm481_vm3, %vm477_vm2  ;;  %vm494_vm2 = vcmp.eq.s32.totalorder %v343_v34, %v5274_v57  ;;  %v1303_v30 = vld [vmem:[#allocation2 + $0x10] sm:$0xff] }
  0xdb   :  { %vm4109_vm11 = vmpackc.low %vm483_vm5, %vm479_vm4  ;;  %vm498_vm3 = vcmp.eq.s32.totalorder %v344_v35, %v5274_v57  ;;  %vm496_vm5 = vcmp.eq.s32.totalorder %v343_v34, %v5276_v58 }
  0xdc   :  { %vm4111_vm13 = vmpackc.low %vm492_vm10, %vm488_vm9  ;;  %vm493_vm10 = vcmp.eq.s32.totalorder %v343_v34, %v5300_v9 }
  0xe1   :  { %3978 = vmatmul.mubr.msk.bf16.gmra.mrb[32].mxu0 %vm3977_vm12, %v5120_v61  ;;  %4106 = vmatmul.mubr.msk.bf16.gmra.mrb[32].mxu1 %vm4105_vm15, %v5120_v61  ;;  %vm3983_vm12 = vmpackc.low %vm490_vm7, %vm486_vm6  ;;  %vm489_vm15 = vcmp.eq.s32.totalorder %v342_v33, %v5300_v9  ;;  %vm500_vm6 = vcmp.eq.s32.totalorder %v344_v35, %v5276_v58 }
  0xe2   :  { %3980 = vmatprep.mubr.msk.bf16.mxu0 %vm3979_vm0, %v5120_v61  ;;  %4108 = vmatprep.mubr.msk.bf16.mxu1 %vm4107_vm1, %v5120_v61  ;;  %vm487_vm0 = vcmp.eq.s32.totalorder %v341_v32, %v5303_v11  ;;  %vm491_vm1 = vcmp.eq.s32.totalorder %v342_v33, %v5303_v11  ;;  %vm3985_vm4 = vmpackc.low %vm489_vm15, %vm485_vm14  ;;  %vm502_vm14 = vcmp.eq.s32.totalorder %v345_v36, %v5274_v57 }
  0xe3   :  { %vm4113_vm7 = vmpackc.low %vm491_vm1, %vm487_vm0  ;;  %vm506_vm15 = vcmp.eq.s32.totalorder %v346_v37, %v5274_v57  ;;  %vm504_vm1 = vcmp.eq.s32.totalorder %v345_v36, %v5276_v58 }
  0xe4   :  { %vm4115_vm9 = vmpackc.low %vm500_vm6, %vm496_vm5  ;;  %vm501_vm6 = vcmp.eq.s32.totalorder %v345_v36, %v5300_v9 }
  0xe9   :  { %3982 = vmatmul.mubr.msk.bf16.gmra.mrb[36].mxu0 %vm3981_vm8, %v5120_v61  ;;  %4110 = vmatmul.mubr.msk.bf16.gmra.mrb[36].mxu1 %vm4109_vm11, %v5120_v61  ;;  %vm3987_vm8 = vmpackc.low %vm498_vm3, %vm494_vm2  ;;  %vm497_vm11 = vcmp.eq.s32.totalorder %v344_v35, %v5300_v9  ;;  %vm508_vm2 = vcmp.eq.s32.totalorder %v346_v37, %v5276_v58 }
  0xea   :  { %3984 = vmatprep.mubr.msk.bf16.mxu0 %vm3983_vm12, %v5120_v61  ;;  %4112 = vmatprep.mubr.msk.bf16.mxu1 %vm4111_vm13, %v5120_v61  ;;  %vm495_vm12 = vcmp.eq.s32.totalorder %v343_v34, %v5303_v11  ;;  %vm499_vm13 = vcmp.eq.s32.totalorder %v344_v35, %v5303_v11  ;;  %vm3989_vm0 = vmpackc.low %vm497_vm11, %vm493_vm10  ;;  %vm510_vm10 = vcmp.eq.s32.totalorder %v347_v38, %v5274_v57 }
  0xeb   :  { %vm4117_vm3 = vmpackc.low %vm499_vm13, %vm495_vm12  ;;  %vm514_vm11 = vcmp.eq.s32.totalorder %v348_v39, %v5274_v57  ;;  %vm512_vm13 = vcmp.eq.s32.totalorder %v347_v38, %v5276_v58 }
  0xec   :  { %vm4119_vm5 = vmpackc.low %vm508_vm2, %vm504_vm1  ;;  %vm509_vm2 = vcmp.eq.s32.totalorder %v347_v38, %v5300_v9 }
  0xf1   :  { %3986 = vmatmul.mubr.msk.bf16.gmra.mrb[40].mxu0 %vm3985_vm4, %v5120_v61  ;;  %4114 = vmatmul.mubr.msk.bf16.gmra.mrb[40].mxu1 %vm4113_vm7, %v5120_v61  ;;  %vm3991_vm4 = vmpackc.low %vm506_vm15, %vm502_vm14  ;;  %vm505_vm7 = vcmp.eq.s32.totalorder %v346_v37, %v5300_v9  ;;  %vm516_vm14 = vcmp.eq.s32.totalorder %v348_v39, %v5276_v58 }
  0xf2   :  { %3988 = vmatprep.mubr.msk.bf16.mxu0 %vm3987_vm8, %v5120_v61  ;;  %4116 = vmatprep.mubr.msk.bf16.mxu1 %vm4115_vm9, %v5120_v61  ;;  %vm503_vm8 = vcmp.eq.s32.totalorder %v345_v36, %v5303_v11  ;;  %vm507_vm9 = vcmp.eq.s32.totalorder %v346_v37, %v5303_v11  ;;  %vm3993_vm12 = vmpackc.low %vm505_vm7, %vm501_vm6  ;;  %vm518_vm6 = vcmp.eq.s32.totalorder %v349_v40, %v5274_v57  ;;  %v1304_v37 = vld [vmem:[#allocation2 + $0x18] sm:$0xff] }
  0xf3   :  { %vm4121_vm15 = vmpackc.low %vm507_vm9, %vm503_vm8  ;;  %vm522_vm7 = vcmp.eq.s32.totalorder %v350_v41, %v5274_v57  ;;  %vm520_vm9 = vcmp.eq.s32.totalorder %v349_v40, %v5276_v58 }
  0xf4   :  { %vm4123_vm1 = vmpackc.low %vm516_vm14, %vm512_vm13  ;;  %vm517_vm14 = vcmp.eq.s32.totalorder %v349_v40, %v5300_v9 }
  0xf9   :  { %3990 = vmatmul.mubr.msk.bf16.gmra.mrb[44].mxu0 %vm3989_vm0, %v5120_v61  ;;  %4118 = vmatmul.mubr.msk.bf16.gmra.mrb[44].mxu1 %vm4117_vm3, %v5120_v61  ;;  %vm3995_vm0 = vmpackc.low %vm514_vm11, %vm510_vm10  ;;  %vm513_vm3 = vcmp.eq.s32.totalorder %v348_v39, %v5300_v9  ;;  %vm524_vm10 = vcmp.eq.s32.totalorder %v350_v41, %v5276_v58 }
  0xfa   :  { %3992 = vmatprep.mubr.msk.bf16.mxu0 %vm3991_vm4, %v5120_v61  ;;  %4120 = vmatprep.mubr.msk.bf16.mxu1 %vm4119_vm5, %v5120_v61  ;;  %vm511_vm4 = vcmp.eq.s32.totalorder %v347_v38, %v5303_v11  ;;  %vm515_vm5 = vcmp.eq.s32.totalorder %v348_v39, %v5303_v11  ;;  %vm3997_vm8 = vmpackc.low %vm513_vm3, %vm509_vm2  ;;  %vm526_vm2 = vcmp.eq.s32.totalorder %v351_v42, %v5274_v57 }
  0xfb   :  { %vm4125_vm11 = vmpackc.low %vm515_vm5, %vm511_vm4  ;;  %vm530_vm3 = vcmp.eq.s32.totalorder %v352_v43, %v5274_v57  ;;  %vm528_vm5 = vcmp.eq.s32.totalorder %v351_v42, %v5276_v58 }
  0xfc   :  { %vm4127_vm13 = vmpackc.low %vm524_vm10, %vm520_vm9  ;;  %vm525_vm10 = vcmp.eq.s32.totalorder %v351_v42, %v5300_v9 }
 0x101   :  { %3994 = vmatmul.mubr.msk.bf16.gmra.mrb[48].mxu0 %vm3993_vm12, %v5120_v61  ;;  %4122 = vmatmul.mubr.msk.bf16.gmra.mrb[48].mxu1 %vm4121_vm15, %v5120_v61  ;;  %vm3999_vm12 = vmpackc.low %vm522_vm7, %vm518_vm6  ;;  %vm521_vm15 = vcmp.eq.s32.totalorder %v350_v41, %v5300_v9  ;;  %vm532_vm6 = vcmp.eq.s32.totalorder %v352_v43, %v5276_v58 }
 0x102   :  { %3996 = vmatprep.mubr.msk.bf16.mxu0 %vm3995_vm0, %v5120_v61  ;;  %4124 = vmatprep.mubr.msk.bf16.mxu1 %vm4123_vm1, %v5120_v61  ;;  %vm519_vm0 = vcmp.eq.s32.totalorder %v349_v40, %v5303_v11  ;;  %vm523_vm1 = vcmp.eq.s32.totalorder %v350_v41, %v5303_v11  ;;  %vm4001_vm4 = vmpackc.low %vm521_vm15, %vm517_vm14  ;;  %vm534_vm14 = vcmp.eq.s32.totalorder %v353_v44, %v5274_v57 }
 0x103   :  { %vm4129_vm7 = vmpackc.low %vm523_vm1, %vm519_vm0  ;;  %vm538_vm15 = vcmp.eq.s32.totalorder %v354_v45, %v5274_v57  ;;  %vm536_vm1 = vcmp.eq.s32.totalorder %v353_v44, %v5276_v58 }
 0x104   :  { %vm4131_vm9 = vmpackc.low %vm532_vm6, %vm528_vm5  ;;  %vm533_vm6 = vcmp.eq.s32.totalorder %v353_v44, %v5300_v9 }
 0x109   :  { %3998 = vmatmul.mubr.msk.bf16.gmra.mrb[52].mxu0 %vm3997_vm8, %v5120_v61  ;;  %4126 = vmatmul.mubr.msk.bf16.gmra.mrb[52].mxu1 %vm4125_vm11, %v5120_v61  ;;  %vm4003_vm8 = vmpackc.low %vm530_vm3, %vm526_vm2  ;;  %vm529_vm11 = vcmp.eq.s32.totalorder %v352_v43, %v5300_v9  ;;  %vm540_vm2 = vcmp.eq.s32.totalorder %v354_v45, %v5276_v58 }
 0x10a   :  { %4000 = vmatprep.mubr.msk.bf16.mxu0 %vm3999_vm12, %v5120_v61  ;;  %4128 = vmatprep.mubr.msk.bf16.mxu1 %vm4127_vm13, %v5120_v61  ;;  %vm527_vm12 = vcmp.eq.s32.totalorder %v351_v42, %v5303_v11  ;;  %vm531_vm13 = vcmp.eq.s32.totalorder %v352_v43, %v5303_v11  ;;  %vm4005_vm0 = vmpackc.low %vm529_vm11, %vm525_vm10  ;;  %vm542_vm10 = vcmp.eq.s32.totalorder %v355_v46, %v5274_v57  ;;  %v381_v43 = vadd.s32 480, %v5258_v48 }
 0x10b   :  { %vm4133_vm3 = vmpackc.low %vm531_vm13, %vm527_vm12  ;;  %vm546_vm11 = vcmp.eq.s32.totalorder %v356_v47, %v5274_v57  ;;  %vm544_vm13 = vcmp.eq.s32.totalorder %v355_v46, %v5276_v58 }
 0x10c   :  { %vm4135_vm5 = vmpackc.low %vm540_vm2, %vm536_vm1  ;;  %vm541_vm2 = vcmp.eq.s32.totalorder %v355_v46, %v5300_v9 }
 0x111   :  { %4002 = vmatmul.mubr.msk.bf16.gmra.mrb[56].mxu0 %vm4001_vm4, %v5120_v61  ;;  %4130 = vmatmul.mubr.msk.bf16.gmra.mrb[56].mxu1 %vm4129_vm7, %v5120_v61  ;;  %vm4007_vm4 = vmpackc.low %vm538_vm15, %vm534_vm14  ;;  %vm537_vm7 = vcmp.eq.s32.totalorder %v354_v45, %v5300_v9  ;;  %vm548_vm14 = vcmp.eq.s32.totalorder %v356_v47, %v5276_v58 }
 0x112   :  { %4004 = vmatprep.mubr.msk.bf16.mxu0 %vm4003_vm8, %v5120_v61  ;;  %4132 = vmatprep.mubr.msk.bf16.mxu1 %vm4131_vm9, %v5120_v61  ;;  %vm535_vm8 = vcmp.eq.s32.totalorder %v353_v44, %v5303_v11  ;;  %vm539_vm9 = vcmp.eq.s32.totalorder %v354_v45, %v5303_v11  ;;  %vm4009_vm12 = vmpackc.low %vm537_vm7, %vm533_vm6  ;;  %vm550_vm6 = vcmp.eq.s32.totalorder %v357_v49, %v5274_v57  ;;  %v382_v44 = vadd.s32 488, %v5258_v48 }
 0x113   :  { %vm4137_vm15 = vmpackc.low %vm539_vm9, %vm535_vm8  ;;  %vm554_vm7 = vcmp.eq.s32.totalorder %v358_v50, %v5274_v57  ;;  %vm552_vm9 = vcmp.eq.s32.totalorder %v357_v49, %v5276_v58 }
 0x114   :  { %vm4139_vm1 = vmpackc.low %vm548_vm14, %vm544_vm13  ;;  %vm549_vm14 = vcmp.eq.s32.totalorder %v357_v49, %v5300_v9 }
 0x119   :  { %4006 = vmatmul.mubr.msk.bf16.gmra.mrb[60].mxu0 %vm4005_vm0, %v5120_v61  ;;  %4134 = vmatmul.mubr.msk.bf16.gmra.mrb[60].mxu1 %vm4133_vm3, %v5120_v61  ;;  %vm4011_vm0 = vmpackc.low %vm546_vm11, %vm542_vm10  ;;  %vm545_vm3 = vcmp.eq.s32.totalorder %v356_v47, %v5300_v9  ;;  %vm556_vm10 = vcmp.eq.s32.totalorder %v358_v50, %v5276_v58 }
 0x11a   :  { %4008 = vmatprep.mubr.msk.bf16.mxu0 %vm4007_vm4, %v5120_v61  ;;  %4136 = vmatprep.mubr.msk.bf16.mxu1 %vm4135_vm5, %v5120_v61  ;;  %vm543_vm4 = vcmp.eq.s32.totalorder %v355_v46, %v5303_v11  ;;  %vm547_vm5 = vcmp.eq.s32.totalorder %v356_v47, %v5303_v11  ;;  %vm4013_vm8 = vmpackc.low %vm545_vm3, %vm541_vm2  ;;  %vm558_vm2 = vcmp.eq.s32.totalorder %v359_v51, %v5274_v57  ;;  %v1305_v47 = vld [vmem:[#allocation2 + $0x20] sm:$0xff] }
 0x11b   :  { %vm4141_vm11 = vmpackc.low %vm547_vm5, %vm543_vm4  ;;  %vm562_vm3 = vcmp.eq.s32.totalorder %v360_v52, %v5274_v57  ;;  %vm560_vm5 = vcmp.eq.s32.totalorder %v359_v51, %v5276_v58 }
 0x11c   :  { %vm4143_vm13 = vmpackc.low %vm556_vm10, %vm552_vm9  ;;  %vm557_vm10 = vcmp.eq.s32.totalorder %v359_v51, %v5300_v9 }
 0x121   :  { %4010 = vmatmul.mubr.msk.bf16.gmra.mrb[64].mxu0 %vm4009_vm12, %v5120_v61  ;;  %4138 = vmatmul.mubr.msk.bf16.gmra.mrb[64].mxu1 %vm4137_vm15, %v5120_v61  ;;  %vm4015_vm12 = vmpackc.low %vm554_vm7, %vm550_vm6  ;;  %vm553_vm15 = vcmp.eq.s32.totalorder %v358_v50, %v5300_v9  ;;  %vm564_vm6 = vcmp.eq.s32.totalorder %v360_v52, %v5276_v58 }
 0x122   :  { %4012 = vmatprep.mubr.msk.bf16.mxu0 %vm4011_vm0, %v5120_v61  ;;  %4140 = vmatprep.mubr.msk.bf16.mxu1 %vm4139_vm1, %v5120_v61  ;;  %vm551_vm0 = vcmp.eq.s32.totalorder %v357_v49, %v5303_v11  ;;  %vm555_vm1 = vcmp.eq.s32.totalorder %v358_v50, %v5303_v11  ;;  %vm4017_vm4 = vmpackc.low %vm553_vm15, %vm549_vm14  ;;  %vm566_vm14 = vcmp.eq.s32.totalorder %v361_v53, %v5274_v57 }
 0x123   :  { %vm4145_vm7 = vmpackc.low %vm555_vm1, %vm551_vm0  ;;  %vm570_vm15 = vcmp.eq.s32.totalorder %v362_v54, %v5274_v57  ;;  %vm568_vm1 = vcmp.eq.s32.totalorder %v361_v53, %v5276_v58 }
 0x124   :  { %vm4147_vm9 = vmpackc.low %vm564_vm6, %vm560_vm5  ;;  %vm565_vm6 = vcmp.eq.s32.totalorder %v361_v53, %v5300_v9 }
 0x129   :  { %4014 = vmatmul.mubr.msk.bf16.gmra.mrb[68].mxu0 %vm4013_vm8, %v5120_v61  ;;  %4142 = vmatmul.mubr.msk.bf16.gmra.mrb[68].mxu1 %vm4141_vm11, %v5120_v61  ;;  %vm4019_vm8 = vmpackc.low %vm562_vm3, %vm558_vm2  ;;  %vm561_vm11 = vcmp.eq.s32.totalorder %v360_v52, %v5300_v9  ;;  %vm572_vm2 = vcmp.eq.s32.totalorder %v362_v54, %v5276_v58 }
 0x12a   :  { %4016 = vmatprep.mubr.msk.bf16.mxu0 %vm4015_vm12, %v5120_v61  ;;  %4144 = vmatprep.mubr.msk.bf16.mxu1 %vm4143_vm13, %v5120_v61  ;;  %vm559_vm12 = vcmp.eq.s32.totalorder %v359_v51, %v5303_v11  ;;  %vm563_vm13 = vcmp.eq.s32.totalorder %v360_v52, %v5303_v11  ;;  %vm4021_vm0 = vmpackc.low %vm561_vm11, %vm557_vm10  ;;  %vm574_vm10 = vcmp.eq.s32.totalorder %v363_v55, %v5274_v57 }
 0x12b   :  { %vm4149_vm3 = vmpackc.low %vm563_vm13, %vm559_vm12  ;;  %vm578_vm11 = vcmp.eq.s32.totalorder %v364_v56, %v5274_v57  ;;  %vm576_vm13 = vcmp.eq.s32.totalorder %v363_v55, %v5276_v58 }
 0x12c   :  { %vm4151_vm5 = vmpackc.low %vm572_vm2, %vm568_vm1  ;;  %vm573_vm2 = vcmp.eq.s32.totalorder %v363_v55, %v5300_v9 }
 0x131   :  { %4018 = vmatmul.mubr.msk.bf16.gmra.mrb[72].mxu0 %vm4017_vm4, %v5120_v61  ;;  %4146 = vmatmul.mubr.msk.bf16.gmra.mrb[72].mxu1 %vm4145_vm7, %v5120_v61  ;;  %vm4023_vm4 = vmpackc.low %vm570_vm15, %vm566_vm14  ;;  %vm569_vm7 = vcmp.eq.s32.totalorder %v362_v54, %v5300_v9  ;;  %vm580_vm14 = vcmp.eq.s32.totalorder %v364_v56, %v5276_v58 }
 0x132   :  { %4020 = vmatprep.mubr.msk.bf16.mxu0 %vm4019_vm8, %v5120_v61  ;;  %4148 = vmatprep.mubr.msk.bf16.mxu1 %vm4147_vm9, %v5120_v61  ;;  %vm567_vm8 = vcmp.eq.s32.totalorder %v361_v53, %v5303_v11  ;;  %vm571_vm9 = vcmp.eq.s32.totalorder %v362_v54, %v5303_v11  ;;  %vm4025_vm12 = vmpackc.low %vm569_vm7, %vm565_vm6  ;;  %vm582_vm6 = vcmp.eq.s32.totalorder %v365_v59, %v5274_v57 }
 0x133   :  { %vm4153_vm15 = vmpackc.low %vm571_vm9, %vm567_vm8  ;;  %vm586_vm7 = vcmp.eq.s32.totalorder %v366_v60, %v5274_v57  ;;  %vm584_vm9 = vcmp.eq.s32.totalorder %v365_v59, %v5276_v58 }
 0x134   :  { %vm4155_vm1 = vmpackc.low %vm580_vm14, %vm576_vm13  ;;  %vm581_vm14 = vcmp.eq.s32.totalorder %v365_v59, %v5300_v9 }
 0x139   :  { %4022 = vmatmul.mubr.msk.bf16.gmra.mrb[76].mxu0 %vm4021_vm0, %v5120_v61  ;;  %4150 = vmatmul.mubr.msk.bf16.gmra.mrb[76].mxu1 %vm4149_vm3, %v5120_v61  ;;  %vm4027_vm0 = vmpackc.low %vm578_vm11, %vm574_vm10  ;;  %vm577_vm3 = vcmp.eq.s32.totalorder %v364_v56, %v5300_v9  ;;  %vm588_vm10 = vcmp.eq.s32.totalorder %v366_v60, %v5276_v58 }
 0x13a   :  { %4024 = vmatprep.mubr.msk.bf16.mxu0 %vm4023_vm4, %v5120_v61  ;;  %4152 = vmatprep.mubr.msk.bf16.mxu1 %vm4151_vm5, %v5120_v61  ;;  %vm575_vm4 = vcmp.eq.s32.totalorder %v363_v55, %v5303_v11  ;;  %vm579_vm5 = vcmp.eq.s32.totalorder %v364_v56, %v5303_v11  ;;  %vm4029_vm8 = vmpackc.low %vm577_vm3, %vm573_vm2  ;;  %vm590_vm2 = vcmp.eq.s32.totalorder %v367_v62, %v5274_v57  ;;  %v1306_v55 = vld [vmem:[#allocation2 + $0x28] sm:$0xff] }
 0x13b   :  { %vm4157_vm11 = vmpackc.low %vm579_vm5, %vm575_vm4  ;;  %vm594_vm3 = vcmp.eq.s32.totalorder %v368_v63, %v5274_v57  ;;  %vm592_vm5 = vcmp.eq.s32.totalorder %v367_v62, %v5276_v58 }
 0x13c   :  { %vm4159_vm13 = vmpackc.low %vm588_vm10, %vm584_vm9  ;;  %vm589_vm10 = vcmp.eq.s32.totalorder %v367_v62, %v5300_v9 }
 0x141   :  { %4026 = vmatmul.mubr.msk.bf16.gmra.mrb[80].mxu0 %vm4025_vm12, %v5120_v61  ;;  %4154 = vmatmul.mubr.msk.bf16.gmra.mrb[80].mxu1 %vm4153_vm15, %v5120_v61  ;;  %vm4031_vm12 = vmpackc.low %vm586_vm7, %vm582_vm6  ;;  %vm585_vm15 = vcmp.eq.s32.totalorder %v366_v60, %v5300_v9  ;;  %vm596_vm6 = vcmp.eq.s32.totalorder %v368_v63, %v5276_v58 }
 0x142   :  { %4028 = vmatprep.mubr.msk.bf16.mxu0 %vm4027_vm0, %v5120_v61  ;;  %4156 = vmatprep.mubr.msk.bf16.mxu1 %vm4155_vm1, %v5120_v61  ;;  %vm583_vm0 = vcmp.eq.s32.totalorder %v365_v59, %v5303_v11  ;;  %vm587_vm1 = vcmp.eq.s32.totalorder %v366_v60, %v5303_v11  ;;  %vm4033_vm4 = vmpackc.low %vm585_vm15, %vm581_vm14  ;;  %vm598_vm14 = vcmp.eq.s32.totalorder %v369_v0, %v5274_v57 }
 0x143   :  { %vm4161_vm7 = vmpackc.low %vm587_vm1, %vm583_vm0  ;;  %vm602_vm15 = vcmp.eq.s32.totalorder %v370_v1, %v5274_v57  ;;  %vm600_vm1 = vcmp.eq.s32.totalorder %v369_v0, %v5276_v58 }
 0x144   :  { %vm4163_vm9 = vmpackc.low %vm596_vm6, %vm592_vm5  ;;  %vm597_vm6 = vcmp.eq.s32.totalorder %v369_v0, %v5300_v9 }
 0x149   :  { %4030 = vmatmul.mubr.msk.bf16.gmra.mrb[84].mxu0 %vm4029_vm8, %v5120_v61  ;;  %4158 = vmatmul.mubr.msk.bf16.gmra.mrb[84].mxu1 %vm4157_vm11, %v5120_v61  ;;  %vm4035_vm8 = vmpackc.low %vm594_vm3, %vm590_vm2  ;;  %vm593_vm11 = vcmp.eq.s32.totalorder %v368_v63, %v5300_v9  ;;  %vm604_vm2 = vcmp.eq.s32.totalorder %v370_v1, %v5276_v58 }
 0x14a   :  { %4032 = vmatprep.mubr.msk.bf16.mxu0 %vm4031_vm12, %v5120_v61  ;;  %4160 = vmatprep.mubr.msk.bf16.mxu1 %vm4159_vm13, %v5120_v61  ;;  %vm591_vm12 = vcmp.eq.s32.totalorder %v367_v62, %v5303_v11  ;;  %vm595_vm13 = vcmp.eq.s32.totalorder %v368_v63, %v5303_v11  ;;  %vm4037_vm0 = vmpackc.low %vm593_vm11, %vm589_vm10  ;;  %vm606_vm10 = vcmp.eq.s32.totalorder %v371_v2, %v5274_v57 }
 0x14b   :  { %vm4165_vm3 = vmpackc.low %vm595_vm13, %vm591_vm12  ;;  %vm610_vm11 = vcmp.eq.s32.totalorder %v372_v3, %v5274_v57  ;;  %vm608_vm13 = vcmp.eq.s32.totalorder %v371_v2, %v5276_v58 }
 0x14c   :  { %vm4167_vm5 = vmpackc.low %vm604_vm2, %vm600_vm1  ;;  %vm605_vm2 = vcmp.eq.s32.totalorder %v371_v2, %v5300_v9 }
 0x151   :  { %4034 = vmatmul.mubr.msk.bf16.gmra.mrb[88].mxu0 %vm4033_vm4, %v5120_v61  ;;  %4162 = vmatmul.mubr.msk.bf16.gmra.mrb[88].mxu1 %vm4161_vm7, %v5120_v61  ;;  %vm4039_vm4 = vmpackc.low %vm602_vm15, %vm598_vm14  ;;  %vm601_vm7 = vcmp.eq.s32.totalorder %v370_v1, %v5300_v9  ;;  %vm612_vm14 = vcmp.eq.s32.totalorder %v372_v3, %v5276_v58 }
 0x152   :  { %4036 = vmatprep.mubr.msk.bf16.mxu0 %vm4035_vm8, %v5120_v61  ;;  %4164 = vmatprep.mubr.msk.bf16.mxu1 %vm4163_vm9, %v5120_v61  ;;  %vm599_vm8 = vcmp.eq.s32.totalorder %v369_v0, %v5303_v11  ;;  %vm603_vm9 = vcmp.eq.s32.totalorder %v370_v1, %v5303_v11  ;;  %vm4041_vm12 = vmpackc.low %vm601_vm7, %vm597_vm6  ;;  %vm614_vm6 = vcmp.eq.s32.totalorder %v373_v4, %v5274_v57  ;;  %v383_v0 = vadd.s32 496, %v5258_v48 }
 0x153   :  { %vm4169_vm15 = vmpackc.low %vm603_vm9, %vm599_vm8  ;;  %vm618_vm7 = vcmp.eq.s32.totalorder %v374_v5, %v5274_v57  ;;  %vm616_vm9 = vcmp.eq.s32.totalorder %v373_v4, %v5276_v58  ;;  %v384_v1 = vadd.s32 504, %v5258_v48 }
 0x154   :  { %vm4171_vm1 = vmpackc.low %vm612_vm14, %vm608_vm13  ;;  %vm613_vm14 = vcmp.eq.s32.totalorder %v373_v4, %v5300_v9 }
 0x159   :  { %4038 = vmatmul.mubr.msk.bf16.gmra.mrb[92].mxu0 %vm4037_vm0, %v5120_v61  ;;  %4166 = vmatmul.mubr.msk.bf16.gmra.mrb[92].mxu1 %vm4165_vm3, %v5120_v61  ;;  %vm4043_vm0 = vmpackc.low %vm610_vm11, %vm606_vm10  ;;  %vm609_vm3 = vcmp.eq.s32.totalorder %v372_v3, %v5300_v9  ;;  %vm620_vm10 = vcmp.eq.s32.totalorder %v374_v5, %v5276_v58 }
 0x15a   :  { %4040 = vmatprep.mubr.msk.bf16.mxu0 %vm4039_vm4, %v5120_v61  ;;  %4168 = vmatprep.mubr.msk.bf16.mxu1 %vm4167_vm5, %v5120_v61  ;;  %vm607_vm4 = vcmp.eq.s32.totalorder %v371_v2, %v5303_v11  ;;  %vm611_vm5 = vcmp.eq.s32.totalorder %v372_v3, %v5303_v11  ;;  %vm4045_vm8 = vmpackc.low %vm609_vm3, %vm605_vm2  ;;  %vm622_vm2 = vcmp.eq.s32.totalorder %v375_v6, %v5274_v57  ;;  %v1307_v3 = vld [vmem:[#allocation2 + $0x30] sm:$0xff] }
 0x15b   :  { %vm4173_vm11 = vmpackc.low %vm611_vm5, %vm607_vm4  ;;  %vm626_vm3 = vcmp.eq.s32.totalorder %v376_v7, %v5274_v57  ;;  %vm624_vm5 = vcmp.eq.s32.totalorder %v375_v6, %v5276_v58 }
 0x15c   :  { %vm4175_vm13 = vmpackc.low %vm620_vm10, %vm616_vm9  ;;  %vm621_vm10 = vcmp.eq.s32.totalorder %v375_v6, %v5300_v9 }
 0x161   :  { %4042 = vmatmul.mubr.msk.bf16.gmra.mrb[96].mxu0 %vm4041_vm12, %v5120_v61  ;;  %4170 = vmatmul.mubr.msk.bf16.gmra.mrb[96].mxu1 %vm4169_vm15, %v5120_v61  ;;  %vm4047_vm12 = vmpackc.low %vm618_vm7, %vm614_vm6  ;;  %vm617_vm15 = vcmp.eq.s32.totalorder %v374_v5, %v5300_v9  ;;  %vm628_vm6 = vcmp.eq.s32.totalorder %v376_v7, %v5276_v58 }
 0x162   :  { %4044 = vmatprep.mubr.msk.bf16.mxu0 %vm4043_vm0, %v5120_v61  ;;  %4172 = vmatprep.mubr.msk.bf16.mxu1 %vm4171_vm1, %v5120_v61  ;;  %vm615_vm0 = vcmp.eq.s32.totalorder %v373_v4, %v5303_v11  ;;  %vm619_vm1 = vcmp.eq.s32.totalorder %v374_v5, %v5303_v11  ;;  %vm4049_vm4 = vmpackc.low %vm617_vm15, %vm613_vm14  ;;  %vm630_vm14 = vcmp.eq.s32.totalorder %v377_v8, %v5274_v57 }
 0x163   :  { %vm4177_vm7 = vmpackc.low %vm619_vm1, %vm615_vm0  ;;  %vm634_vm15 = vcmp.eq.s32.totalorder %v378_v10, %v5274_v57  ;;  %vm632_vm1 = vcmp.eq.s32.totalorder %v377_v8, %v5276_v58 }
 0x164   :  { %vm4179_vm9 = vmpackc.low %vm628_vm6, %vm624_vm5  ;;  %vm629_vm6 = vcmp.eq.s32.totalorder %v377_v8, %v5300_v9 }
 0x169   :  { %4046 = vmatmul.mubr.msk.bf16.gmra.mrb[100].mxu0 %vm4045_vm8, %v5120_v61  ;;  %4174 = vmatmul.mubr.msk.bf16.gmra.mrb[100].mxu1 %vm4173_vm11, %v5120_v61  ;;  %vm4051_vm8 = vmpackc.low %vm626_vm3, %vm622_vm2  ;;  %vm625_vm11 = vcmp.eq.s32.totalorder %v376_v7, %v5300_v9  ;;  %vm636_vm2 = vcmp.eq.s32.totalorder %v378_v10, %v5276_v58 }
 0x16a   :  { %4048 = vmatprep.mubr.msk.bf16.mxu0 %vm4047_vm12, %v5120_v61  ;;  %4176 = vmatprep.mubr.msk.bf16.mxu1 %vm4175_vm13, %v5120_v61  ;;  %vm623_vm12 = vcmp.eq.s32.totalorder %v375_v6, %v5303_v11  ;;  %vm627_vm13 = vcmp.eq.s32.totalorder %v376_v7, %v5303_v11  ;;  %vm5698_vm0 = vmpackc.low %vm625_vm11, %vm621_vm10  ;;  %vm638_vm10 = vcmp.eq.s32.totalorder %v379_v26, %v5274_v57 }
 0x16b   :  { %vm4181_vm3 = vmpackc.low %vm627_vm13, %vm623_vm12  ;;  %vm642_vm11 = vcmp.eq.s32.totalorder %v380_v27, %v5274_v57  ;;  %vm640_vm13 = vcmp.eq.s32.totalorder %v379_v26, %v5276_v58 }
 0x16c   :  { %vm4183_vm5 = vmpackc.low %vm636_vm2, %vm632_vm1  ;;  %vm637_vm2 = vcmp.eq.s32.totalorder %v379_v26, %v5300_v9 }
 0x171   :  { %4050 = vmatmul.mubr.msk.bf16.gmra.mrb[104].mxu0 %vm4049_vm4, %v5120_v61  ;;  %4178 = vmatmul.mubr.msk.bf16.gmra.mrb[104].mxu1 %vm4177_vm7, %v5120_v61  ;;  %vm4055_vm4 = vmpackc.low %vm634_vm15, %vm630_vm14  ;;  %vm633_vm7 = vcmp.eq.s32.totalorder %v378_v10, %v5300_v9  ;;  %vm644_vm14 = vcmp.eq.s32.totalorder %v380_v27, %v5276_v58 }
 0x172   :  { %4052 = vmatprep.mubr.msk.bf16.mxu0 %vm4051_vm8, %v5120_v61  ;;  %4180 = vmatprep.mubr.msk.bf16.mxu1 %vm4179_vm9, %v5120_v61  ;;  %vm631_vm8 = vcmp.eq.s32.totalorder %v377_v8, %v5303_v11  ;;  %vm635_vm9 = vcmp.eq.s32.totalorder %v378_v10, %v5303_v11  ;;  %vm5720_vm12 = vmpackc.low %vm633_vm7, %vm629_vm6  ;;  %vm646_vm6 = vcmp.eq.s32.totalorder %v381_v43, %v5274_v57 }
 0x173   :  { %vm4185_vm15 = vmpackc.low %vm635_vm9, %vm631_vm8  ;;  %vm650_vm7 = vcmp.eq.s32.totalorder %v382_v44, %v5274_v57  ;;  %vm648_vm9 = vcmp.eq.s32.totalorder %v381_v43, %v5276_v58 }
 0x174   :  { %v1655_v12 = vpop.f32.mrb[0].mxu0  ;;  %v1944_v14 = vpop.f32.mrb[0].mxu1  ;;  %vm4187_vm1 = vmpackc.low %vm644_vm14, %vm640_vm13  ;;  %vm645_vm14 = vcmp.eq.s32.totalorder %v381_v43, %v5300_v9 }
 0x175   :  { %v1657_v15 = vpop.f32.mrb[1].mxu0  ;;  %v1945_v17 = vadd.f32 %v1944_v14, %v1655_v12  ;;  %v1946_v18 = vpop.f32.mrb[1].mxu1  ;;  %v1308_v12 = vld [vmem:[#allocation2 + $0x38] sm:$0xff] }
 0x176   :  { %v1658_v19 = vpop.f32.mrb[2].mxu0  ;;  %v1947_v21 = vpop.f32.mrb[2].mxu1  ;;  %v1309_v18 = vld [vmem:[#allocation2 + $0x40] sm:$0xff] }
 0x177   :  { %v1660_v22 = vpop.f32.mrb[3].mxu0  ;;  %v2199_v23 = vadd.f32 %v1945_v17, %v1301_v13  ;;  %v1948_v24 = vadd.f32 %v1947_v21, %v1658_v19  ;;  %v1949_v25 = vpop.f32.mrb[3].mxu1 }
 0x179   :  { %4054 = vmatmul.mubr.msk.bf16.gmra.mrb[108].mxu0 %vm5698_vm0, %v5120_v61  ;;  %2263 = vst [vmem:[#allocation2] sm:$0xff] %v2199_v23  ;;  %v2200_v28 = vadd.f32 %v1948_v24, %v1302_v20  ;;  %4182 = vmatmul.mubr.msk.bf16.gmra.mrb[108].mxu1 %vm4181_vm3, %v5120_v61  ;;  %vm4059_vm0 = vmpackc.low %vm642_vm11, %vm638_vm10  ;;  %vm641_vm3 = vcmp.eq.s32.totalorder %v380_v27, %v5300_v9  ;;  %v1310_v24 = vld [vmem:[#allocation2 + $0x48] sm:$0xff] }
 0x17a   :  { %4056 = vmatprep.mubr.msk.bf16.mxu0 %vm4055_vm4, %v5120_v61  ;;  %4184 = vmatprep.mubr.msk.bf16.mxu1 %vm4183_vm5, %v5120_v61  ;;  %vm639_vm4 = vcmp.eq.s32.totalorder %v379_v26, %v5303_v11  ;;  %vm643_vm5 = vcmp.eq.s32.totalorder %v380_v27, %v5303_v11  ;;  %vm5744_vm8 = vmpackc.low %vm641_vm3, %vm637_vm2  ;;  %vm652_vm10 = vcmp.eq.s32.totalorder %v382_v44, %v5276_v58 }
 0x17b   :  { %2264 = vst [vmem:[#allocation2 + $0x8] sm:$0xff] %v2200_v28  ;;  %vm4189_vm11 = vmpackc.low %vm643_vm5, %vm639_vm4  ;;  %vm654_vm2 = vcmp.eq.s32.totalorder %v383_v0, %v5274_v57  ;;  %vm658_vm3 = vcmp.eq.s32.totalorder %v384_v1, %v5274_v57  ;;  %vm656_vm5 = vcmp.eq.s32.totalorder %v383_v0, %v5276_v58 }
 0x17c   :  { %v1663_v29 = vpop.f32.mrb[4].mxu0  ;;  %v1952_v31 = vpop.f32.mrb[4].mxu1  ;;  %vm4191_vm13 = vmpackc.low %vm652_vm10, %vm648_vm9  ;;  %vm653_vm10 = vcmp.eq.s32.totalorder %v383_v0, %v5300_v9 }
 0x17d   :  { %v1665_v32 = vpop.f32.mrb[5].mxu0  ;;  %v1953_v34 = vadd.f32 %v1952_v31, %v1663_v29  ;;  %v1954_v35 = vpop.f32.mrb[5].mxu1 }
 0x17e   :  { %v1666_v36 = vpop.f32.mrb[6].mxu0  ;;  %v1955_v38 = vpop.f32.mrb[6].mxu1 }
 0x17f   :  { %v1668_v39 = vpop.f32.mrb[7].mxu0  ;;  %v2201_v40 = vadd.f32 %v1953_v34, %v1303_v30  ;;  %v1956_v41 = vadd.f32 %v1955_v38, %v1666_v36  ;;  %v1957_v42 = vpop.f32.mrb[7].mxu1  ;;  %v1311_v30 = vld [vmem:[#allocation2 + $0x50] sm:$0xff]  ;;  %v1312_v36 = vld [vmem:[#allocation2 + $0x58] sm:$0xff] }
 0x181   :  { %4058 = vmatmul.mubr.msk.bf16.gmra.mrb[112].mxu0 %vm5720_vm12, %v5120_v61  ;;  %2265 = vst [vmem:[#allocation2 + $0x10] sm:$0xff] %v2201_v40  ;;  %v2202_v45 = vadd.f32 %v1956_v41, %v1304_v37  ;;  %4186 = vmatmul.mubr.msk.bf16.gmra.mrb[112].mxu1 %vm4185_vm15, %v5120_v61  ;;  %vm4063_vm12 = vmpackc.low %vm650_vm7, %vm646_vm6  ;;  %vm649_vm15 = vcmp.eq.s32.totalorder %v382_v44, %v5300_v9 }
 0x182   :  { %4060 = vmatprep.mubr.msk.bf16.mxu0 %vm4059_vm0, %v5120_v61  ;;  %4188 = vmatprep.mubr.msk.bf16.mxu1 %vm4187_vm1, %v5120_v61  ;;  %vm647_vm0 = vcmp.eq.s32.totalorder %v381_v43, %v5303_v11  ;;  %vm651_vm1 = vcmp.eq.s32.totalorder %v382_v44, %v5303_v11  ;;  %vm5768_vm4 = vmpackc.low %vm649_vm15, %vm645_vm14  ;;  %vm660_vm6 = vcmp.eq.s32.totalorder %v384_v1, %v5276_v58  ;;  %v1313_v44 = vld [vmem:[#allocation2 + $0x60] sm:$0xff] }
 0x183   :  { %2266 = vst [vmem:[#allocation2 + $0x18] sm:$0xff] %v2202_v45  ;;  %vm4193_vm7 = vmpackc.low %vm651_vm1, %vm647_vm0 }
 0x184   :  { %v1671_v46 = vpop.f32.mrb[8].mxu0  ;;  %v1960_v49 = vpop.f32.mrb[8].mxu1  ;;  %vm4195_vm9 = vmpackc.low %vm660_vm6, %vm656_vm5 }
 0x185   :  { %v1673_v50 = vpop.f32.mrb[9].mxu0  ;;  %v1961_v52 = vadd.f32 %v1960_v49, %v1671_v46  ;;  %v1962_v53 = vpop.f32.mrb[9].mxu1 }
 0x186   :  { %v1674_v54 = vpop.f32.mrb[10].mxu0  ;;  %v1963_v56 = vpop.f32.mrb[10].mxu1  ;;  %v1314_v50 = vld [vmem:[#allocation2 + $0x68] sm:$0xff] }
 0x187   :  { %v1676_v59 = vpop.f32.mrb[11].mxu0  ;;  %v2203_v60 = vadd.f32 %v1961_v52, %v1305_v47  ;;  %v1964_v62 = vadd.f32 %v1963_v56, %v1674_v54  ;;  %v1965_v63 = vpop.f32.mrb[11].mxu1 }
 0x189   :  { %4062 = vmatmul.mubr.msk.bf16.gmra.mrb[116].mxu0 %vm5744_vm8, %v5120_v61  ;;  %2267 = vst [vmem:[#allocation2 + $0x20] sm:$0xff] %v2203_v60  ;;  %v2204_v2 = vadd.f32 %v1964_v62, %v1306_v55  ;;  %4190 = vmatmul.mubr.msk.bf16.gmra.mrb[116].mxu1 %vm4189_vm11, %v5120_v61  ;;  %vm4067_vm8 = vmpackc.low %vm658_vm3, %vm654_vm2  ;;  %vm657_vm11 = vcmp.eq.s32.totalorder %v384_v1, %v5300_v9  ;;  %v1315_v60 = vld [vmem:[#allocation2 + $0x70] sm:$0xff] }
 0x18a   :  { %4064 = vmatprep.mubr.msk.bf16.mxu0 %vm4063_vm12, %v5120_v61  ;;  %4192 = vmatprep.mubr.msk.bf16.mxu1 %vm4191_vm13, %v5120_v61  ;;  %vm655_vm12 = vcmp.eq.s32.totalorder %v383_v0, %v5303_v11  ;;  %vm659_vm13 = vcmp.eq.s32.totalorder %v384_v1, %v5303_v11  ;;  %vm4069_vm14 = vmpackc.low %vm657_vm11, %vm653_vm10 }
 0x18b   :  { %2268 = vst [vmem:[#allocation2 + $0x28] sm:$0xff] %v2204_v2  ;;  %vm4197_vm15 = vmpackc.low %vm659_vm13, %vm655_vm12 }
 0x18c   :  { %v1679_v48 = vpop.f32.mrb[12].mxu0  ;;  %v1968_v4 = vpop.f32.mrb[12].mxu1 }
 0x18d   :  { %v1681_v5 = vpop.f32.mrb[13].mxu0  ;;  %v1969_v7 = vadd.f32 %v1968_v4, %v1679_v48  ;;  %v1970_v8 = vpop.f32.mrb[13].mxu1  ;;  %v1316_v48 = vld [vmem:[#allocation2 + $0x78] sm:$0xff] }
 0x18e   :  { %v1682_v10 = vpop.f32.mrb[14].mxu0  ;;  %v1971_v13 = vpop.f32.mrb[14].mxu1 }
 0x18f   :  { %v1684_v14 = vpop.f32.mrb[15].mxu0  ;;  %v2205_v15 = vadd.f32 %v1969_v7, %v1307_v3  ;;  %v1972_v16 = vadd.f32 %v1971_v13, %v1682_v10  ;;  %v1973_v17 = vpop.f32.mrb[15].mxu1 }
 0x191   :  { %4066 = vmatmul.mubr.msk.bf16.gmra.mrb[120].mxu0 %vm5768_vm4, %v5120_v61  ;;  %2269 = vst [vmem:[#allocation2 + $0x30] sm:$0xff] %v2205_v15  ;;  %v2206_v58 = vadd.f32 %v1972_v16, %v1308_v12  ;;  %4194 = vmatmul.mubr.msk.bf16.gmra.mrb[120].mxu1 %vm4193_vm7, %v5120_v61  ;;  %v1317_v12 = vld [vmem:[#allocation2 + $0x80] sm:$0xff] }
 0x192   :  { %4068 = vmatprep.mubr.msk.bf16.mxu0 %vm4067_vm8, %v5120_v61  ;;  %4196 = vmatprep.mubr.msk.bf16.mxu1 %vm4195_vm9, %v5120_v61 }
 0x193   :  { %2270 = vst [vmem:[#allocation2 + $0x38] sm:$0xff] %v2206_v58  ;;  %v1318_v58 = vld [vmem:[#allocation2 + $0x88] sm:$0xff] }
 0x194   :  { %v1687_v57 = vpop.f32.mrb[16].mxu0  ;;  %v1976_v19 = vpop.f32.mrb[16].mxu1 }
 0x195   :  { %v1689_v20 = vpop.f32.mrb[17].mxu0  ;;  %v1977_v21 = vadd.f32 %v1976_v19, %v1687_v57  ;;  %v1978_v22 = vpop.f32.mrb[17].mxu1 }
 0x196   :  { %v1690_v23 = vpop.f32.mrb[18].mxu0  ;;  %v1979_v25 = vpop.f32.mrb[18].mxu1 }
 0x197   :  { %v1692_v26 = vpop.f32.mrb[19].mxu0  ;;  %v2207_v27 = vadd.f32 %v1977_v21, %v1309_v18  ;;  %v1980_v28 = vadd.f32 %v1979_v25, %v1690_v23  ;;  %v1981_v9 = vpop.f32.mrb[19].mxu1 }
 0x199   :  { %4070 = vmatmul.mubr.msk.bf16.gmra.mrb[124].mxu0 %vm4069_vm14, %v5120_v61  ;;  %2271 = vst [vmem:[#allocation2 + $0x40] sm:$0xff] %v2207_v27  ;;  %v2208_v29 = vadd.f32 %v1980_v28, %v1310_v24  ;;  %4198 = vmatmul.mubr.msk.bf16.gmra.mrb[124].mxu1 %vm4197_vm15, %v5120_v61  ;;  %v1319_v24 = vld [vmem:[#allocation2 + $0x90] sm:$0xff] }
 0x19b   :  { %2272 = vst [vmem:[#allocation2 + $0x48] sm:$0xff] %v2208_v29  ;;  %v1320_v29 = vld [vmem:[#allocation2 + $0x98] sm:$0xff] }
 0x19c   :  { %v1695_v11 = vpop.f32.mrb[20].mxu0  ;;  %v1984_v31 = vpop.f32.mrb[20].mxu1 }
 0x19d   :  { %v1697_v32 = vpop.f32.mrb[21].mxu0  ;;  %v1985_v33 = vadd.f32 %v1984_v31, %v1695_v11  ;;  %v1986_v34 = vpop.f32.mrb[21].mxu1 }
 0x19e   :  { %v1698_v35 = vpop.f32.mrb[22].mxu0  ;;  %v1987_v37 = vpop.f32.mrb[22].mxu1 }
 0x19f   :  { %v1700_v38 = vpop.f32.mrb[23].mxu0  ;;  %v2209_v39 = vadd.f32 %v1985_v33, %v1311_v30  ;;  %v1988_v40 = vadd.f32 %v1987_v37, %v1698_v35  ;;  %v1989_v41 = vpop.f32.mrb[23].mxu1 }
 0x1a1   :  { %2273 = vst [vmem:[#allocation2 + $0x50] sm:$0xff] %v2209_v39  ;;  %v2210_v42 = vadd.f32 %v1988_v40, %v1312_v36  ;;  %v1321_v36 = vld [vmem:[#allocation2 + $0xa0] sm:$0xff] }
 0x1a3   :  { %2274 = vst [vmem:[#allocation2 + $0x58] sm:$0xff] %v2210_v42  ;;  %v1322_v42 = vld [vmem:[#allocation2 + $0xa8] sm:$0xff] }
 0x1a4   :  { %v1703_v43 = vpop.f32.mrb[24].mxu0  ;;  %v1992_v61 = vpop.f32.mrb[24].mxu1 }
 0x1a5   :  { %v1705_v45 = vpop.f32.mrb[25].mxu0  ;;  %v1993_v46 = vadd.f32 %v1992_v61, %v1703_v43  ;;  %v1994_v47 = vpop.f32.mrb[25].mxu1 }
 0x1a6   :  { %v1706_v49 = vpop.f32.mrb[26].mxu0  ;;  %v1995_v51 = vpop.f32.mrb[26].mxu1 }
 0x1a7   :  { %v1708_v52 = vpop.f32.mrb[27].mxu0  ;;  %v2211_v53 = vadd.f32 %v1993_v46, %v1313_v44  ;;  %v1996_v54 = vadd.f32 %v1995_v51, %v1706_v49  ;;  %v1997_v55 = vpop.f32.mrb[27].mxu1 }
 0x1a9   :  { %2275 = vst [vmem:[#allocation2 + $0x60] sm:$0xff] %v2211_v53  ;;  %v2212_v56 = vadd.f32 %v1996_v54, %v1314_v50  ;;  %v1323_v50 = vld [vmem:[#allocation2 + $0xb0] sm:$0xff] }
 0x1ab   :  { %2276 = vst [vmem:[#allocation2 + $0x68] sm:$0xff] %v2212_v56  ;;  %v1324_v56 = vld [vmem:[#allocation2 + $0xb8] sm:$0xff] }
 0x1ac   :  { %v1711_v59 = vpop.f32.mrb[28].mxu0  ;;  %v2000_v62 = vpop.f32.mrb[28].mxu1 }
 0x1ad   :  { %v1713_v63 = vpop.f32.mrb[29].mxu0  ;;  %v2001_v0 = vadd.f32 %v2000_v62, %v1711_v59  ;;  %v2002_v1 = vpop.f32.mrb[29].mxu1 }
 0x1ae   :  { %v1714_v2 = vpop.f32.mrb[30].mxu0  ;;  %v2003_v3 = vpop.f32.mrb[30].mxu1 }
 0x1af   :  { %v1716_v4 = vpop.f32.mrb[31].mxu0  ;;  %v2213_v5 = vadd.f32 %v2001_v0, %v1315_v60  ;;  %v2004_v6 = vadd.f32 %v2003_v3, %v1714_v2  ;;  %v2005_v7 = vpop.f32.mrb[31].mxu1 }
 0x1b1   :  { %2277 = vst [vmem:[#allocation2 + $0x70] sm:$0xff] %v2213_v5  ;;  %v2214_v8 = vadd.f32 %v2004_v6, %v1316_v48  ;;  %v1325_v48 = vld [vmem:[#allocation2 + $0xc0] sm:$0xff] }
 0x1b3   :  { %2278 = vst [vmem:[#allocation2 + $0x78] sm:$0xff] %v2214_v8  ;;  %v1326_v8 = vld [vmem:[#allocation2 + $0xc8] sm:$0xff] }
 0x1b4   :  { %v1719_v10 = vpop.f32.mrb[32].mxu0  ;;  %v2008_v13 = vpop.f32.mrb[32].mxu1 }
 0x1b5   :  { %v1721_v14 = vpop.f32.mrb[33].mxu0  ;;  %v2009_v15 = vadd.f32 %v2008_v13, %v1719_v10  ;;  %v2010_v16 = vpop.f32.mrb[33].mxu1 }
 0x1b6   :  { %v1722_v17 = vpop.f32.mrb[34].mxu0  ;;  %v2011_v57 = vpop.f32.mrb[34].mxu1 }
 0x1b7   :  { %v1724_v18 = vpop.f32.mrb[35].mxu0  ;;  %v2215_v19 = vadd.f32 %v2009_v15, %v1317_v12  ;;  %v2012_v20 = vadd.f32 %v2011_v57, %v1722_v17  ;;  %v2013_v21 = vpop.f32.mrb[35].mxu1 }
 0x1b9   :  { %2279 = vst [vmem:[#allocation2 + $0x80] sm:$0xff] %v2215_v19  ;;  %v2216_v22 = vadd.f32 %v2012_v20, %v1318_v58  ;;  %v1327_v58 = vld [vmem:[#allocation2 + $0xd0] sm:$0xff] }
 0x1bb   :  { %2280 = vst [vmem:[#allocation2 + $0x88] sm:$0xff] %v2216_v22  ;;  %v1328_v22 = vld [vmem:[#allocation2 + $0xd8] sm:$0xff] }
 0x1bc   :  { %v1727_v23 = vpop.f32.mrb[36].mxu0  ;;  %v2016_v25 = vpop.f32.mrb[36].mxu1 }
 0x1bd   :  { %v1729_v26 = vpop.f32.mrb[37].mxu0  ;;  %v2017_v27 = vadd.f32 %v2016_v25, %v1727_v23  ;;  %v2018_v28 = vpop.f32.mrb[37].mxu1 }
 0x1be   :  { %v1730_v9 = vpop.f32.mrb[38].mxu0  ;;  %v2019_v11 = vpop.f32.mrb[38].mxu1 }
 0x1bf   :  { %v1732_v30 = vpop.f32.mrb[39].mxu0  ;;  %v2217_v31 = vadd.f32 %v2017_v27, %v1319_v24  ;;  %v2020_v32 = vadd.f32 %v2019_v11, %v1730_v9  ;;  %v2021_v33 = vpop.f32.mrb[39].mxu1 }
 0x1c1   :  { %2281 = vst [vmem:[#allocation2 + $0x90] sm:$0xff] %v2217_v31  ;;  %v2218_v34 = vadd.f32 %v2020_v32, %v1320_v29  ;;  %v1329_v29 = vld [vmem:[#allocation2 + $0xe0] sm:$0xff] }
 0x1c3   :  { %2282 = vst [vmem:[#allocation2 + $0x98] sm:$0xff] %v2218_v34  ;;  %v1330_v34 = vld [vmem:[#allocation2 + $0xe8] sm:$0xff] }
 0x1c4   :  { %v1735_v35 = vpop.f32.mrb[40].mxu0  ;;  %v2024_v37 = vpop.f32.mrb[40].mxu1 }
 0x1c5   :  { %v1737_v38 = vpop.f32.mrb[41].mxu0  ;;  %v2025_v39 = vadd.f32 %v2024_v37, %v1735_v35  ;;  %v2026_v40 = vpop.f32.mrb[41].mxu1 }
 0x1c6   :  { %v1738_v41 = vpop.f32.mrb[42].mxu0  ;;  %v2027_v43 = vpop.f32.mrb[42].mxu1 }
 0x1c7   :  { %v1740_v44 = vpop.f32.mrb[43].mxu0  ;;  %v2219_v61 = vadd.f32 %v2025_v39, %v1321_v36  ;;  %v2028_v45 = vadd.f32 %v2027_v43, %v1738_v41  ;;  %v2029_v46 = vpop.f32.mrb[43].mxu1 }
 0x1c9   :  { %2283 = vst [vmem:[#allocation2 + $0xa0] sm:$0xff] %v2219_v61  ;;  %v2220_v47 = vadd.f32 %v2028_v45, %v1322_v42  ;;  %v1331_v42 = vld [vmem:[#allocation2 + $0xf0] sm:$0xff] }
 0x1cb   :  { %2284 = vst [vmem:[#allocation2 + $0xa8] sm:$0xff] %v2220_v47  ;;  %v1332_v47 = vld [vmem:[#allocation2 + $0xf8] sm:$0xff] }
 0x1cc   :  { %v1743_v49 = vpop.f32.mrb[44].mxu0  ;;  %v2032_v51 = vpop.f32.mrb[44].mxu1 }
 0x1cd   :  { %v1745_v52 = vpop.f32.mrb[45].mxu0  ;;  %v2033_v53 = vadd.f32 %v2032_v51, %v1743_v49  ;;  %v2034_v54 = vpop.f32.mrb[45].mxu1 }
 0x1ce   :  { %v1746_v55 = vpop.f32.mrb[46].mxu0  ;;  %v2035_v59 = vpop.f32.mrb[46].mxu1 }
 0x1cf   :  { %v1748_v60 = vpop.f32.mrb[47].mxu0  ;;  %v2221_v62 = vadd.f32 %v2033_v53, %v1323_v50  ;;  %v2036_v63 = vadd.f32 %v2035_v59, %v1746_v55  ;;  %v2037_v0 = vpop.f32.mrb[47].mxu1 }
 0x1d1   :  { %2285 = vst [vmem:[#allocation2 + $0xb0] sm:$0xff] %v2221_v62  ;;  %v2222_v1 = vadd.f32 %v2036_v63, %v1324_v56  ;;  %v1333_v56 = vld [vmem:[#allocation2 + $0x100] sm:$0xff] }
 0x1d3   :  { %2286 = vst [vmem:[#allocation2 + $0xb8] sm:$0xff] %v2222_v1  ;;  %v1334_v1 = vld [vmem:[#allocation2 + $0x108] sm:$0xff] }
 0x1d4   :  { %v1751_v2 = vpop.f32.mrb[48].mxu0  ;;  %v2040_v3 = vpop.f32.mrb[48].mxu1 }
 0x1d5   :  { %v1753_v4 = vpop.f32.mrb[49].mxu0  ;;  %v2041_v5 = vadd.f32 %v2040_v3, %v1751_v2  ;;  %v2042_v6 = vpop.f32.mrb[49].mxu1 }
 0x1d6   :  { %v1754_v7 = vpop.f32.mrb[50].mxu0  ;;  %v2043_v10 = vpop.f32.mrb[50].mxu1 }
 0x1d7   :  { %v1756_v12 = vpop.f32.mrb[51].mxu0  ;;  %v2223_v13 = vadd.f32 %v2041_v5, %v1325_v48  ;;  %v2044_v14 = vadd.f32 %v2043_v10, %v1754_v7  ;;  %v2045_v15 = vpop.f32.mrb[51].mxu1 }
 0x1d9   :  { %2287 = vst [vmem:[#allocation2 + $0xc0] sm:$0xff] %v2223_v13  ;;  %v2224_v16 = vadd.f32 %v2044_v14, %v1326_v8  ;;  %v1335_v8 = vld [vmem:[#allocation2 + $0x110] sm:$0xff] }
 0x1db   :  { %2288 = vst [vmem:[#allocation2 + $0xc8] sm:$0xff] %v2224_v16  ;;  %v1336_v16 = vld [vmem:[#allocation2 + $0x118] sm:$0xff] }
 0x1dc   :  { %v1759_v17 = vpop.f32.mrb[52].mxu0  ;;  %v2048_v57 = vpop.f32.mrb[52].mxu1 }
 0x1dd   :  { %v1761_v18 = vpop.f32.mrb[53].mxu0  ;;  %v2049_v19 = vadd.f32 %v2048_v57, %v1759_v17  ;;  %v2050_v20 = vpop.f32.mrb[53].mxu1 }
 0x1de   :  { %v1762_v21 = vpop.f32.mrb[54].mxu0  ;;  %v2051_v23 = vpop.f32.mrb[54].mxu1 }
 0x1df   :  { %v1764_v24 = vpop.f32.mrb[55].mxu0  ;;  %v2225_v25 = vadd.f32 %v2049_v19, %v1327_v58  ;;  %v2052_v26 = vadd.f32 %v2051_v23, %v1762_v21  ;;  %v2053_v27 = vpop.f32.mrb[55].mxu1 }
 0x1e1   :  { %2289 = vst [vmem:[#allocation2 + $0xd0] sm:$0xff] %v2225_v25  ;;  %v2226_v28 = vadd.f32 %v2052_v26, %v1328_v22  ;;  %v1337_v22 = vld [vmem:[#allocation2 + $0x120] sm:$0xff] }
 0x1e3   :  { %2290 = vst [vmem:[#allocation2 + $0xd8] sm:$0xff] %v2226_v28  ;;  %v1338_v28 = vld [vmem:[#allocation2 + $0x128] sm:$0xff] }
 0x1e4   :  { %v1767_v9 = vpop.f32.mrb[56].mxu0  ;;  %v2056_v11 = vpop.f32.mrb[56].mxu1 }
 0x1e5   :  { %v1769_v30 = vpop.f32.mrb[57].mxu0  ;;  %v2057_v31 = vadd.f32 %v2056_v11, %v1767_v9  ;;  %v2058_v32 = vpop.f32.mrb[57].mxu1 }
 0x1e6   :  { %v1770_v33 = vpop.f32.mrb[58].mxu0  ;;  %v2059_v35 = vpop.f32.mrb[58].mxu1 }
 0x1e7   :  { %v1772_v36 = vpop.f32.mrb[59].mxu0  ;;  %v2227_v37 = vadd.f32 %v2057_v31, %v1329_v29  ;;  %v2060_v38 = vadd.f32 %v2059_v35, %v1770_v33  ;;  %v2061_v39 = vpop.f32.mrb[59].mxu1 }
 0x1e9   :  { %2291 = vst [vmem:[#allocation2 + $0xe0] sm:$0xff] %v2227_v37  ;;  %v2228_v40 = vadd.f32 %v2060_v38, %v1330_v34  ;;  %v1339_v34 = vld [vmem:[#allocation2 + $0x130] sm:$0xff] }
 0x1eb   :  { %2292 = vst [vmem:[#allocation2 + $0xe8] sm:$0xff] %v2228_v40  ;;  %v1340_v40 = vld [vmem:[#allocation2 + $0x138] sm:$0xff] }
 0x1ec   :  { %v1775_v41 = vpop.f32.mrb[60].mxu0  ;;  %v2064_v43 = vpop.f32.mrb[60].mxu1 }
 0x1ed   :  { %v1777_v44 = vpop.f32.mrb[61].mxu0  ;;  %v2065_v61 = vadd.f32 %v2064_v43, %v1775_v41  ;;  %v2066_v45 = vpop.f32.mrb[61].mxu1 }
 0x1ee   :  { %v1778_v46 = vpop.f32.mrb[62].mxu0  ;;  %v2067_v49 = vpop.f32.mrb[62].mxu1 }
 0x1ef   :  { %v1780_v50 = vpop.f32.mrb[63].mxu0  ;;  %v2229_v51 = vadd.f32 %v2065_v61, %v1331_v42  ;;  %v2068_v52 = vadd.f32 %v2067_v49, %v1778_v46  ;;  %v2069_v53 = vpop.f32.mrb[63].mxu1 }
 0x1f1   :  { %2293 = vst [vmem:[#allocation2 + $0xf0] sm:$0xff] %v2229_v51  ;;  %v2230_v54 = vadd.f32 %v2068_v52, %v1332_v47  ;;  %v1341_v47 = vld [vmem:[#allocation2 + $0x140] sm:$0xff] }
 0x1f3   :  { %2294 = vst [vmem:[#allocation2 + $0xf8] sm:$0xff] %v2230_v54  ;;  %v1342_v54 = vld [vmem:[#allocation2 + $0x148] sm:$0xff] }
 0x1f4   :  { %v1783_v55 = vpop.f32.mrb[64].mxu0  ;;  %v2072_v59 = vpop.f32.mrb[64].mxu1 }
 0x1f5   :  { %v1785_v60 = vpop.f32.mrb[65].mxu0  ;;  %v2073_v62 = vadd.f32 %v2072_v59, %v1783_v55  ;;  %v2074_v63 = vpop.f32.mrb[65].mxu1 }
 0x1f6   :  { %v1786_v0 = vpop.f32.mrb[66].mxu0  ;;  %v2075_v2 = vpop.f32.mrb[66].mxu1 }
 0x1f7   :  { %v1788_v48 = vpop.f32.mrb[67].mxu0  ;;  %v2231_v3 = vadd.f32 %v2073_v62, %v1333_v56  ;;  %v2076_v4 = vadd.f32 %v2075_v2, %v1786_v0  ;;  %v2077_v5 = vpop.f32.mrb[67].mxu1 }
 0x1f9   :  { %2295 = vst [vmem:[#allocation2 + $0x100] sm:$0xff] %v2231_v3  ;;  %v2232_v6 = vadd.f32 %v2076_v4, %v1334_v1  ;;  %v1343_v1 = vld [vmem:[#allocation2 + $0x150] sm:$0xff] }
 0x1fb   :  { %2296 = vst [vmem:[#allocation2 + $0x108] sm:$0xff] %v2232_v6  ;;  %v1344_v6 = vld [vmem:[#allocation2 + $0x158] sm:$0xff] }
 0x1fc   :  { %v1791_v7 = vpop.f32.mrb[68].mxu0  ;;  %v2080_v10 = vpop.f32.mrb[68].mxu1 }
 0x1fd   :  { %v1793_v12 = vpop.f32.mrb[69].mxu0  ;;  %v2081_v13 = vadd.f32 %v2080_v10, %v1791_v7  ;;  %v2082_v14 = vpop.f32.mrb[69].mxu1 }
 0x1fe   :  { %v1794_v15 = vpop.f32.mrb[70].mxu0  ;;  %v2083_v17 = vpop.f32.mrb[70].mxu1 }
 0x1ff   :  { %v1796_v58 = vpop.f32.mrb[71].mxu0  ;;  %v2233_v57 = vadd.f32 %v2081_v13, %v1335_v8  ;;  %v2084_v18 = vadd.f32 %v2083_v17, %v1794_v15  ;;  %v2085_v19 = vpop.f32.mrb[71].mxu1 }
 0x201   :  { %2297 = vst [vmem:[#allocation2 + $0x110] sm:$0xff] %v2233_v57  ;;  %v2234_v20 = vadd.f32 %v2084_v18, %v1336_v16  ;;  %v1345_v16 = vld [vmem:[#allocation2 + $0x160] sm:$0xff] }
 0x203   :  { %2298 = vst [vmem:[#allocation2 + $0x118] sm:$0xff] %v2234_v20  ;;  %v1346_v20 = vld [vmem:[#allocation2 + $0x168] sm:$0xff] }
 0x204   :  { %v1799_v21 = vpop.f32.mrb[72].mxu0  ;;  %v2088_v23 = vpop.f32.mrb[72].mxu1 }
 0x205   :  { %v1801_v24 = vpop.f32.mrb[73].mxu0  ;;  %v2089_v25 = vadd.f32 %v2088_v23, %v1799_v21  ;;  %v2090_v26 = vpop.f32.mrb[73].mxu1 }
 0x206   :  { %v1802_v27 = vpop.f32.mrb[74].mxu0  ;;  %v2091_v9 = vpop.f32.mrb[74].mxu1 }
 0x207   :  { %v1804_v29 = vpop.f32.mrb[75].mxu0  ;;  %v2235_v11 = vadd.f32 %v2089_v25, %v1337_v22  ;;  %v2092_v30 = vadd.f32 %v2091_v9, %v1802_v27  ;;  %v2093_v31 = vpop.f32.mrb[75].mxu1 }
 0x209   :  { %2299 = vst [vmem:[#allocation2 + $0x120] sm:$0xff] %v2235_v11  ;;  %v2236_v32 = vadd.f32 %v2092_v30, %v1338_v28  ;;  %v1347_v28 = vld [vmem:[#allocation2 + $0x170] sm:$0xff] }
 0x20b   :  { %2300 = vst [vmem:[#allocation2 + $0x128] sm:$0xff] %v2236_v32  ;;  %v1348_v32 = vld [vmem:[#allocation2 + $0x178] sm:$0xff] }
 0x20c   :  { %v1807_v33 = vpop.f32.mrb[76].mxu0  ;;  %v2096_v35 = vpop.f32.mrb[76].mxu1 }
 0x20d   :  { %v1809_v36 = vpop.f32.mrb[77].mxu0  ;;  %v2097_v37 = vadd.f32 %v2096_v35, %v1807_v33  ;;  %v2098_v38 = vpop.f32.mrb[77].mxu1 }
 0x20e   :  { %v1810_v39 = vpop.f32.mrb[78].mxu0  ;;  %v2099_v41 = vpop.f32.mrb[78].mxu1 }
 0x20f   :  { %v1812_v42 = vpop.f32.mrb[79].mxu0  ;;  %v2237_v43 = vadd.f32 %v2097_v37, %v1339_v34  ;;  %v2100_v44 = vadd.f32 %v2099_v41, %v1810_v39  ;;  %v2101_v61 = vpop.f32.mrb[79].mxu1 }
 0x211   :  { %2301 = vst [vmem:[#allocation2 + $0x130] sm:$0xff] %v2237_v43  ;;  %v2238_v45 = vadd.f32 %v2100_v44, %v1340_v40  ;;  %v1349_v40 = vld [vmem:[#allocation2 + $0x180] sm:$0xff] }
 0x213   :  { %2302 = vst [vmem:[#allocation2 + $0x138] sm:$0xff] %v2238_v45  ;;  %v1350_v45 = vld [vmem:[#allocation2 + $0x188] sm:$0xff] }
 0x214   :  { %v1815_v46 = vpop.f32.mrb[80].mxu0  ;;  %v2104_v49 = vpop.f32.mrb[80].mxu1 }
 0x215   :  { %v1817_v50 = vpop.f32.mrb[81].mxu0  ;;  %v2105_v51 = vadd.f32 %v2104_v49, %v1815_v46  ;;  %v2106_v52 = vpop.f32.mrb[81].mxu1 }
 0x216   :  { %v1818_v53 = vpop.f32.mrb[82].mxu0  ;;  %v2107_v55 = vpop.f32.mrb[82].mxu1 }
 0x217   :  { %v1820_v56 = vpop.f32.mrb[83].mxu0  ;;  %v2239_v59 = vadd.f32 %v2105_v51, %v1341_v47  ;;  %v2108_v60 = vadd.f32 %v2107_v55, %v1818_v53  ;;  %v2109_v62 = vpop.f32.mrb[83].mxu1 }
 0x219   :  { %2303 = vst [vmem:[#allocation2 + $0x140] sm:$0xff] %v2239_v59  ;;  %v2240_v63 = vadd.f32 %v2108_v60, %v1342_v54  ;;  %v1351_v54 = vld [vmem:[#allocation2 + $0x190] sm:$0xff] }
 0x21b   :  { %2304 = vst [vmem:[#allocation2 + $0x148] sm:$0xff] %v2240_v63  ;;  %v1352_v63 = vld [vmem:[#allocation2 + $0x198] sm:$0xff] }
 0x21c   :  { %v1823_v0 = vpop.f32.mrb[84].mxu0  ;;  %v2112_v2 = vpop.f32.mrb[84].mxu1 }
 0x21d   :  { %v1825_v48 = vpop.f32.mrb[85].mxu0  ;;  %v2113_v3 = vadd.f32 %v2112_v2, %v1823_v0  ;;  %v2114_v4 = vpop.f32.mrb[85].mxu1 }
 0x21e   :  { %v1826_v5 = vpop.f32.mrb[86].mxu0  ;;  %v2115_v7 = vpop.f32.mrb[86].mxu1 }
 0x21f   :  { %v1828_v8 = vpop.f32.mrb[87].mxu0  ;;  %v2241_v10 = vadd.f32 %v2113_v3, %v1343_v1  ;;  %v2116_v12 = vadd.f32 %v2115_v7, %v1826_v5  ;;  %v2117_v13 = vpop.f32.mrb[87].mxu1 }
 0x221   :  { %2305 = vst [vmem:[#allocation2 + $0x150] sm:$0xff] %v2241_v10  ;;  %v2242_v14 = vadd.f32 %v2116_v12, %v1344_v6  ;;  %v1353_v6 = vld [vmem:[#allocation2 + $0x1a0] sm:$0xff] }
 0x223   :  { %2306 = vst [vmem:[#allocation2 + $0x158] sm:$0xff] %v2242_v14  ;;  %v1354_v14 = vld [vmem:[#allocation2 + $0x1a8] sm:$0xff] }
 0x224   :  { %v1831_v15 = vpop.f32.mrb[88].mxu0  ;;  %v2120_v17 = vpop.f32.mrb[88].mxu1 }
 0x225   :  { %v1833_v58 = vpop.f32.mrb[89].mxu0  ;;  %v2121_v57 = vadd.f32 %v2120_v17, %v1831_v15  ;;  %v2122_v18 = vpop.f32.mrb[89].mxu1 }
 0x226   :  { %v1834_v19 = vpop.f32.mrb[90].mxu0  ;;  %v2123_v21 = vpop.f32.mrb[90].mxu1 }
 0x227   :  { %v1836_v22 = vpop.f32.mrb[91].mxu0  ;;  %v2243_v23 = vadd.f32 %v2121_v57, %v1345_v16  ;;  %v2124_v24 = vadd.f32 %v2123_v21, %v1834_v19  ;;  %v2125_v25 = vpop.f32.mrb[91].mxu1 }
 0x229   :  { %2307 = vst [vmem:[#allocation2 + $0x160] sm:$0xff] %v2243_v23  ;;  %v2244_v26 = vadd.f32 %v2124_v24, %v1346_v20  ;;  %v1355_v20 = vld [vmem:[#allocation2 + $0x1b0] sm:$0xff] }
 0x22b   :  { %2308 = vst [vmem:[#allocation2 + $0x168] sm:$0xff] %v2244_v26  ;;  %v1356_v26 = vld [vmem:[#allocation2 + $0x1b8] sm:$0xff] }
 0x22c   :  { %v1839_v27 = vpop.f32.mrb[92].mxu0  ;;  %v2128_v9 = vpop.f32.mrb[92].mxu1 }
 0x22d   :  { %v1841_v29 = vpop.f32.mrb[93].mxu0  ;;  %v2129_v11 = vadd.f32 %v2128_v9, %v1839_v27  ;;  %v2130_v30 = vpop.f32.mrb[93].mxu1 }
 0x22e   :  { %v1842_v31 = vpop.f32.mrb[94].mxu0  ;;  %v2131_v33 = vpop.f32.mrb[94].mxu1 }
 0x22f   :  { %v1844_v34 = vpop.f32.mrb[95].mxu0  ;;  %v2245_v35 = vadd.f32 %v2129_v11, %v1347_v28  ;;  %v2132_v36 = vadd.f32 %v2131_v33, %v1842_v31  ;;  %v2133_v37 = vpop.f32.mrb[95].mxu1 }
 0x231   :  { %2309 = vst [vmem:[#allocation2 + $0x170] sm:$0xff] %v2245_v35  ;;  %v2246_v38 = vadd.f32 %v2132_v36, %v1348_v32  ;;  %v1357_v32 = vld [vmem:[#allocation2 + $0x1c0] sm:$0xff] }
 0x233   :  { %2310 = vst [vmem:[#allocation2 + $0x178] sm:$0xff] %v2246_v38  ;;  %v1358_v38 = vld [vmem:[#allocation2 + $0x1c8] sm:$0xff] }
 0x234   :  { %v1847_v39 = vpop.f32.mrb[96].mxu0  ;;  %v2136_v41 = vpop.f32.mrb[96].mxu1 }
 0x235   :  { %v1849_v42 = vpop.f32.mrb[97].mxu0  ;;  %v2137_v43 = vadd.f32 %v2136_v41, %v1847_v39  ;;  %v2138_v44 = vpop.f32.mrb[97].mxu1 }
 0x236   :  { %v1850_v61 = vpop.f32.mrb[98].mxu0  ;;  %v2139_v46 = vpop.f32.mrb[98].mxu1 }
 0x237   :  { %v1852_v47 = vpop.f32.mrb[99].mxu0  ;;  %v2247_v49 = vadd.f32 %v2137_v43, %v1349_v40  ;;  %v2140_v50 = vadd.f32 %v2139_v46, %v1850_v61  ;;  %v2141_v51 = vpop.f32.mrb[99].mxu1 }
 0x239   :  { %2311 = vst [vmem:[#allocation2 + $0x180] sm:$0xff] %v2247_v49  ;;  %v2248_v52 = vadd.f32 %v2140_v50, %v1350_v45  ;;  %v1359_v45 = vld [vmem:[#allocation2 + $0x1d0] sm:$0xff] }
 0x23b   :  { %2312 = vst [vmem:[#allocation2 + $0x188] sm:$0xff] %v2248_v52  ;;  %v1360_v52 = vld [vmem:[#allocation2 + $0x1d8] sm:$0xff] }
 0x23c   :  { %v1855_v53 = vpop.f32.mrb[100].mxu0  ;;  %v2144_v55 = vpop.f32.mrb[100].mxu1 }
 0x23d   :  { %v1857_v56 = vpop.f32.mrb[101].mxu0  ;;  %v2145_v59 = vadd.f32 %v2144_v55, %v1855_v53  ;;  %v2146_v60 = vpop.f32.mrb[101].mxu1 }
 0x23e   :  { %v1858_v62 = vpop.f32.mrb[102].mxu0  ;;  %v2147_v0 = vpop.f32.mrb[102].mxu1 }
 0x23f   :  { %v1860_v1 = vpop.f32.mrb[103].mxu0  ;;  %v2249_v2 = vadd.f32 %v2145_v59, %v1351_v54  ;;  %v2148_v48 = vadd.f32 %v2147_v0, %v1858_v62  ;;  %v2149_v3 = vpop.f32.mrb[103].mxu1 }
 0x241   :  { %2313 = vst [vmem:[#allocation2 + $0x190] sm:$0xff] %v2249_v2  ;;  %v2250_v4 = vadd.f32 %v2148_v48, %v1352_v63  ;;  %v1361_v63 = vld [vmem:[#allocation2 + $0x1e0] sm:$0xff] }
 0x243   :  { %2314 = vst [vmem:[#allocation2 + $0x198] sm:$0xff] %v2250_v4  ;;  %v1362_v4 = vld [vmem:[#allocation2 + $0x1e8] sm:$0xff] }
 0x244   :  { %v1863_v5 = vpop.f32.mrb[104].mxu0  ;;  %v2152_v7 = vpop.f32.mrb[104].mxu1 }
 0x245   :  { %v1865_v8 = vpop.f32.mrb[105].mxu0  ;;  %v2153_v10 = vadd.f32 %v2152_v7, %v1863_v5  ;;  %v2154_v12 = vpop.f32.mrb[105].mxu1 }
 0x246   :  { %v1866_v13 = vpop.f32.mrb[106].mxu0  ;;  %v2155_v15 = vpop.f32.mrb[106].mxu1 }
 0x247   :  { %v1868_v16 = vpop.f32.mrb[107].mxu0  ;;  %v2251_v17 = vadd.f32 %v2153_v10, %v1353_v6  ;;  %v2156_v58 = vadd.f32 %v2155_v15, %v1866_v13  ;;  %v2157_v57 = vpop.f32.mrb[107].mxu1 }
 0x249   :  { %2315 = vst [vmem:[#allocation2 + $0x1a0] sm:$0xff] %v2251_v17  ;;  %v2252_v18 = vadd.f32 %v2156_v58, %v1354_v14  ;;  %v1363_v14 = vld [vmem:[#allocation2 + $0x1f0] sm:$0xff] }
 0x24b   :  { %2316 = vst [vmem:[#allocation2 + $0x1a8] sm:$0xff] %v2252_v18  ;;  %v1364_v18 = vld [vmem:[#allocation2 + $0x1f8] sm:$0xff] }
 0x24c   :  { %v1871_v19 = vpop.f32.mrb[108].mxu0  ;;  %v2160_v21 = vpop.f32.mrb[108].mxu1 }
 0x24d   :  { %v1873_v22 = vpop.f32.mrb[109].mxu0  ;;  %v2161_v23 = vadd.f32 %v2160_v21, %v1871_v19  ;;  %v2162_v24 = vpop.f32.mrb[109].mxu1 }
 0x24e   :  { %v1874_v25 = vpop.f32.mrb[110].mxu0  ;;  %v2163_v27 = vpop.f32.mrb[110].mxu1 }
 0x24f   :  { %v1876_v28 = vpop.f32.mrb[111].mxu0  ;;  %v2253_v9 = vadd.f32 %v2161_v23, %v1355_v20  ;;  %v2164_v29 = vadd.f32 %v2163_v27, %v1874_v25  ;;  %v2165_v11 = vpop.f32.mrb[111].mxu1 }
 0x251   :  { %2317 = vst [vmem:[#allocation2 + $0x1b0] sm:$0xff] %v2253_v9  ;;  %v2254_v30 = vadd.f32 %v2164_v29, %v1356_v26 }
 0x253   :  { %2318 = vst [vmem:[#allocation2 + $0x1b8] sm:$0xff] %v2254_v30 }
 0x254   :  { %v1879_v31 = vpop.f32.mrb[112].mxu0  ;;  %v2168_v33 = vpop.f32.mrb[112].mxu1 }
 0x255   :  { %v1881_v34 = vpop.f32.mrb[113].mxu0  ;;  %v2169_v35 = vadd.f32 %v2168_v33, %v1879_v31  ;;  %v2170_v36 = vpop.f32.mrb[113].mxu1 }
 0x256   :  { %v1882_v37 = vpop.f32.mrb[114].mxu0  ;;  %v2171_v39 = vpop.f32.mrb[114].mxu1 }
 0x257   :  { %v1884_v40 = vpop.f32.mrb[115].mxu0  ;;  %v2255_v41 = vadd.f32 %v2169_v35, %v1357_v32  ;;  %v2172_v42 = vadd.f32 %v2171_v39, %v1882_v37  ;;  %v2173_v43 = vpop.f32.mrb[115].mxu1 }
 0x259   :  { %2319 = vst [vmem:[#allocation2 + $0x1c0] sm:$0xff] %v2255_v41  ;;  %v2256_v44 = vadd.f32 %v2172_v42, %v1358_v38 }
 0x25b   :  { %2320 = vst [vmem:[#allocation2 + $0x1c8] sm:$0xff] %v2256_v44 }
 0x25c   :  { %v1887_v61 = vpop.f32.mrb[116].mxu0  ;;  %v2176_v46 = vpop.f32.mrb[116].mxu1 }
 0x25d   :  { %v1889_v47 = vpop.f32.mrb[117].mxu0  ;;  %v2177_v49 = vadd.f32 %v2176_v46, %v1887_v61  ;;  %v2178_v50 = vpop.f32.mrb[117].mxu1 }
 0x25e   :  { %v1890_v51 = vpop.f32.mrb[118].mxu0  ;;  %v2179_v53 = vpop.f32.mrb[118].mxu1 }
 0x25f   :  { %v1892_v54 = vpop.f32.mrb[119].mxu0  ;;  %v2257_v55 = vadd.f32 %v2177_v49, %v1359_v45  ;;  %v2180_v56 = vadd.f32 %v2179_v53, %v1890_v51  ;;  %v2181_v59 = vpop.f32.mrb[119].mxu1 }
 0x261   :  { %2321 = vst [vmem:[#allocation2 + $0x1d0] sm:$0xff] %v2257_v55  ;;  %v2258_v60 = vadd.f32 %v2180_v56, %v1360_v52 }
 0x263   :  { %2322 = vst [vmem:[#allocation2 + $0x1d8] sm:$0xff] %v2258_v60 }
 0x264   :  { %v1895_v62 = vpop.f32.mrb[120].mxu0  ;;  %v2184_v0 = vpop.f32.mrb[120].mxu1 }
 0x265   :  { %v1897_v1 = vpop.f32.mrb[121].mxu0  ;;  %v2185_v2 = vadd.f32 %v2184_v0, %v1895_v62  ;;  %v2186_v48 = vpop.f32.mrb[121].mxu1 }
 0x266   :  { %v1898_v3 = vpop.f32.mrb[122].mxu0  ;;  %v2187_v5 = vpop.f32.mrb[122].mxu1 }
 0x267   :  { %v1900_v6 = vpop.f32.mrb[123].mxu0  ;;  %v2259_v7 = vadd.f32 %v2185_v2, %v1361_v63  ;;  %v2188_v8 = vadd.f32 %v2187_v5, %v1898_v3  ;;  %v2189_v10 = vpop.f32.mrb[123].mxu1 }
 0x269   :  { %2323 = vst [vmem:[#allocation2 + $0x1e0] sm:$0xff] %v2259_v7  ;;  %v2260_v12 = vadd.f32 %v2188_v8, %v1362_v4 }
 0x26b   :  { %2324 = vst [vmem:[#allocation2 + $0x1e8] sm:$0xff] %v2260_v12 }
 0x26c   :  { %v1903_v13 = vpop.f32.mrb[124].mxu0  ;;  %v2192_v15 = vpop.f32.mrb[124].mxu1 }
 0x26d   :  { %v1905_v16 = vpop.f32.mrb[125].mxu0  ;;  %v2193_v17 = vadd.f32 %v2192_v15, %v1903_v13  ;;  %v2194_v58 = vpop.f32.mrb[125].mxu1 }
 0x26e   :  { %v1906_v57 = vpop.f32.mrb[126].mxu0  ;;  %v2195_v19 = vpop.f32.mrb[126].mxu1 }
 0x26f   :  { %v1908_v20 = vpop.f32.mrb[127].mxu0  ;;  %v2261_v21 = vadd.f32 %v2193_v17, %v1363_v14  ;;  %v2196_v22 = vadd.f32 %v2195_v19, %v1906_v57  ;;  %v2197_v23 = vpop.f32.mrb[127].mxu1 }
 0x271   :  { %2325 = vst [vmem:[#allocation2 + $0x1f0] sm:$0xff] %v2261_v21  ;;  %v2262_v24 = vadd.f32 %v2196_v22, %v1364_v18 }
 0x273   :  { %2326 = vst [vmem:[#allocation2 + $0x1f8] sm:$0xff] %v2262_v24 }
 0x274 PF:  { %v4977_v25 = vld [vmem:[#allocation11] sm:$0xff]   ;;  %v4978_v26 = vld [vmem:[#allocation11 + $0x8] sm:$0xff]   ;;  %v4979_v27 = vld [vmem:[#allocation11 + $0x10] sm:$0xff]  }
 0x275   :  { %4776 = vmatprep.subr.bf16.mxu0 %v4977_v25  ;;  %v4980_v28 = vld [vmem:[#allocation11 + $0x18] sm:$0xff]   ;;  %v2330_v9 = vld [vmem:[#allocation2] sm:$0xff]  ;;  %v2331_v29 = vld [vmem:[#allocation2 + $0x8] sm:$0xff] }
 0x276   :  { %4777 = vmatpush3.bf16.msra.mxu0 %v4977_v25  ;;  %v2394_v11 = vpack.c.bf16 %v2331_v29, %v2330_v9  ;;  %v4981_v30 = vld [vmem:[#allocation11 + $0x20] sm:$0xff]   ;;  %v4982_v31 = vld [vmem:[#allocation11 + $0x28] sm:$0xff]   ;;  %v4983_v32 = vld [vmem:[#allocation11 + $0x30] sm:$0xff]  }
 0x277   :  { %4778 = vmatprep.subr.bf16.mxu0 %v4978_v26  ;;  %v4984_v33 = vld [vmem:[#allocation11 + $0x38] sm:$0xff]   ;;  %v2332_v34 = vld [vmem:[#allocation2 + $0x10] sm:$0xff]  ;;  %v2334_v36 = vld [vmem:[#allocation2 + $0x20] sm:$0xff] }
 0x278   :  { %4792 = vmatprep.mubr.bf16.mxu0 %v2394_v11  ;;  %v2333_v35 = vld [vmem:[#allocation2 + $0x18] sm:$0xff]  ;;  %v2335_v37 = vld [vmem:[#allocation2 + $0x28] sm:$0xff]  ;;  %v4985_v39 = vld [vmem:[#allocation12] sm:$0xff]  }
 0x279   :  { %v2395_v38 = vpack.c.bf16 %v2333_v35, %v2332_v34  ;;  %v2396_v40 = vpack.c.bf16 %v2335_v37, %v2334_v36  ;;  %v4986_v41 = vld [vmem:[#allocation12 + $0x8] sm:$0xff]   ;;  %4856 = vmatprep.subr.bf16.mxu1 %v4985_v39  ;;  %v2336_v42 = vld [vmem:[#allocation2 + $0x30] sm:$0xff]  ;;  %v2337_v43 = vld [vmem:[#allocation2 + $0x38] sm:$0xff] }
 0x27a   :  { %4779 = vmatpush3.bf16.msra.mxu0 %v4978_v26  ;;  %4857 = vmatpush3.bf16.msra.mxu1 %v4985_v39  ;;  %v4987_v44 = vld [vmem:[#allocation12 + $0x10] sm:$0xff]   ;;  %v2338_v61 = vld [vmem:[#allocation2 + $0x40] sm:$0xff]  ;;  %v2339_v45 = vld [vmem:[#allocation2 + $0x48] sm:$0xff]  ;;  %v2397_v46 = vpack.c.bf16 %v2337_v43, %v2336_v42 }
 0x27b   :  { %4780 = vmatprep.subr.bf16.mxu0 %v4979_v27  ;;  %4858 = vmatprep.subr.bf16.mxu1 %v4986_v41  ;;  %v4988_v47 = vld [vmem:[#allocation12 + $0x18] sm:$0xff]   ;;  %v2398_v49 = vpack.c.bf16 %v2339_v45, %v2338_v61  ;;  %v4989_v50 = vld [vmem:[#allocation12 + $0x20] sm:$0xff]   ;;  %v2340_v51 = vld [vmem:[#allocation2 + $0x50] sm:$0xff] }
 0x27c   :  { %v2341_v52 = vld [vmem:[#allocation2 + $0x58] sm:$0xff]  ;;  %v2342_v53 = vld [vmem:[#allocation2 + $0x60] sm:$0xff]  ;;  %v2343_v54 = vld [vmem:[#allocation2 + $0x68] sm:$0xff] }
 0x27d   :  { %v2399_v55 = vpack.c.bf16 %v2341_v52, %v2340_v51  ;;  %v4990_v56 = vld [vmem:[#allocation12 + $0x28] sm:$0xff]   ;;  %v2400_v59 = vpack.c.bf16 %v2343_v54, %v2342_v53  ;;  %v2344_v60 = vld [vmem:[#allocation2 + $0x70] sm:$0xff]  ;;  %v2345_v62 = vld [vmem:[#allocation2 + $0x78] sm:$0xff] }
 0x27e   :  { %4781 = vmatpush3.bf16.msra.mxu0 %v4979_v27  ;;  %4859 = vmatpush3.bf16.msra.mxu1 %v4986_v41  ;;  %v2346_v63 = vld [vmem:[#allocation2 + $0x80] sm:$0xff]  ;;  %v2347_v0 = vld [vmem:[#allocation2 + $0x88] sm:$0xff]  ;;  %v2401_v1 = vpack.c.bf16 %v2345_v62, %v2344_v60  ;;  %v2348_v48 = vld [vmem:[#allocation2 + $0x90] sm:$0xff] }
 0x27f   :  { %4782 = vmatprep.subr.bf16.mxu0 %v4980_v28  ;;  %4860 = vmatprep.subr.bf16.mxu1 %v4987_v44  ;;  %v2402_v2 = vpack.c.bf16 %v2347_v0, %v2346_v63  ;;  %v2349_v3 = vld [vmem:[#allocation2 + $0x98] sm:$0xff]  ;;  %v2350_v4 = vld [vmem:[#allocation2 + $0xa0] sm:$0xff]  ;;  %v2351_v5 = vld [vmem:[#allocation2 + $0xa8] sm:$0xff] }
 0x280   :  { %v2403_v6 = vpack.c.bf16 %v2349_v3, %v2348_v48  ;;  %v2404_v7 = vpack.c.bf16 %v2351_v5, %v2350_v4  ;;  %v2352_v8 = vld [vmem:[#allocation2 + $0xb0] sm:$0xff]  ;;  %v2353_v10 = vld [vmem:[#allocation2 + $0xb8] sm:$0xff]  ;;  %v2354_v12 = vld [vmem:[#allocation2 + $0xc0] sm:$0xff] }
 0x281   :  { %v2355_v13 = vld [vmem:[#allocation2 + $0xc8] sm:$0xff]  ;;  %v2405_v14 = vpack.c.bf16 %v2353_v10, %v2352_v8  ;;  %v2356_v16 = vld [vmem:[#allocation2 + $0xd0] sm:$0xff]  ;;  %v2357_v17 = vld [vmem:[#allocation2 + $0xd8] sm:$0xff] }
 0x282   :  { %4783 = vmatpush3.bf16.msra.mxu0 %v4980_v28  ;;  %4861 = vmatpush3.bf16.msra.mxu1 %v4987_v44  ;;  %v2406_v15 = vpack.c.bf16 %v2355_v13, %v2354_v12  ;;  %v2358_v58 = vld [vmem:[#allocation2 + $0xe0] sm:$0xff]  ;;  %v2359_v57 = vld [vmem:[#allocation2 + $0xe8] sm:$0xff]  ;;  %v2407_v18 = vpack.c.bf16 %v2357_v17, %v2356_v16  ;;  %v2360_v20 = vld [vmem:[#allocation2 + $0xf0] sm:$0xff] }
 0x283   :  { %4784 = vmatprep.subr.bf16.mxu0 %v4981_v30  ;;  %4862 = vmatprep.subr.bf16.mxu1 %v4988_v47  ;;  %v2408_v19 = vpack.c.bf16 %v2359_v57, %v2358_v58  ;;  %v2361_v21 = vld [vmem:[#allocation2 + $0xf8] sm:$0xff]  ;;  %v2362_v22 = vld [vmem:[#allocation2 + $0x100] sm:$0xff]  ;;  %v2363_v23 = vld [vmem:[#allocation2 + $0x108] sm:$0xff] }
 0x284   :  { %v2409_v24 = vpack.c.bf16 %v2361_v21, %v2360_v20  ;;  %v2410_v25 = vpack.c.bf16 %v2363_v23, %v2362_v22  ;;  %v2364_v26 = vld [vmem:[#allocation2 + $0x110] sm:$0xff]  ;;  %v2365_v27 = vld [vmem:[#allocation2 + $0x118] sm:$0xff]  ;;  %v2366_v28 = vld [vmem:[#allocation2 + $0x120] sm:$0xff] }
 0x285   :  { %v2367_v9 = vld [vmem:[#allocation2 + $0x128] sm:$0xff]  ;;  %v2411_v29 = vpack.c.bf16 %v2365_v27, %v2364_v26  ;;  %v2372_v36 = vld [vmem:[#allocation2 + $0x150] sm:$0xff]  ;;  %v2373_v37 = vld [vmem:[#allocation2 + $0x158] sm:$0xff] }
 0x286   :  { %4785 = vmatpush3.bf16.msra.mxu0 %v4981_v30  ;;  %4863 = vmatpush3.bf16.msra.mxu1 %v4988_v47  ;;  %v2412_v11 = vpack.c.bf16 %v2367_v9, %v2366_v28  ;;  %v2368_v30 = vld [vmem:[#allocation2 + $0x130] sm:$0xff]  ;;  %v2375_v39 = vld [vmem:[#allocation2 + $0x168] sm:$0xff]  ;;  %v2377_v43 = vld [vmem:[#allocation2 + $0x178] sm:$0xff] }
 0x287   :  { %4786 = vmatprep.subr.bf16.mxu0 %v4982_v31  ;;  %4864 = vmatprep.subr.bf16.mxu1 %v4989_v50  ;;  %v2376_v42 = vld [vmem:[#allocation2 + $0x170] sm:$0xff]  ;;  %v2378_v44 = vld [vmem:[#allocation2 + $0x180] sm:$0xff]  ;;  %v2379_v61 = vld [vmem:[#allocation2 + $0x188] sm:$0xff] }
 0x288   :  { %v2417_v45 = vpack.c.bf16 %v2377_v43, %v2376_v42  ;;  %v2418_v47 = vpack.c.bf16 %v2379_v61, %v2378_v44  ;;  %v2381_v51 = vld [vmem:[#allocation2 + $0x198] sm:$0xff]  ;;  %v2382_v52 = vld [vmem:[#allocation2 + $0x1a0] sm:$0xff]  ;;  %v2383_v53 = vld [vmem:[#allocation2 + $0x1a8] sm:$0xff] }
 0x289   :  { %v2386_v60 = vld [vmem:[#allocation2 + $0x1c0] sm:$0xff]  ;;  %v2387_v62 = vld [vmem:[#allocation2 + $0x1c8] sm:$0xff] }
 0x28a   :  { %4787 = vmatpush3.bf16.msra.mxu0 %v4982_v31  ;;  %4865 = vmatpush3.bf16.msra.mxu1 %v4989_v50  ;;  %v2369_v31 = vld [vmem:[#allocation2 + $0x138] sm:$0xff]  ;;  %v2380_v50 = vld [vmem:[#allocation2 + $0x190] sm:$0xff]  ;;  %v2422_v0 = vpack.c.bf16 %v2387_v62, %v2386_v60  ;;  %v2390_v48 = vld [vmem:[#allocation2 + $0x1e0] sm:$0xff] }
 0x28b   :  { %4788 = vmatprep.subr.bf16.mxu0 %v4983_v32  ;;  %4866 = vmatprep.subr.bf16.mxu1 %v4990_v56  ;;  %v2413_v34 = vpack.c.bf16 %v2369_v31, %v2368_v30  ;;  %v2419_v54 = vpack.c.bf16 %v2381_v51, %v2380_v50  ;;  %v2391_v3 = vld [vmem:[#allocation2 + $0x1e8] sm:$0xff]  ;;  %v5793_v10 = vld [vmem:[%s5949_s6] ss:$0 sm:$0xff] }
 0x28c   :  { %v2424_v5 = vpack.c.bf16 %v2391_v3, %v2390_v48 }
 0x28e   :  { %4789 = vmatpush3.bf16.msra.mxu0 %v4983_v32  ;;  %4867 = vmatpush3.bf16.msra.mxu1 %v4990_v56  ;;  %v2370_v32 = vld [vmem:[#allocation2 + $0x140] sm:$0xff]  ;;  %v2384_v56 = vld [vmem:[#allocation2 + $0x1b0] sm:$0xff] }
 0x28f   :  { %4790 = vmatprep.subr.bf16.mxu0 %v4984_v33 }
 0x292   :  { %4791 = vmatpush3.bf16.msra.mxu0 %v4984_v33  ;;  %v2371_v33 = vld [vmem:[#allocation2 + $0x148] sm:$0xff] }
 0x293   :  { %v2414_v35 = vpack.c.bf16 %v2371_v33, %v2370_v32 }
 0x295   :  { %4793 = vmatmul.mubr.bf16.vlgmr.msra.gmra.mrb[0].mxu0 %v2395_v38  ;;  %v2374_v38 = vld [vmem:[#allocation2 + $0x160] sm:$0xff] }
 0x296   :  { %4796 = vmatprep.mubr.bf16.mxu0 %v2396_v40  ;;  %v2415_v40 = vpack.c.bf16 %v2373_v37, %v2372_v36  ;;  %v2416_v41 = vpack.c.bf16 %v2375_v39, %v2374_v38 }
 0x29d   :  { %4797 = vmatmul.mubr.bf16.gmra.mrb[4].mxu0 %v2397_v46  ;;  %v4991_v46 = vld [vmem:[#allocation12 + $0x30] sm:$0xff]  }
 0x29e   :  { %4800 = vmatprep.mubr.bf16.mxu0 %v2398_v49  ;;  %4868 = vmatprep.subr.bf16.mxu1 %v4991_v46  ;;  %v4992_v49 = vld [vmem:[#allocation12 + $0x38] sm:$0xff]  }
 0x29f   :  { %4869 = vmatpush3.bf16.msra.mxu1 %v4991_v46 }
 0x2a0   :  { %4870 = vmatprep.subr.bf16.mxu1 %v4992_v49 }
 0x2a3   :  { %4871 = vmatpush3.bf16.msra.mxu1 %v4992_v49 }
 0x2a5   :  { %4801 = vmatmul.mubr.bf16.gmra.mrb[8].mxu0 %v2399_v55  ;;  %v2420_v55 = vpack.c.bf16 %v2383_v53, %v2382_v52 }
 0x2a6   :  { %4804 = vmatprep.mubr.bf16.mxu0 %v2400_v59  ;;  %v2385_v59 = vld [vmem:[#allocation2 + $0x1b8] sm:$0xff] }
 0x2a7   :  { %v2421_v63 = vpack.c.bf16 %v2385_v59, %v2384_v56 }
 0x2ad   :  { %4805 = vmatmul.mubr.bf16.gmra.mrb[12].mxu0 %v2401_v1  ;;  %v2388_v1 = vld [vmem:[#allocation2 + $0x1d0] sm:$0xff] }
 0x2ae   :  { %4808 = vmatprep.mubr.bf16.mxu0 %v2402_v2  ;;  %v2389_v2 = vld [vmem:[#allocation2 + $0x1d8] sm:$0xff] }
 0x2af   :  { %v2423_v4 = vpack.c.bf16 %v2389_v2, %v2388_v1 }
 0x2b5   :  { %4809 = vmatmul.mubr.bf16.gmra.mrb[16].mxu0 %v2403_v6  ;;  %v2392_v6 = vld [vmem:[#allocation2 + $0x1f0] sm:$0xff] }
 0x2b6   :  { %4812 = vmatprep.mubr.bf16.mxu0 %v2404_v7  ;;  %v2393_v7 = vld [vmem:[#allocation2 + $0x1f8] sm:$0xff] }
 0x2b7   :  { %v2425_v8 = vpack.c.bf16 %v2393_v7, %v2392_v6 }
 0x2bd   :  { %4813 = vmatmul.mubr.bf16.gmra.mrb[20].mxu0 %v2405_v14 }
 0x2be   :  { %4816 = vmatprep.mubr.bf16.mxu0 %v2406_v15 }
 0x2c5   :  { %4817 = vmatmul.mubr.bf16.gmra.mrb[24].mxu0 %v2407_v18 }
 0x2c6   :  { %4820 = vmatprep.mubr.bf16.mxu0 %v2408_v19 }
 0x2cd   :  { %4821 = vmatmul.mubr.bf16.gmra.mrb[28].mxu0 %v2409_v24 }
 0x2ce   :  { %4824 = vmatprep.mubr.bf16.mxu0 %v2410_v25 }
 0x2d5   :  { %4825 = vmatmul.mubr.bf16.gmra.mrb[32].mxu0 %v2411_v29 }
 0x2d6   :  { %4828 = vmatprep.mubr.bf16.mxu0 %v2412_v11 }
 0x2dd   :  { %4829 = vmatmul.mubr.bf16.gmra.mrb[36].mxu0 %v2413_v34 }
 0x2de   :  { %4832 = vmatprep.mubr.bf16.mxu0 %v2414_v35 }
 0x2e5   :  { %4833 = vmatmul.mubr.bf16.gmra.mrb[40].mxu0 %v2415_v40 }
 0x2e6   :  { %4836 = vmatprep.mubr.bf16.mxu0 %v2416_v41 }
 0x2ed   :  { %4837 = vmatmul.mubr.bf16.gmra.mrb[44].mxu0 %v2417_v45 }
 0x2ee   :  { %4840 = vmatprep.mubr.bf16.mxu0 %v2418_v47 }
 0x2f5   :  { %4841 = vmatmul.mubr.bf16.gmra.mrb[48].mxu0 %v2419_v54 }
 0x2f6   :  { %4844 = vmatprep.mubr.bf16.mxu0 %v2420_v55 }
 0x2fd   :  { %4845 = vmatmul.mubr.bf16.gmra.mrb[52].mxu0 %v2421_v63 }
 0x2fe   :  { %4848 = vmatprep.mubr.bf16.mxu0 %v2422_v0 }
 0x305   :  { %4849 = vmatmul.mubr.bf16.gmra.mrb[56].mxu0 %v2423_v4 }
 0x306   :  { %4852 = vmatprep.mubr.bf16.mxu0 %v2424_v5 }
 0x30d   :  { %4853 = vmatmul.mubr.bf16.gmra.mrb[60].mxu0 %v2425_v8 }
 0x368   :  { %v4794_v12 = vpop.f32.mrb[0].mxu0 }
 0x369   :  { %v2540_v13 = vadd.f32 %v4794_v12, %v5793_v10  ;;  %v2531_v14 = vpop.f32.mrb[1].mxu0 }
 0x36a   :  { %v2532_v15 = vadd.f32 %v5793_v10, %v2531_v14  ;;  %v4795_v16 = vpop.f32.mrb[2].mxu0 }
 0x36b   :  { %v2543_v17 = vadd.f32 %v4795_v16, %v5793_v10  ;;  %v2534_v58 = vpop.f32.mrb[3].mxu0  ;;  %v2788_v18 = vmax.f32 %v2540_v13, 0.0 }
 0x36c   :  { %v2535_v57 = vadd.f32 %v5793_v10, %v2534_v58  ;;  %v2786_v20 = vmax.f32 %v2532_v15, 0.0 }
 0x36d   :  { %v2789_v19 = vmax.f32 %v2543_v17, 0.0 }
 0x36e   :  { %v2787_v21 = vmax.f32 %v2535_v57, 0.0 }
 0x36f   :  { %v2851_v22 = vpack.c.bf16 %v2789_v19, %v2788_v18 }
 0x370   :  { %v4798_v23 = vpop.f32.mrb[4].mxu0  ;;  %v2850_v24 = vpack.c.bf16 %v2787_v21, %v2786_v20 }
 0x371   :  { %v2556_v25 = vadd.f32 %v4798_v23, %v5793_v10  ;;  %v2547_v26 = vpop.f32.mrb[5].mxu0 }
 0x372   :  { %v2548_v27 = vadd.f32 %v5793_v10, %v2547_v26  ;;  %v4799_v28 = vpop.f32.mrb[6].mxu0  ;;  %4872 = vmatprep.mubr.bf16.mxu1 %v2850_v24 }
 0x373   :  { %v2559_v9 = vadd.f32 %v4799_v28, %v5793_v10  ;;  %v2550_v29 = vpop.f32.mrb[7].mxu0  ;;  %4873 = vmatmul.mubr.bf16.vlgmr.msra.gmra.mrb[0].mxu1 %v2851_v22  ;;  %v2792_v30 = vmax.f32 %v2556_v25, 0.0 }
 0x374   :  { %v2551_v11 = vadd.f32 %v5793_v10, %v2550_v29  ;;  %v2790_v32 = vmax.f32 %v2548_v27, 0.0 }
 0x375   :  { %v2793_v31 = vmax.f32 %v2559_v9, 0.0 }
 0x376   :  { %v2791_v33 = vmax.f32 %v2551_v11, 0.0 }
 0x377   :  { %v2853_v34 = vpack.c.bf16 %v2793_v31, %v2792_v30 }
 0x378   :  { %v2852_v35 = vpack.c.bf16 %v2791_v33, %v2790_v32  ;;  %v4802_v36 = vpop.f32.mrb[8].mxu0 }
 0x379   :  { %v2572_v37 = vadd.f32 %v4802_v36, %v5793_v10  ;;  %v2563_v38 = vpop.f32.mrb[9].mxu0 }
 0x37a   :  { %v2564_v39 = vadd.f32 %v5793_v10, %v2563_v38  ;;  %v4803_v40 = vpop.f32.mrb[10].mxu0  ;;  %4876 = vmatprep.mubr.bf16.mxu1 %v2852_v35 }
 0x37b   :  { %v2575_v41 = vadd.f32 %v4803_v40, %v5793_v10  ;;  %v2566_v42 = vpop.f32.mrb[11].mxu0  ;;  %4877 = vmatmul.mubr.bf16.gmra.mrb[4].mxu1 %v2853_v34  ;;  %v2796_v44 = vmax.f32 %v2572_v37, 0.0 }
 0x37c   :  { %v2567_v43 = vadd.f32 %v5793_v10, %v2566_v42  ;;  %v2794_v45 = vmax.f32 %v2564_v39, 0.0 }
 0x37d   :  { %v2797_v61 = vmax.f32 %v2575_v41, 0.0 }
 0x37e   :  { %v2795_v46 = vmax.f32 %v2567_v43, 0.0 }
 0x37f   :  { %v2855_v47 = vpack.c.bf16 %v2797_v61, %v2796_v44 }
 0x380   :  { %v2854_v49 = vpack.c.bf16 %v2795_v46, %v2794_v45  ;;  %v4806_v50 = vpop.f32.mrb[12].mxu0 }
 0x381   :  { %v2588_v51 = vadd.f32 %v4806_v50, %v5793_v10  ;;  %v2579_v52 = vpop.f32.mrb[13].mxu0 }
 0x382   :  { %v2580_v53 = vadd.f32 %v5793_v10, %v2579_v52  ;;  %v4807_v54 = vpop.f32.mrb[14].mxu0  ;;  %4880 = vmatprep.mubr.bf16.mxu1 %v2854_v49 }
 0x383   :  { %v2591_v55 = vadd.f32 %v4807_v54, %v5793_v10  ;;  %v2582_v56 = vpop.f32.mrb[15].mxu0  ;;  %4881 = vmatmul.mubr.bf16.gmra.mrb[8].mxu1 %v2855_v47  ;;  %v2800_v60 = vmax.f32 %v2588_v51, 0.0 }
 0x384   :  { %v2583_v59 = vadd.f32 %v5793_v10, %v2582_v56  ;;  %v2798_v63 = vmax.f32 %v2580_v53, 0.0 }
 0x385   :  { %v2801_v62 = vmax.f32 %v2591_v55, 0.0 }
 0x386   :  { %v2799_v0 = vmax.f32 %v2583_v59, 0.0 }
 0x387   :  { %v2857_v1 = vpack.c.bf16 %v2801_v62, %v2800_v60 }
 0x388   :  { %v2856_v2 = vpack.c.bf16 %v2799_v0, %v2798_v63  ;;  %v4810_v48 = vpop.f32.mrb[16].mxu0 }
 0x389   :  { %v2604_v3 = vadd.f32 %v4810_v48, %v5793_v10  ;;  %v2595_v4 = vpop.f32.mrb[17].mxu0 }
 0x38a   :  { %v2596_v5 = vadd.f32 %v5793_v10, %v2595_v4  ;;  %v4811_v6 = vpop.f32.mrb[18].mxu0  ;;  %4884 = vmatprep.mubr.bf16.mxu1 %v2856_v2 }
 0x38b   :  { %v2607_v7 = vadd.f32 %v4811_v6, %v5793_v10  ;;  %v2598_v8 = vpop.f32.mrb[19].mxu0  ;;  %4885 = vmatmul.mubr.bf16.gmra.mrb[12].mxu1 %v2857_v1  ;;  %v2804_v13 = vmax.f32 %v2604_v3, 0.0 }
 0x38c   :  { %v2599_v12 = vadd.f32 %v5793_v10, %v2598_v8  ;;  %v2802_v15 = vmax.f32 %v2596_v5, 0.0 }
 0x38d   :  { %v2805_v14 = vmax.f32 %v2607_v7, 0.0 }
 0x38e   :  { %v2803_v16 = vmax.f32 %v2599_v12, 0.0 }
 0x38f   :  { %v2859_v17 = vpack.c.bf16 %v2805_v14, %v2804_v13 }
 0x390   :  { %v2858_v58 = vpack.c.bf16 %v2803_v16, %v2802_v15  ;;  %v4814_v57 = vpop.f32.mrb[20].mxu0 }
 0x391   :  { %v2620_v18 = vadd.f32 %v4814_v57, %v5793_v10  ;;  %v2611_v19 = vpop.f32.mrb[21].mxu0 }
 0x392   :  { %v2612_v20 = vadd.f32 %v5793_v10, %v2611_v19  ;;  %v4815_v21 = vpop.f32.mrb[22].mxu0  ;;  %4888 = vmatprep.mubr.bf16.mxu1 %v2858_v58 }
 0x393   :  { %v2623_v22 = vadd.f32 %v4815_v21, %v5793_v10  ;;  %v2614_v23 = vpop.f32.mrb[23].mxu0  ;;  %4889 = vmatmul.mubr.bf16.gmra.mrb[16].mxu1 %v2859_v17  ;;  %v2808_v25 = vmax.f32 %v2620_v18, 0.0 }
 0x394   :  { %v2615_v24 = vadd.f32 %v5793_v10, %v2614_v23  ;;  %v2806_v27 = vmax.f32 %v2612_v20, 0.0 }
 0x395   :  { %v2809_v26 = vmax.f32 %v2623_v22, 0.0 }
 0x396   :  { %v2807_v28 = vmax.f32 %v2615_v24, 0.0 }
 0x397   :  { %v2861_v9 = vpack.c.bf16 %v2809_v26, %v2808_v25 }
 0x398   :  { %v2860_v29 = vpack.c.bf16 %v2807_v28, %v2806_v27  ;;  %v4818_v11 = vpop.f32.mrb[24].mxu0 }
 0x399   :  { %v2636_v30 = vadd.f32 %v4818_v11, %v5793_v10  ;;  %v2627_v31 = vpop.f32.mrb[25].mxu0 }
 0x39a   :  { %v2628_v32 = vadd.f32 %v5793_v10, %v2627_v31  ;;  %v4819_v33 = vpop.f32.mrb[26].mxu0  ;;  %4892 = vmatprep.mubr.bf16.mxu1 %v2860_v29 }
 0x39b   :  { %v2639_v34 = vadd.f32 %v4819_v33, %v5793_v10  ;;  %v2630_v35 = vpop.f32.mrb[27].mxu0  ;;  %4893 = vmatmul.mubr.bf16.gmra.mrb[20].mxu1 %v2861_v9  ;;  %v2812_v37 = vmax.f32 %v2636_v30, 0.0 }
 0x39c   :  { %v2631_v36 = vadd.f32 %v5793_v10, %v2630_v35  ;;  %v2810_v39 = vmax.f32 %v2628_v32, 0.0 }
 0x39d   :  { %v2813_v38 = vmax.f32 %v2639_v34, 0.0 }
 0x39e   :  { %v2811_v40 = vmax.f32 %v2631_v36, 0.0 }
 0x39f   :  { %v2863_v41 = vpack.c.bf16 %v2813_v38, %v2812_v37 }
 0x3a0   :  { %v2862_v42 = vpack.c.bf16 %v2811_v40, %v2810_v39  ;;  %v4822_v43 = vpop.f32.mrb[28].mxu0 }
 0x3a1   :  { %v2652_v44 = vadd.f32 %v4822_v43, %v5793_v10  ;;  %v2643_v61 = vpop.f32.mrb[29].mxu0 }
 0x3a2   :  { %v2644_v45 = vadd.f32 %v5793_v10, %v2643_v61  ;;  %v4823_v46 = vpop.f32.mrb[30].mxu0  ;;  %4896 = vmatprep.mubr.bf16.mxu1 %v2862_v42 }
 0x3a3   :  { %v2655_v47 = vadd.f32 %v4823_v46, %v5793_v10  ;;  %v2646_v49 = vpop.f32.mrb[31].mxu0  ;;  %4897 = vmatmul.mubr.bf16.gmra.mrb[24].mxu1 %v2863_v41  ;;  %v2816_v51 = vmax.f32 %v2652_v44, 0.0 }
 0x3a4   :  { %v2647_v50 = vadd.f32 %v5793_v10, %v2646_v49  ;;  %v2814_v53 = vmax.f32 %v2644_v45, 0.0 }
 0x3a5   :  { %v2817_v52 = vmax.f32 %v2655_v47, 0.0 }
 0x3a6   :  { %v2815_v54 = vmax.f32 %v2647_v50, 0.0 }
 0x3a7   :  { %v2865_v55 = vpack.c.bf16 %v2817_v52, %v2816_v51 }
 0x3a8   :  { %v2864_v56 = vpack.c.bf16 %v2815_v54, %v2814_v53  ;;  %v4826_v59 = vpop.f32.mrb[32].mxu0 }
 0x3a9   :  { %v2668_v60 = vadd.f32 %v4826_v59, %v5793_v10  ;;  %v2659_v62 = vpop.f32.mrb[33].mxu0 }
 0x3aa   :  { %v2660_v63 = vadd.f32 %v5793_v10, %v2659_v62  ;;  %v4827_v0 = vpop.f32.mrb[34].mxu0  ;;  %4900 = vmatprep.mubr.bf16.mxu1 %v2864_v56 }
 0x3ab   :  { %v2671_v1 = vadd.f32 %v4827_v0, %v5793_v10  ;;  %v2662_v2 = vpop.f32.mrb[35].mxu0  ;;  %4901 = vmatmul.mubr.bf16.gmra.mrb[28].mxu1 %v2865_v55  ;;  %v2820_v3 = vmax.f32 %v2668_v60, 0.0 }
 0x3ac   :  { %v2663_v48 = vadd.f32 %v5793_v10, %v2662_v2  ;;  %v2818_v5 = vmax.f32 %v2660_v63, 0.0 }
 0x3ad   :  { %v2821_v4 = vmax.f32 %v2671_v1, 0.0 }
 0x3ae   :  { %v2819_v6 = vmax.f32 %v2663_v48, 0.0 }
 0x3af   :  { %v2867_v7 = vpack.c.bf16 %v2821_v4, %v2820_v3 }
 0x3b0   :  { %v2866_v8 = vpack.c.bf16 %v2819_v6, %v2818_v5  ;;  %v4830_v12 = vpop.f32.mrb[36].mxu0 }
 0x3b1   :  { %v2684_v13 = vadd.f32 %v4830_v12, %v5793_v10  ;;  %v2675_v14 = vpop.f32.mrb[37].mxu0 }
 0x3b2   :  { %v2676_v15 = vadd.f32 %v5793_v10, %v2675_v14  ;;  %v4831_v16 = vpop.f32.mrb[38].mxu0  ;;  %4904 = vmatprep.mubr.bf16.mxu1 %v2866_v8 }
 0x3b3   :  { %v2687_v17 = vadd.f32 %v4831_v16, %v5793_v10  ;;  %v2678_v58 = vpop.f32.mrb[39].mxu0  ;;  %4905 = vmatmul.mubr.bf16.gmra.mrb[32].mxu1 %v2867_v7  ;;  %v2824_v18 = vmax.f32 %v2684_v13, 0.0 }
 0x3b4   :  { %v2679_v57 = vadd.f32 %v5793_v10, %v2678_v58  ;;  %v2822_v20 = vmax.f32 %v2676_v15, 0.0 }
 0x3b5   :  { %v2825_v19 = vmax.f32 %v2687_v17, 0.0 }
 0x3b6   :  { %v2823_v21 = vmax.f32 %v2679_v57, 0.0 }
 0x3b7   :  { %v2869_v22 = vpack.c.bf16 %v2825_v19, %v2824_v18 }
 0x3b8   :  { %v2868_v23 = vpack.c.bf16 %v2823_v21, %v2822_v20  ;;  %v4834_v24 = vpop.f32.mrb[40].mxu0 }
 0x3b9   :  { %v2700_v25 = vadd.f32 %v4834_v24, %v5793_v10  ;;  %v2691_v26 = vpop.f32.mrb[41].mxu0 }
 0x3ba   :  { %v2692_v27 = vadd.f32 %v5793_v10, %v2691_v26  ;;  %v4835_v28 = vpop.f32.mrb[42].mxu0  ;;  %4908 = vmatprep.mubr.bf16.mxu1 %v2868_v23 }
 0x3bb   :  { %v2703_v9 = vadd.f32 %v4835_v28, %v5793_v10  ;;  %v2694_v29 = vpop.f32.mrb[43].mxu0  ;;  %4909 = vmatmul.mubr.bf16.gmra.mrb[36].mxu1 %v2869_v22  ;;  %v2828_v30 = vmax.f32 %v2700_v25, 0.0 }
 0x3bc   :  { %v2695_v11 = vadd.f32 %v5793_v10, %v2694_v29  ;;  %v2826_v32 = vmax.f32 %v2692_v27, 0.0 }
 0x3bd   :  { %v2829_v31 = vmax.f32 %v2703_v9, 0.0 }
 0x3be   :  { %v2827_v33 = vmax.f32 %v2695_v11, 0.0 }
 0x3bf   :  { %v2871_v34 = vpack.c.bf16 %v2829_v31, %v2828_v30 }
 0x3c0   :  { %v2870_v35 = vpack.c.bf16 %v2827_v33, %v2826_v32  ;;  %v4838_v36 = vpop.f32.mrb[44].mxu0 }
 0x3c1   :  { %v2716_v37 = vadd.f32 %v4838_v36, %v5793_v10  ;;  %v2707_v38 = vpop.f32.mrb[45].mxu0 }
 0x3c2   :  { %v2708_v39 = vadd.f32 %v5793_v10, %v2707_v38  ;;  %v4839_v40 = vpop.f32.mrb[46].mxu0  ;;  %4912 = vmatprep.mubr.bf16.mxu1 %v2870_v35 }
 0x3c3   :  { %v2719_v41 = vadd.f32 %v4839_v40, %v5793_v10  ;;  %v2710_v42 = vpop.f32.mrb[47].mxu0  ;;  %4913 = vmatmul.mubr.bf16.gmra.mrb[40].mxu1 %v2871_v34  ;;  %v2832_v44 = vmax.f32 %v2716_v37, 0.0 }
 0x3c4   :  { %v2711_v43 = vadd.f32 %v5793_v10, %v2710_v42  ;;  %v2830_v45 = vmax.f32 %v2708_v39, 0.0 }
 0x3c5   :  { %v2833_v61 = vmax.f32 %v2719_v41, 0.0 }
 0x3c6   :  { %v2831_v46 = vmax.f32 %v2711_v43, 0.0  ;;  %v5862_v43 = vld [vmem:[%s5951_s8] ss:$0 sm:$0xff]  ;;  %s5121_s8 = smov [#allocation14]  }
 0x3c7   :  { %v2873_v47 = vpack.c.bf16 %v2833_v61, %v2832_v44  ;;  %s3631_s26 = sshll.u32 %s5121_s8, 4  ;;  %s3632_s26 = int_to_ptr.vmem [resolvable:$true] %s3631_s26 }
 0x3c8   :  { %v2872_v49 = vpack.c.bf16 %v2831_v46, %v2830_v45  ;;  %v4842_v50 = vpop.f32.mrb[48].mxu0  ;;  %s5083_s29 = scalar_lea.vmem %s3632_s26, 4096  ;;  %p5088_p11 = scmp.lt.s32.totalorder %s3632_s26, %s3632_s26 }
 0x3c9   :  { %v2732_v51 = vadd.f32 %v4842_v50, %v5793_v10  ;;  %v2723_v52 = vpop.f32.mrb[49].mxu0  ;;  %p5084_p10 = scmp.ne.s32.totalorder %s3632_s26, %s5083_s29  ;;  %p5089_p12 = scmp.lt.s32.totalorder %s5083_s29, %s5083_s29 }
 0x3ca   :  { %v2724_v53 = vadd.f32 %v5793_v10, %v2723_v52  ;;  %v4843_v54 = vpop.f32.mrb[50].mxu0  ;;  %4916 = vmatprep.mubr.bf16.mxu1 %v2872_v49 }
 0x3cb   :  { %v2735_v55 = vadd.f32 %v4843_v54, %v5793_v10  ;;  %v2726_v56 = vpop.f32.mrb[51].mxu0  ;;  %4917 = vmatmul.mubr.bf16.gmra.mrb[44].mxu1 %v2873_v47  ;;  %v2836_v60 = vmax.f32 %v2732_v51, 0.0  ;;  %p5090_p13 = por %p5089_p12, %p5088_p11 }
 0x3cc   :  { %v2727_v59 = vadd.f32 %v5793_v10, %v2726_v56  ;;  %v2834_v63 = vmax.f32 %v2724_v53, 0.0 }
 0x3cd   :  { %v2837_v62 = vmax.f32 %v2735_v55, 0.0  ;;  %p5091_p0 = pnand %p5090_p13, %p5084_p10 }
 0x3ce   :  { %v2835_v0 = vmax.f32 %v2727_v59, 0.0 }
 0x3cf   :  { %v2875_v1 = vpack.c.bf16 %v2837_v62, %v2836_v60 }
 0x3d0   :  { %v2874_v2 = vpack.c.bf16 %v2835_v0, %v2834_v63  ;;  %v4846_v48 = vpop.f32.mrb[52].mxu0 }
 0x3d1   :  { %v2748_v3 = vadd.f32 %v4846_v48, %v5793_v10  ;;  %v2739_v4 = vpop.f32.mrb[53].mxu0 }
 0x3d2   :  { %v2740_v5 = vadd.f32 %v5793_v10, %v2739_v4  ;;  %v4847_v6 = vpop.f32.mrb[54].mxu0  ;;  %4920 = vmatprep.mubr.bf16.mxu1 %v2874_v2 }
 0x3d3   :  { %v2751_v7 = vadd.f32 %v4847_v6, %v5793_v10  ;;  %v2742_v8 = vpop.f32.mrb[55].mxu0  ;;  %4921 = vmatmul.mubr.bf16.gmra.mrb[48].mxu1 %v2875_v1  ;;  %v2840_v13 = vmax.f32 %v2748_v3, 0.0 }
 0x3d4   :  { %v2743_v12 = vadd.f32 %v5793_v10, %v2742_v8  ;;  %v2838_v15 = vmax.f32 %v2740_v5, 0.0 }
 0x3d5   :  { %v2841_v14 = vmax.f32 %v2751_v7, 0.0 }
 0x3d6   :  { %v2839_v16 = vmax.f32 %v2743_v12, 0.0 }
 0x3d7   :  { %v2877_v17 = vpack.c.bf16 %v2841_v14, %v2840_v13 }
 0x3d8   :  { %v2876_v58 = vpack.c.bf16 %v2839_v16, %v2838_v15  ;;  %v4850_v57 = vpop.f32.mrb[56].mxu0 }
 0x3d9   :  { %v2764_v18 = vadd.f32 %v4850_v57, %v5793_v10  ;;  %v2755_v19 = vpop.f32.mrb[57].mxu0 }
 0x3da   :  { %v2756_v20 = vadd.f32 %v5793_v10, %v2755_v19  ;;  %v4851_v21 = vpop.f32.mrb[58].mxu0  ;;  %4924 = vmatprep.mubr.bf16.mxu1 %v2876_v58 }
 0x3db   :  { %v2767_v22 = vadd.f32 %v4851_v21, %v5793_v10  ;;  %v2758_v23 = vpop.f32.mrb[59].mxu0  ;;  %4925 = vmatmul.mubr.bf16.gmra.mrb[52].mxu1 %v2877_v17  ;;  %v2844_v25 = vmax.f32 %v2764_v18, 0.0 }
 0x3dc   :  { %v2759_v24 = vadd.f32 %v5793_v10, %v2758_v23  ;;  %v2842_v27 = vmax.f32 %v2756_v20, 0.0 }
 0x3dd   :  { %v2845_v26 = vmax.f32 %v2767_v22, 0.0 }
 0x3de   :  { %v2843_v28 = vmax.f32 %v2759_v24, 0.0 }
 0x3df   :  { %v2879_v9 = vpack.c.bf16 %v2845_v26, %v2844_v25 }
 0x3e0   :  { %v2878_v29 = vpack.c.bf16 %v2843_v28, %v2842_v27  ;;  %v4854_v11 = vpop.f32.mrb[60].mxu0 }
 0x3e1   :  { %v2780_v30 = vadd.f32 %v4854_v11, %v5793_v10  ;;  %v2771_v31 = vpop.f32.mrb[61].mxu0 }
 0x3e2   :  { %v2772_v32 = vadd.f32 %v5793_v10, %v2771_v31  ;;  %v4855_v33 = vpop.f32.mrb[62].mxu0  ;;  %4928 = vmatprep.mubr.bf16.mxu1 %v2878_v29 }
 0x3e3   :  { %v2783_v34 = vadd.f32 %v4855_v33, %v5793_v10  ;;  %v2774_v35 = vpop.f32.mrb[63].mxu0  ;;  %4929 = vmatmul.mubr.bf16.gmra.mrb[56].mxu1 %v2879_v9  ;;  %v2848_v37 = vmax.f32 %v2780_v30, 0.0 }
 0x3e4   :  { %v2775_v36 = vadd.f32 %v5793_v10, %v2774_v35  ;;  %v2846_v39 = vmax.f32 %v2772_v32, 0.0 }
 0x3e5   :  { %v2849_v38 = vmax.f32 %v2783_v34, 0.0 }
 0x3e6   :  { %v2847_v40 = vmax.f32 %v2775_v36, 0.0 }
 0x3e7   :  { %v2881_v41 = vpack.c.bf16 %v2849_v38, %v2848_v37 }
 0x3e8   :  { %v2880_v42 = vpack.c.bf16 %v2847_v40, %v2846_v39 }
 0x3ea   :  { %4932 = vmatprep.mubr.bf16.mxu1 %v2880_v42 }
 0x3eb   :  { %4933 = vmatmul.mubr.bf16.gmra.mrb[60].mxu1 %v2881_v41 }
 0x446   :  { %v4874_v44 = vpop.f32.mrb[0].mxu1 }
 0x447   :  { %v2996_v61 = vadd.f32 %v4874_v44, %v5862_v43  ;;  %v2987_v45 = vpop.f32.mrb[1].mxu1 }
 0x448   :  { %v2988_v46 = vadd.f32 %v5862_v43, %v2987_v45  ;;  %v4875_v10 = vpop.f32.mrb[2].mxu1 }
 0x449   :  { %v2999_v47 = vadd.f32 %v4875_v10, %v5862_v43  ;;  %v2990_v49 = vpop.f32.mrb[3].mxu1  ;;  %v3244_v51 = vmax.f32 %v2996_v61, 0.0 }
 0x44a   :  { %v2991_v50 = vadd.f32 %v5862_v43, %v2990_v49  ;;  %v3242_v53 = vmax.f32 %v2988_v46, 0.0 }
 0x44b   :  { %v3245_v52 = vmax.f32 %v2999_v47, 0.0 }
 0x44c   :  { %v3243_v54 = vmax.f32 %v2991_v50, 0.0 }
 0x44d   :  { %v4482_v55 = vpack.c.bf16 %v3245_v52, %v3244_v51 }
 0x44e   :  { %v4477_v56 = vpack.c.bf16 %v3243_v54, %v3242_v53  ;;  %v4878_v59 = vpop.f32.mrb[4].mxu1 }
 0x44f   :  { %4665 = vst [vmem:[#allocation14 + $0x8] sm:$0xff] %v4482_v55   ;;  %v3012_v60 = vadd.f32 %v4878_v59, %v5862_v43  ;;  %v3003_v62 = vpop.f32.mrb[5].mxu1 }
 0x450   :  { %4478 = vst [vmem:[#allocation14] sm:$0xff] %v4477_v56   ;;  %v3004_v63 = vadd.f32 %v5862_v43, %v3003_v62  ;;  %v4879_v0 = vpop.f32.mrb[6].mxu1 }
 0x451   :  { %v3015_v1 = vadd.f32 %v4879_v0, %v5862_v43  ;;  %v3006_v2 = vpop.f32.mrb[7].mxu1  ;;  %v3248_v3 = vmax.f32 %v3012_v60, 0.0 }
 0x452   :  { %v3007_v48 = vadd.f32 %v5862_v43, %v3006_v2  ;;  %v3246_v5 = vmax.f32 %v3004_v63, 0.0 }
 0x453   :  { %v3249_v4 = vmax.f32 %v3015_v1, 0.0 }
 0x454   :  { %v3247_v6 = vmax.f32 %v3007_v48, 0.0 }
 0x455   :  { %v4492_v7 = vpack.c.bf16 %v3249_v4, %v3248_v3 }
 0x456   :  { %v4487_v8 = vpack.c.bf16 %v3247_v6, %v3246_v5  ;;  %v4882_v12 = vpop.f32.mrb[8].mxu1 }
 0x457   :  { %4667 = vst [vmem:[#allocation14 + $0x18] sm:$0xff] %v4492_v7   ;;  %v3028_v13 = vadd.f32 %v4882_v12, %v5862_v43  ;;  %v3019_v14 = vpop.f32.mrb[9].mxu1 }
 0x458   :  { %4666 = vst [vmem:[#allocation14 + $0x10] sm:$0xff] %v4487_v8   ;;  %v3020_v15 = vadd.f32 %v5862_v43, %v3019_v14  ;;  %v4883_v16 = vpop.f32.mrb[10].mxu1 }
 0x459   :  { %v3031_v17 = vadd.f32 %v4883_v16, %v5862_v43  ;;  %v3022_v58 = vpop.f32.mrb[11].mxu1  ;;  %v3252_v18 = vmax.f32 %v3028_v13, 0.0 }
 0x45a   :  { %v3023_v57 = vadd.f32 %v5862_v43, %v3022_v58  ;;  %v3250_v20 = vmax.f32 %v3020_v15, 0.0 }
 0x45b   :  { %v3253_v19 = vmax.f32 %v3031_v17, 0.0 }
 0x45c   :  { %v3251_v21 = vmax.f32 %v3023_v57, 0.0 }
 0x45d   :  { %v4502_v22 = vpack.c.bf16 %v3253_v19, %v3252_v18 }
 0x45e   :  { %v4497_v23 = vpack.c.bf16 %v3251_v21, %v3250_v20  ;;  %v4886_v24 = vpop.f32.mrb[12].mxu1 }
 0x45f   :  { %4669 = vst [vmem:[#allocation14 + $0x28] sm:$0xff] %v4502_v22   ;;  %v3044_v25 = vadd.f32 %v4886_v24, %v5862_v43  ;;  %v3035_v26 = vpop.f32.mrb[13].mxu1 }
 0x460   :  { %4668 = vst [vmem:[#allocation14 + $0x20] sm:$0xff] %v4497_v23   ;;  %v3036_v27 = vadd.f32 %v5862_v43, %v3035_v26  ;;  %v4887_v28 = vpop.f32.mrb[14].mxu1 }
 0x461   :  { %v3047_v9 = vadd.f32 %v4887_v28, %v5862_v43  ;;  %v3038_v29 = vpop.f32.mrb[15].mxu1  ;;  %v3256_v30 = vmax.f32 %v3044_v25, 0.0 }
 0x462   :  { %v3039_v11 = vadd.f32 %v5862_v43, %v3038_v29  ;;  %v3254_v32 = vmax.f32 %v3036_v27, 0.0 }
 0x463   :  { %v3257_v31 = vmax.f32 %v3047_v9, 0.0 }
 0x464   :  { %v3255_v33 = vmax.f32 %v3039_v11, 0.0 }
 0x465   :  { %v4512_v34 = vpack.c.bf16 %v3257_v31, %v3256_v30 }
 0x466   :  { %v4507_v35 = vpack.c.bf16 %v3255_v33, %v3254_v32  ;;  %v4890_v36 = vpop.f32.mrb[16].mxu1 }
 0x467   :  { %4671 = vst [vmem:[#allocation14 + $0x38] sm:$0xff] %v4512_v34   ;;  %v3060_v37 = vadd.f32 %v4890_v36, %v5862_v43  ;;  %v3051_v38 = vpop.f32.mrb[17].mxu1 }
 0x468   :  { %4670 = vst [vmem:[#allocation14 + $0x30] sm:$0xff] %v4507_v35   ;;  %v3052_v39 = vadd.f32 %v5862_v43, %v3051_v38  ;;  %v4891_v40 = vpop.f32.mrb[18].mxu1 }
 0x469   :  { %v3063_v41 = vadd.f32 %v4891_v40, %v5862_v43  ;;  %v3054_v42 = vpop.f32.mrb[19].mxu1  ;;  %v3260_v61 = vmax.f32 %v3060_v37, 0.0 }
 0x46a   :  { %v3055_v44 = vadd.f32 %v5862_v43, %v3054_v42  ;;  %v3258_v46 = vmax.f32 %v3052_v39, 0.0 }
 0x46b   :  { %v3261_v45 = vmax.f32 %v3063_v41, 0.0 }
 0x46c   :  { %v3259_v10 = vmax.f32 %v3055_v44, 0.0 }
 0x46d   :  { %v4522_v47 = vpack.c.bf16 %v3261_v45, %v3260_v61 }
 0x46e   :  { %v4517_v49 = vpack.c.bf16 %v3259_v10, %v3258_v46  ;;  %v4894_v50 = vpop.f32.mrb[20].mxu1 }
 0x46f   :  { %4673 = vst [vmem:[#allocation14 + $0x48] sm:$0xff] %v4522_v47   ;;  %v3076_v51 = vadd.f32 %v4894_v50, %v5862_v43  ;;  %v3067_v52 = vpop.f32.mrb[21].mxu1 }
 0x470   :  { %4672 = vst [vmem:[#allocation14 + $0x40] sm:$0xff] %v4517_v49   ;;  %v3068_v53 = vadd.f32 %v5862_v43, %v3067_v52  ;;  %v4895_v54 = vpop.f32.mrb[22].mxu1 }
 0x471   :  { %v3079_v55 = vadd.f32 %v4895_v54, %v5862_v43  ;;  %v3070_v56 = vpop.f32.mrb[23].mxu1  ;;  %v3264_v60 = vmax.f32 %v3076_v51, 0.0 }
 0x472   :  { %v3071_v59 = vadd.f32 %v5862_v43, %v3070_v56  ;;  %v3262_v63 = vmax.f32 %v3068_v53, 0.0 }
 0x473   :  { %v3265_v62 = vmax.f32 %v3079_v55, 0.0 }
 0x474   :  { %v3263_v0 = vmax.f32 %v3071_v59, 0.0 }
 0x475   :  { %v4532_v1 = vpack.c.bf16 %v3265_v62, %v3264_v60 }
 0x476   :  { %v4527_v2 = vpack.c.bf16 %v3263_v0, %v3262_v63  ;;  %v4898_v48 = vpop.f32.mrb[24].mxu1 }
 0x477   :  { %4675 = vst [vmem:[#allocation14 + $0x58] sm:$0xff] %v4532_v1   ;;  %v3092_v3 = vadd.f32 %v4898_v48, %v5862_v43  ;;  %v3083_v4 = vpop.f32.mrb[25].mxu1 }
 0x478   :  { %4674 = vst [vmem:[#allocation14 + $0x50] sm:$0xff] %v4527_v2   ;;  %v3084_v5 = vadd.f32 %v5862_v43, %v3083_v4  ;;  %v4899_v6 = vpop.f32.mrb[26].mxu1 }
 0x479   :  { %v3095_v7 = vadd.f32 %v4899_v6, %v5862_v43  ;;  %v3086_v8 = vpop.f32.mrb[27].mxu1  ;;  %v3268_v13 = vmax.f32 %v3092_v3, 0.0 }
 0x47a   :  { %v3087_v12 = vadd.f32 %v5862_v43, %v3086_v8  ;;  %v3266_v15 = vmax.f32 %v3084_v5, 0.0 }
 0x47b   :  { %v3269_v14 = vmax.f32 %v3095_v7, 0.0 }
 0x47c   :  { %v3267_v16 = vmax.f32 %v3087_v12, 0.0 }
 0x47d   :  { %v4542_v17 = vpack.c.bf16 %v3269_v14, %v3268_v13 }
 0x47e   :  { %v4537_v58 = vpack.c.bf16 %v3267_v16, %v3266_v15  ;;  %v4902_v57 = vpop.f32.mrb[28].mxu1 }
 0x47f   :  { %4677 = vst [vmem:[#allocation14 + $0x68] sm:$0xff] %v4542_v17   ;;  %v3108_v18 = vadd.f32 %v4902_v57, %v5862_v43  ;;  %v3099_v19 = vpop.f32.mrb[29].mxu1 }
 0x480   :  { %4676 = vst [vmem:[#allocation14 + $0x60] sm:$0xff] %v4537_v58   ;;  %v3100_v20 = vadd.f32 %v5862_v43, %v3099_v19  ;;  %v4903_v21 = vpop.f32.mrb[30].mxu1 }
 0x481   :  { %v3111_v22 = vadd.f32 %v4903_v21, %v5862_v43  ;;  %v3102_v23 = vpop.f32.mrb[31].mxu1  ;;  %v3272_v25 = vmax.f32 %v3108_v18, 0.0 }
 0x482   :  { %v3103_v24 = vadd.f32 %v5862_v43, %v3102_v23  ;;  %v3270_v27 = vmax.f32 %v3100_v20, 0.0 }
 0x483   :  { %v3273_v26 = vmax.f32 %v3111_v22, 0.0 }
 0x484   :  { %v3271_v28 = vmax.f32 %v3103_v24, 0.0 }
 0x485   :  { %v4552_v9 = vpack.c.bf16 %v3273_v26, %v3272_v25 }
 0x486   :  { %v4547_v29 = vpack.c.bf16 %v3271_v28, %v3270_v27  ;;  %v4906_v11 = vpop.f32.mrb[32].mxu1 }
 0x487   :  { %4679 = vst [vmem:[#allocation14 + $0x78] sm:$0xff] %v4552_v9   ;;  %v3124_v30 = vadd.f32 %v4906_v11, %v5862_v43  ;;  %v3115_v31 = vpop.f32.mrb[33].mxu1 }
 0x488   :  { %4678 = vst [vmem:[#allocation14 + $0x70] sm:$0xff] %v4547_v29   ;;  %v3116_v32 = vadd.f32 %v5862_v43, %v3115_v31  ;;  %v4907_v33 = vpop.f32.mrb[34].mxu1 }
 0x489   :  { %v3127_v34 = vadd.f32 %v4907_v33, %v5862_v43  ;;  %v3118_v35 = vpop.f32.mrb[35].mxu1  ;;  %v3276_v37 = vmax.f32 %v3124_v30, 0.0 }
 0x48a   :  { %v3119_v36 = vadd.f32 %v5862_v43, %v3118_v35  ;;  %v3274_v39 = vmax.f32 %v3116_v32, 0.0 }
 0x48b   :  { %v3277_v38 = vmax.f32 %v3127_v34, 0.0 }
 0x48c   :  { %v3275_v40 = vmax.f32 %v3119_v36, 0.0 }
 0x48d   :  { %v4562_v41 = vpack.c.bf16 %v3277_v38, %v3276_v37 }
 0x48e   :  { %v4557_v42 = vpack.c.bf16 %v3275_v40, %v3274_v39  ;;  %v4910_v44 = vpop.f32.mrb[36].mxu1 }
 0x48f   :  { %4681 = vst [vmem:[#allocation14 + $0x88] sm:$0xff] %v4562_v41   ;;  %v3140_v61 = vadd.f32 %v4910_v44, %v5862_v43  ;;  %v3131_v45 = vpop.f32.mrb[37].mxu1 }
 0x490   :  { %4680 = vst [vmem:[#allocation14 + $0x80] sm:$0xff] %v4557_v42   ;;  %v3132_v46 = vadd.f32 %v5862_v43, %v3131_v45  ;;  %v4911_v10 = vpop.f32.mrb[38].mxu1 }
 0x491   :  { %v3143_v47 = vadd.f32 %v4911_v10, %v5862_v43  ;;  %v3134_v49 = vpop.f32.mrb[39].mxu1  ;;  %v3280_v51 = vmax.f32 %v3140_v61, 0.0 }
 0x492   :  { %v3135_v50 = vadd.f32 %v5862_v43, %v3134_v49  ;;  %v3278_v53 = vmax.f32 %v3132_v46, 0.0 }
 0x493   :  { %v3281_v52 = vmax.f32 %v3143_v47, 0.0 }
 0x494   :  { %v3279_v54 = vmax.f32 %v3135_v50, 0.0 }
 0x495   :  { %v4572_v55 = vpack.c.bf16 %v3281_v52, %v3280_v51 }
 0x496   :  { %v4567_v56 = vpack.c.bf16 %v3279_v54, %v3278_v53  ;;  %v4914_v59 = vpop.f32.mrb[40].mxu1 }
 0x497   :  { %4683 = vst [vmem:[#allocation14 + $0x98] sm:$0xff] %v4572_v55   ;;  %v3156_v60 = vadd.f32 %v4914_v59, %v5862_v43  ;;  %v3147_v62 = vpop.f32.mrb[41].mxu1 }
 0x498   :  { %4682 = vst [vmem:[#allocation14 + $0x90] sm:$0xff] %v4567_v56   ;;  %v3148_v63 = vadd.f32 %v5862_v43, %v3147_v62  ;;  %v4915_v0 = vpop.f32.mrb[42].mxu1 }
 0x499   :  { %v3159_v1 = vadd.f32 %v4915_v0, %v5862_v43  ;;  %v3150_v2 = vpop.f32.mrb[43].mxu1  ;;  %v3284_v3 = vmax.f32 %v3156_v60, 0.0 }
 0x49a   :  { %v3151_v48 = vadd.f32 %v5862_v43, %v3150_v2  ;;  %v3282_v5 = vmax.f32 %v3148_v63, 0.0 }
 0x49b   :  { %v3285_v4 = vmax.f32 %v3159_v1, 0.0 }
 0x49c   :  { %v3283_v6 = vmax.f32 %v3151_v48, 0.0 }
 0x49d   :  { %v4582_v7 = vpack.c.bf16 %v3285_v4, %v3284_v3 }
 0x49e   :  { %v4577_v8 = vpack.c.bf16 %v3283_v6, %v3282_v5  ;;  %v4918_v12 = vpop.f32.mrb[44].mxu1 }
 0x49f   :  { %4685 = vst [vmem:[#allocation14 + $0xa8] sm:$0xff] %v4582_v7   ;;  %v3172_v13 = vadd.f32 %v4918_v12, %v5862_v43  ;;  %v3163_v14 = vpop.f32.mrb[45].mxu1 }
 0x4a0   :  { %4684 = vst [vmem:[#allocation14 + $0xa0] sm:$0xff] %v4577_v8   ;;  %v3164_v15 = vadd.f32 %v5862_v43, %v3163_v14  ;;  %v4919_v16 = vpop.f32.mrb[46].mxu1 }
 0x4a1   :  { %v3175_v17 = vadd.f32 %v4919_v16, %v5862_v43  ;;  %v3166_v58 = vpop.f32.mrb[47].mxu1  ;;  %v3288_v18 = vmax.f32 %v3172_v13, 0.0 }
 0x4a2   :  { %v3167_v57 = vadd.f32 %v5862_v43, %v3166_v58  ;;  %v3286_v20 = vmax.f32 %v3164_v15, 0.0 }
 0x4a3   :  { %v3289_v19 = vmax.f32 %v3175_v17, 0.0 }
 0x4a4   :  { %v3287_v21 = vmax.f32 %v3167_v57, 0.0 }
 0x4a5   :  { %v4592_v22 = vpack.c.bf16 %v3289_v19, %v3288_v18 }
 0x4a6   :  { %v4587_v23 = vpack.c.bf16 %v3287_v21, %v3286_v20  ;;  %v4922_v24 = vpop.f32.mrb[48].mxu1 }
 0x4a7   :  { %4687 = vst [vmem:[#allocation14 + $0xb8] sm:$0xff] %v4592_v22   ;;  %v3188_v25 = vadd.f32 %v4922_v24, %v5862_v43  ;;  %v3179_v26 = vpop.f32.mrb[49].mxu1 }
 0x4a8   :  { %4686 = vst [vmem:[#allocation14 + $0xb0] sm:$0xff] %v4587_v23   ;;  %v3180_v27 = vadd.f32 %v5862_v43, %v3179_v26  ;;  %v4923_v28 = vpop.f32.mrb[50].mxu1 }
 0x4a9   :  { %v3191_v9 = vadd.f32 %v4923_v28, %v5862_v43  ;;  %v3182_v29 = vpop.f32.mrb[51].mxu1  ;;  %v3292_v30 = vmax.f32 %v3188_v25, 0.0 }
 0x4aa   :  { %v3183_v11 = vadd.f32 %v5862_v43, %v3182_v29  ;;  %v3290_v32 = vmax.f32 %v3180_v27, 0.0 }
 0x4ab   :  { %v3293_v31 = vmax.f32 %v3191_v9, 0.0 }
 0x4ac   :  { %v3291_v33 = vmax.f32 %v3183_v11, 0.0 }
 0x4ad   :  { %v4602_v34 = vpack.c.bf16 %v3293_v31, %v3292_v30 }
 0x4ae   :  { %v4597_v35 = vpack.c.bf16 %v3291_v33, %v3290_v32  ;;  %v4926_v36 = vpop.f32.mrb[52].mxu1 }
 0x4af   :  { %4689 = vst [vmem:[#allocation14 + $0xc8] sm:$0xff] %v4602_v34   ;;  %v3204_v37 = vadd.f32 %v4926_v36, %v5862_v43  ;;  %v3195_v38 = vpop.f32.mrb[53].mxu1 }
 0x4b0   :  { %4688 = vst [vmem:[#allocation14 + $0xc0] sm:$0xff] %v4597_v35   ;;  %v3196_v39 = vadd.f32 %v5862_v43, %v3195_v38  ;;  %v4927_v40 = vpop.f32.mrb[54].mxu1 }
 0x4b1   :  { %v3207_v41 = vadd.f32 %v4927_v40, %v5862_v43  ;;  %v3198_v42 = vpop.f32.mrb[55].mxu1  ;;  %v3296_v61 = vmax.f32 %v3204_v37, 0.0 }
 0x4b2   :  { %v3199_v44 = vadd.f32 %v5862_v43, %v3198_v42  ;;  %v3294_v46 = vmax.f32 %v3196_v39, 0.0 }
 0x4b3   :  { %v3297_v45 = vmax.f32 %v3207_v41, 0.0 }
 0x4b4   :  { %v3295_v10 = vmax.f32 %v3199_v44, 0.0 }
 0x4b5   :  { %v4612_v47 = vpack.c.bf16 %v3297_v45, %v3296_v61 }
 0x4b6   :  { %v4607_v49 = vpack.c.bf16 %v3295_v10, %v3294_v46  ;;  %v4930_v50 = vpop.f32.mrb[56].mxu1 }
 0x4b7   :  { %4691 = vst [vmem:[#allocation14 + $0xd8] sm:$0xff] %v4612_v47   ;;  %v3220_v51 = vadd.f32 %v4930_v50, %v5862_v43  ;;  %v3211_v52 = vpop.f32.mrb[57].mxu1 }
 0x4b8   :  { %4690 = vst [vmem:[#allocation14 + $0xd0] sm:$0xff] %v4607_v49   ;;  %v3212_v53 = vadd.f32 %v5862_v43, %v3211_v52  ;;  %v4931_v54 = vpop.f32.mrb[58].mxu1 }
 0x4b9   :  { %v3223_v55 = vadd.f32 %v4931_v54, %v5862_v43  ;;  %v3214_v56 = vpop.f32.mrb[59].mxu1  ;;  %v3300_v60 = vmax.f32 %v3220_v51, 0.0 }
 0x4ba   :  { %v3215_v59 = vadd.f32 %v5862_v43, %v3214_v56  ;;  %v3298_v63 = vmax.f32 %v3212_v53, 0.0 }
 0x4bb   :  { %v3301_v62 = vmax.f32 %v3223_v55, 0.0 }
 0x4bc   :  { %v3299_v0 = vmax.f32 %v3215_v59, 0.0 }
 0x4bd   :  { %v4622_v1 = vpack.c.bf16 %v3301_v62, %v3300_v60 }
 0x4be   :  { %v4617_v2 = vpack.c.bf16 %v3299_v0, %v3298_v63  ;;  %v4934_v48 = vpop.f32.mrb[60].mxu1 }
 0x4bf   :  { %4693 = vst [vmem:[#allocation14 + $0xe8] sm:$0xff] %v4622_v1   ;;  %v3236_v3 = vadd.f32 %v4934_v48, %v5862_v43  ;;  %v3227_v4 = vpop.f32.mrb[61].mxu1 }
 0x4c0   :  { %4692 = vst [vmem:[#allocation14 + $0xe0] sm:$0xff] %v4617_v2   ;;  %v3228_v5 = vadd.f32 %v5862_v43, %v3227_v4  ;;  %v4935_v6 = vpop.f32.mrb[62].mxu1 }
 0x4c1   :  { %v3239_v7 = vadd.f32 %v4935_v6, %v5862_v43  ;;  %v3230_v8 = vpop.f32.mrb[63].mxu1  ;;  %v3304_v13 = vmax.f32 %v3236_v3, 0.0 }
 0x4c2   :  { %v3231_v12 = vadd.f32 %v5862_v43, %v3230_v8  ;;  %v3302_v15 = vmax.f32 %v3228_v5, 0.0 }
 0x4c3   :  { %v3305_v14 = vmax.f32 %v3239_v7, 0.0 }
 0x4c4   :  { %v3303_v16 = vmax.f32 %v3231_v12, 0.0 }
 0x4c5   :  { %v4632_v17 = vpack.c.bf16 %v3305_v14, %v3304_v13 }
 0x4c6   :  { %v4627_v58 = vpack.c.bf16 %v3303_v16, %v3302_v15 }
 0x4c7   :  { %4695 = vst [vmem:[#allocation14 + $0xf8] sm:$0xff] %v4632_v17  }
 0x4c8   :  { %4694 = vst [vmem:[#allocation14 + $0xf0] sm:$0xff] %v4627_v58  }
 0x4c9   :  { %5094 = shalt.err (!%p5091_p0)
}
 0x4ca   :  { %s5095_s11 = scalar_lea.hbm %s5952_s9, 4096 }
 0x4cb   :  { %p5096_p1 = scmp.ne.s32.totalorder %s5952_s9, %s5095_s11  ;;  %p5099_p2 = scmp.lt.u32.totalorder %s5095_s11, %s5952_s9 }
 0x4cd   :  { %p5101_p3 = pnand %p5099_p2, %p5096_p1 }
 0x4cf   :  { %5104 = shalt.err (!%p5101_p3)
}
 0x4d0   :  { %3637 = dma.vmem_to_hbm [thread:$0]  %s3632_s26, 4096, %s5952_s9, [#allocation8], %s5114_s24, %s5114_s24, %s5115_s25  }
 0x4d1   :  { %5111 = dma.done.wait [#allocation8], 4096  }
 0x4d2   :  { %5112 = vsyncadd [#allocation8], 4294963200 }
 0x4d3   :  { %3641 = vsyncpa [#allocation7], 1 }
 0x4d4   :  { %3642 = vsyncpa [#allocation10], 1 }
 0x4d5   :  { %3643 = vsyncpa [#allocation13], 1 }
 0x4d6   :  { %3644 = vsyncpa [#allocation8], 1 }

</bundles_post_ra>
